<compile_context>
chip_gen: v7x
topology: tpu7x:2x2x1
jax: 0.10.0
libtpu: 0.0.40
codegen_flags: <defaults>
</compile_context>

<pallas_src>
import math

import jax
import jax.numpy as jnp
from jax.experimental import pallas as pl
from jax.experimental.pallas import tpu as pltpu

D_IN = 192    # LayerNorm / Linear in_features
D_OUT = 768   # Linear out_features
LN_EPS = 1e-6
_INV_SQRT2 = 1.0 / math.sqrt(2.0)


def _round_up(a, b):
    return ((a + b - 1) // b) * b


def _num_tensorcores():
    # v7x has 2 TensorCores per chip; v5e/v6e have 1. Used only to bias the
    # row-tile choice toward even grid-step counts (megacore load balance).
    try:
        kind = jax.devices()[0].device_kind.lower()
    except Exception:
        return 1
    return 2 if "v7" in kind else 1


def _pick_block_rows(m, cap=1024, num_tc=1):
    """Largest divisor of m that is a multiple of 8 (sublane) and <= cap.

    When running on a 2-TC chip, prefer divisors that give an even number of
    grid steps so both TensorCores get equal work. Returns None if no
    suitable divisor exists (caller falls back to a padded grid).
    """
    cands = [d for d in range(8, min(m, cap) + 1, 8) if m % d == 0]
    if not cands:
        return None
    if num_tc > 1:
        balanced = [d for d in cands if (m // d) % num_tc == 0]
        if balanced:
            return max(balanced)
    return max(cands)


def _ln_linear_gelu_kernel(x_ref, w_ref, b_ref, o_ref):
    # x_ref: (tm, D_IN) input rows
    # w_ref: (D_IN, D_OUT) bf16, LayerNorm gamma already folded in
    # b_ref: (1, D_OUT) f32, equals beta @ W^T + bias
    # o_ref: (tm, D_OUT)
    x = x_ref[...].astype(jnp.float32)

    # --- LayerNorm (normalization only; affine folded into W'/b') ---
    mean = jnp.mean(x, axis=-1, keepdims=True)
    xc = x - mean
    var = jnp.mean(xc * xc, axis=-1, keepdims=True)
    xn = xc * jax.lax.rsqrt(var + LN_EPS)

    # --- Linear 192 -> 768 on the MXU: bf16 operands, f32 accumulation ---
    z = jnp.dot(xn.astype(w_ref.dtype), w_ref[...],
                preferred_element_type=jnp.float32)
    z = z + b_ref[...]

    # --- GELU, exact (erf) variant to match approximate='none'.
    # Kept in f32: erf lowering for bf16 is not guaranteed, and exact erf is
    # what the module specifies.
    g = 0.5 * z * (1.0 + jax.lax.erf(z * _INV_SQRT2))

    o_ref[...] = g.astype(o_ref.dtype)


def layernorm_linear_gelu(x, gamma, beta, weight, bias, *,
                          block_rows=None, out_dtype=None,
                          mxu_dtype=jnp.bfloat16):
    """Fused LayerNorm(192) -> Linear(192->768) -> GELU(exact).

    x: (..., 192) channels-last tensor. weight: (768, 192) PyTorch convention.
    out_dtype defaults to bf16 (halves the dominant output HBM traffic);
    pass jnp.float32 to match PyTorch's dtype exactly.
    """
    orig_shape = x.shape
    assert orig_shape[-1] == D_IN
    x2 = x.reshape(-1, D_IN)
    m = x2.shape[0]
    out_dtype = jnp.bfloat16 if out_dtype is None else out_dtype

    # Fold the LayerNorm affine into the matmul:
    #   z = (xn*gamma + beta) @ W^T + bias = xn @ (gamma[:,None]*W^T) + (beta@W^T + bias)
    # Done once in the wrapper (hoisted/cached by XLA under jit). Weight is
    # cast to bf16 so the MXU runs single-pass at full rate and the resident
    # VMEM weight is halved (288 KiB).
    w_prime = (weight.astype(jnp.float32)
               * gamma.astype(jnp.float32)[None, :]).T.astype(mxu_dtype)   # (192, 768)
    b_prime = (beta.astype(jnp.float32) @ weight.T.astype(jnp.float32)
               + bias.astype(jnp.float32)).reshape(1, D_OUT)               # (1, 768) f32

    # Row-tile selection: prefer a tile that exactly divides M so no pad /
    # output slice (each of those is an extra HBM round trip of x or of the
    # 4x-larger output). Large tiles (<=1024 rows) amortize per-step overhead;
    # on 2-TC chips prefer an even number of grid steps.
    num_tc = _num_tensorcores()
    if block_rows is None:
        block_rows = _pick_block_rows(m, cap=1024, num_tc=num_tc)

    pad_needed = (block_rows is None) or (m % block_rows != 0)
    if pad_needed:
        # Fallback path for M with no 8-multiple divisor: zero-pad rows
        # (LayerNorm of a zero row is finite; padded rows are sliced off).
        if block_rows is None:
            block_rows = 512 if m >= 1024 else max(8, _round_up(m, 8))
        m_padded = _round_up(m, block_rows)
        x2 = jnp.pad(x2, ((0, m_padded - m), (0, 0)))
    else:
        m_padded = m
    grid = m_padded // block_rows

    out = pl.pallas_call(
        _ln_linear_gelu_kernel,
        out_shape=jax.ShapeDtypeStruct((m_padded, D_OUT), out_dtype),
        grid_spec=pltpu.PrefetchScalarGridSpec(
            num_scalar_prefetch=0,
            grid=(grid,),
            in_specs=[
                pl.BlockSpec((block_rows, D_IN), lambda i: (i, 0)),
                # Constant index_map -> the (bf16) weight and folded bias stay
                # VMEM-resident across all grid steps (no per-step re-DMA).
                pl.BlockSpec((D_IN, D_OUT), lambda i: (0, 0)),
                pl.BlockSpec((1, D_OUT), lambda i: (0, 0)),
            ],
            out_specs=pl.BlockSpec((block_rows, D_OUT), lambda i: (i, 0)),
        ),
        compiler_params=pltpu.CompilerParams(
            dimension_semantics=("parallel",)),
    )(x2, w_prime, b_prime)

    if pad_needed:
        out = out[:m]
    return out.reshape(*orig_shape[:-1], D_OUT)


def _reference(x, gamma, beta, weight, bias):
    xf = x.astype(jnp.float32)
    mean = jnp.mean(xf, axis=-1, keepdims=True)
    var = jnp.mean((xf - mean) ** 2, axis=-1, keepdims=True)
    xn = (xf - mean) * jax.lax.rsqrt(var + LN_EPS)
    y = xn * gamma + beta
    z = y @ weight.T + bias
    return 0.5 * z * (1.0 + jax.lax.erf(z * _INV_SQRT2))


if __name__ == "__main__":
    key = jax.random.PRNGKey(0)
    k_x, k_w, k_b, k_g, k_be = jax.random.split(key, 5)

    # Small-but-consistent shapes: N=1, H=W=16, C=192 (C fixed by the module).
    x = jax.random.normal(k_x, (1, 16, 16, D_IN), dtype=jnp.float32)

    # Non-trivial affine params so the gamma/beta folding is actually tested.
    gamma = 1.0 + 0.1 * jax.random.normal(k_g, (D_IN,), jnp.float32)
    beta = 0.1 * jax.random.normal(k_be, (D_IN,), jnp.float32)
    bound = 1.0 / math.sqrt(D_IN)
    weight = jax.random.uniform(k_w, (D_OUT, D_IN), jnp.float32, -bound, bound)
    bias = jax.random.uniform(k_b, (D_OUT,), jnp.float32, -bound, bound)

    out = layernorm_linear_gelu(x, gamma, beta, weight, bias)
    out = jax.block_until_ready(out)

    ref = _reference(x, gamma, beta, weight, bias)
    assert out.shape == (1, 16, 16, D_OUT), out.shape
    # bf16 MXU operands + bf16 output => looser tolerance than the all-f32 path.
    err = jnp.max(jnp.abs(out.astype(jnp.float32) - ref))
    assert jnp.allclose(out.astype(jnp.float32), ref, atol=2e-2, rtol=2e-2), float(err)

    print("KERNEL_OK")
</pallas_src>

<mosaic_0001>
module attributes {stable_mosaic.version = 11 : i64} {
  func.func @_ln_linear_gelu_kernel(%arg0: i32, %arg1: memref<256x192xf32, #tpu.memory_space<vmem>>, %arg2: memref<192x768xbf16, #tpu.memory_space<vmem>>, %arg3: memref<1x768xf32, #tpu.memory_space<vmem>>, %arg4: memref<256x768xbf16, #tpu.memory_space<vmem>>) attributes {dimension_semantics = [#tpu.dimension_semantics<parallel>], iteration_bounds = array<i64: 1>, scalar_prefetch = 0 : i64, scratch_operands = 0 : i64, tpu.core_type = #tpu.core_type<tc>, window_params = [{transform_indices = @transform_0, window_bounds = array<i64: 256, 192>}, {pipeline_mode = #tpu.pipeline_mode<synchronous>, transform_indices = @transform_1, window_bounds = array<i64: 192, 768>}, {pipeline_mode = #tpu.pipeline_mode<synchronous>, transform_indices = @transform_2, window_bounds = array<i64: 1, 768>}, {transform_indices = @transform_3, window_bounds = array<i64: 256, 768>}]} {
    %c0 = arith.constant 0 : index
    %c0_0 = arith.constant 0 : index
    %0 = vector.load %arg1[%c0, %c0_0] : memref<256x192xf32, #tpu.memory_space<vmem>>, vector<256x192xf32>
    %cst = arith.constant dense<0.000000e+00> : vector<256xf32>
    %1 = vector.multi_reduction <add>, %0, %cst [1] : vector<256x192xf32> to vector<256xf32>
    %2 = vector.shape_cast %1 : vector<256xf32> to vector<256x1xf32>
    %cst_1 = arith.constant 1.920000e+02 : f32
    %3 = vector.broadcast %cst_1 : f32 to vector<256x1xf32>
    %4 = arith.divf %2, %3 : vector<256x1xf32>
    %5 = vector.broadcast %4 : vector<256x1xf32> to vector<256x192xf32>
    %6 = arith.subf %0, %5 : vector<256x192xf32>
    %7 = arith.mulf %6, %6 : vector<256x192xf32>
    %cst_2 = arith.constant dense<0.000000e+00> : vector<256xf32>
    %8 = vector.multi_reduction <add>, %7, %cst_2 [1] : vector<256x192xf32> to vector<256xf32>
    %9 = vector.shape_cast %8 : vector<256xf32> to vector<256x1xf32>
    %cst_3 = arith.constant 1.920000e+02 : f32
    %10 = vector.broadcast %cst_3 : f32 to vector<256x1xf32>
    %11 = arith.divf %9, %10 : vector<256x1xf32>
    %cst_4 = arith.constant 9.99999997E-7 : f32
    %12 = vector.broadcast %cst_4 : f32 to vector<256x1xf32>
    %13 = arith.addf %11, %12 : vector<256x1xf32>
    %14 = math.rsqrt %13 : vector<256x1xf32>
    %15 = vector.broadcast %14 : vector<256x1xf32> to vector<256x192xf32>
    %16 = arith.mulf %6, %15 : vector<256x192xf32>
    %17 = arith.truncf %16 : vector<256x192xf32> to vector<256x192xbf16>
    %c0_5 = arith.constant 0 : index
    %c0_6 = arith.constant 0 : index
    %18 = vector.load %arg2[%c0_5, %c0_6] : memref<192x768xbf16, #tpu.memory_space<vmem>>, vector<192x768xbf16>
    %cst_7 = arith.constant dense<0.000000e+00> : vector<256x768xf32>
    %19 = tpu.matmul %17, %18, %cst_7 {dimension_numbers = #tpu.dot_dimension_numbers<[1], [0], [0], [1], [0, 0, 1, 1], [], []>} : vector<256x192xbf16>, vector<192x768xbf16>, vector<256x768xf32> -> vector<256x768xf32>
    %c0_8 = arith.constant 0 : index
    %c0_9 = arith.constant 0 : index
    %20 = vector.load %arg3[%c0_8, %c0_9] : memref<1x768xf32, #tpu.memory_space<vmem>>, vector<1x768xf32>
    %21 = vector.broadcast %20 : vector<1x768xf32> to vector<256x768xf32>
    %22 = arith.addf %19, %21 : vector<256x768xf32>
    %cst_10 = arith.constant 5.000000e-01 : f32
    %23 = vector.broadcast %cst_10 : f32 to vector<256x768xf32>
    %24 = arith.mulf %23, %22 : vector<256x768xf32>
    %cst_11 = arith.constant 0.707106769 : f32
    %25 = vector.broadcast %cst_11 : f32 to vector<256x768xf32>
    %26 = arith.mulf %22, %25 : vector<256x768xf32>
    %27 = math.erf %26 : vector<256x768xf32>
    %cst_12 = arith.constant 1.000000e+00 : f32
    %28 = vector.broadcast %cst_12 : f32 to vector<256x768xf32>
    %29 = arith.addf %28, %27 : vector<256x768xf32>
    %30 = arith.mulf %24, %29 : vector<256x768xf32>
    %31 = arith.truncf %30 : vector<256x768xf32> to vector<256x768xbf16>
    %c0_13 = arith.constant 0 : index
    %c0_14 = arith.constant 0 : index
    %32 = vector.load %arg4[%c0_13, %c0_14] : memref<256x768xbf16, #tpu.memory_space<vmem>>, vector<256x768xbf16>
    tpu.vector_store %arg4[%c0_13, %c0_14], %31 {strides = array<i32>} : memref<256x768xbf16, #tpu.memory_space<vmem>>, vector<256x768xbf16>,
    return
  }
  func.func @transform_0(%arg0: i32) -> (i32, i32) {
    %c0_i32 = arith.constant 0 : i32
    %c0_i32_0 = arith.constant 0 : i32
    return %arg0, %c0_i32 : i32, i32
  }
  func.func @transform_1(%arg0: i32) -> (i32, i32) {
    %c0_i32 = arith.constant 0 : i32
    %c0_i32_0 = arith.constant 0 : i32
    %c0_i32_1 = arith.constant 0 : i32
    return %c0_i32, %c0_i32_0 : i32, i32
  }
  func.func @transform_2(%arg0: i32) -> (i32, i32) {
    %c0_i32 = arith.constant 0 : i32
    %c0_i32_0 = arith.constant 0 : i32
    %c0_i32_1 = arith.constant 0 : i32
    return %c0_i32, %c0_i32_0 : i32, i32
  }
  func.func @transform_3(%arg0: i32) -> (i32, i32) {
    %c0_i32 = arith.constant 0 : i32
    %c0_i32_0 = arith.constant 0 : i32
    return %arg0, %c0_i32 : i32, i32
  }
}

</mosaic_0001>

<bundles_post_ra>
// kernel: tpu_custom_call.1
= control target key start
LH: loop header
LB: loop body
LE: loop exit
PB: predicated region body
PF: predicated region fallthrough
CT: control target
= control target key end

     0   :  { %vm80_vm0 = vcmask 523264   ;;  %s6954_s0 = inlined_call_operand.vmem [shape: f32[256,192], index: 0, kind: input, shape index: {}]   ;;  %s6955_s1 = inlined_call_operand.vmem [shape: bf16[192,768], index: 1, kind: input, shape index: {}]   ;;  %s6956_s2 = inlined_call_operand.vmem [shape: f32[1,768], index: 2, kind: input, shape index: {}]   ;;  %s6957_s3 = inlined_call_operand.hbm [shape: bf16[256,768], index: 3, kind: output, shape index: {}]  }
   0x1   :  { %v4374_v0 = vld [vmem:[%s6954_s0] sm:$0xff]  ;;  %v4379_v1 = vld [vmem:[%s6954_s0 + $0x8] sm:$0xff]  ;;  %v4396_v5 = vld [vmem:[%s6954_s0 + $0x10] sm:$0xff] }
   0x2   :  { %v4384_v2 = vld [vmem:[%s6954_s0 + $0x100] sm:$0xff]  ;;  %v81_v3 = vsel %vm80_vm0, %v4379_v1, 0.0  ;;  %v4391_v4 = vld [vmem:[%s6954_s0 + $0x108] sm:$0xff]  ;;  %v4401_v6 = vld [vmem:[%s6954_s0 + $0x18] sm:$0xff] }
   0x3   :  { %v82_v7 = vadd.f32 %v81_v3, %v4374_v0  ;;  %v145_v8 = vsel %vm80_vm0, %v4391_v4, 0.0  ;;  %v85_v9 = vsel %vm80_vm0, %v4401_v6, 0.0  ;;  %v4411_v10 = vld [vmem:[%s6954_s0 + $0x110] sm:$0xff]  ;;  %v4416_v11 = vld [vmem:[%s6954_s0 + $0x118] sm:$0xff]  ;;  %v4424_v14 = vld [vmem:[%s6954_s0 + $0x28] sm:$0xff] }
   0x4   :  { %v146_v12 = vadd.f32 %v145_v8, %v4384_v2  ;;  %v149_v13 = vsel %vm80_vm0, %v4416_v11, 0.0  ;;  %v4429_v15 = vld [vmem:[%s6954_s0 + $0x38] sm:$0xff]  ;;  %v86_v16 = vadd.f32 %v85_v9, %v4396_v5  ;;  %v4436_v18 = vld [vmem:[%s6954_s0 + $0x20] sm:$0xff]  ;;  %v89_v19 = vsel %vm80_vm0, %v4424_v14, 0.0  ;;  %v4443_v20 = vld [vmem:[%s6954_s0 + $0x30] sm:$0xff] }
   0x5   :  { %83 = vadd.xlane.f32.xlu0 %v82_v7  ;;  %v150_v17 = vadd.f32 %v149_v13, %v4411_v10  ;;  %v93_v21 = vsel %vm80_vm0, %v4429_v15, 0.0  ;;  %v4450_v22 = vld [vmem:[%s6954_s0 + $0x128] sm:$0xff]  ;;  %v4455_v23 = vld [vmem:[%s6954_s0 + $0x138] sm:$0xff]  ;;  %v90_v24 = vadd.f32 %v89_v19, %v4436_v18  ;;  %v4462_v26 = vld [vmem:[%s6954_s0 + $0x120] sm:$0xff] }
   0x6   :  { %147 = vadd.xlane.f32.xlu1 %v146_v12  ;;  %v94_v25 = vadd.f32 %v93_v21, %v4443_v20  ;;  %v153_v27 = vsel %vm80_vm0, %v4450_v22, 0.0  ;;  %v4469_v28 = vld [vmem:[%s6954_s0 + $0x130] sm:$0xff]  ;;  %v157_v29 = vsel %vm80_vm0, %v4455_v23, 0.0  ;;  %v4476_v30 = vld [vmem:[%s6954_s0 + $0x48] sm:$0xff]  ;;  %v4481_v31 = vld [vmem:[%s6954_s0 + $0x58] sm:$0xff] }
   0x7   :  { %v154_v32 = vadd.f32 %v153_v27, %v4462_v26  ;;  %v158_v33 = vadd.f32 %v157_v29, %v4469_v28  ;;  %v4488_v34 = vld [vmem:[%s6954_s0 + $0x40] sm:$0xff]  ;;  %v97_v35 = vsel %vm80_vm0, %v4476_v30, 0.0  ;;  %v4495_v36 = vld [vmem:[%s6954_s0 + $0x50] sm:$0xff]  ;;  %v101_v37 = vsel %vm80_vm0, %v4481_v31, 0.0  ;;  %v4502_v38 = vld [vmem:[%s6954_s0 + $0x148] sm:$0xff] }
   0x8   :  { %v4507_v39 = vld [vmem:[%s6954_s0 + $0x158] sm:$0xff]  ;;  %v98_v40 = vadd.f32 %v97_v35, %v4488_v34  ;;  %v102_v41 = vadd.f32 %v101_v37, %v4495_v36  ;;  %v4514_v42 = vld [vmem:[%s6954_s0 + $0x140] sm:$0xff]  ;;  %v161_v43 = vsel %vm80_vm0, %v4502_v38, 0.0  ;;  %v4521_v44 = vld [vmem:[%s6954_s0 + $0x150] sm:$0xff] }
   0x9   :  { %87 = vadd.xlane.f32.xlu0 %v86_v16  ;;  %v165_v45 = vsel %vm80_vm0, %v4507_v39, 0.0  ;;  %v4528_v46 = vld [vmem:[%s6954_s0 + $0x68] sm:$0xff]  ;;  %v4533_v47 = vld [vmem:[%s6954_s0 + $0x78] sm:$0xff]  ;;  %v162_v48 = vadd.f32 %v161_v43, %v4514_v42  ;;  %v4539_v49 = vld [vmem:[%s6954_s0 + $0x60] sm:$0xff] }
   0xa   :  { %151 = vadd.xlane.f32.xlu1 %v150_v17  ;;  %v4544_v50 = vld [vmem:[%s6954_s0 + $0x70] sm:$0xff]  ;;  %v4549_v51 = vld [vmem:[%s6954_s0 + $0x168] sm:$0xff]  ;;  %v166_v52 = vadd.f32 %v165_v45, %v4521_v44  ;;  %v105_v53 = vsel %vm80_vm0, %v4528_v46, 0.0  ;;  %v4557_v54 = vld [vmem:[%s6954_s0 + $0x178] sm:$0xff]  ;;  %v109_v55 = vsel %vm80_vm0, %v4533_v47, 0.0 }
   0xb   :  { %v4564_v56 = vld [vmem:[%s6954_s0 + $0x160] sm:$0xff]  ;;  %v106_v57 = vadd.f32 %v105_v53, %v4539_v49  ;;  %v4570_v58 = vld [vmem:[%s6954_s0 + $0x170] sm:$0xff]  ;;  %v4575_v59 = vld [vmem:[%s6954_s0 + $0x88] sm:$0xff]  ;;  %v110_v60 = vadd.f32 %v109_v55, %v4544_v50  ;;  %v169_v61 = vsel %vm80_vm0, %v4549_v51, 0.0  ;;  %v173_v63 = vsel %vm80_vm0, %v4557_v54, 0.0 }
   0xc   :  { %v4583_v62 = vld [vmem:[%s6954_s0 + $0x98] sm:$0xff]  ;;  %v4590_v3 = vld [vmem:[%s6954_s0 + $0x80] sm:$0xff]  ;;  %v170_v7 = vadd.f32 %v169_v61, %v4564_v56  ;;  %v4596_v8 = vld [vmem:[%s6954_s0 + $0x90] sm:$0xff]  ;;  %v174_v12 = vadd.f32 %v173_v63, %v4570_v58  ;;  %v113_v13 = vsel %vm80_vm0, %v4575_v59, 0.0 }
   0xd   :  { %91 = vadd.xlane.f32.xlu0 %v90_v24  ;;  %v4601_v9 = vld [vmem:[%s6954_s0 + $0x188] sm:$0xff]  ;;  %v4609_v16 = vld [vmem:[%s6954_s0 + $0x198] sm:$0xff]  ;;  %v117_v17 = vsel %vm80_vm0, %v4583_v62, 0.0  ;;  %v4616_v19 = vld [vmem:[%s6954_s0 + $0x180] sm:$0xff]  ;;  %v114_v21 = vadd.f32 %v113_v13, %v4590_v3 }
   0xe   :  { %95 = vadd.xlane.f32.xlu1 %v94_v25  ;;  %v4622_v24 = vld [vmem:[%s6954_s0 + $0x190] sm:$0xff]  ;;  %v4627_v25 = vld [vmem:[%s6954_s0 + $0xa8] sm:$0xff]  ;;  %v118_v27 = vadd.f32 %v117_v17, %v4596_v8  ;;  %v177_v29 = vsel %vm80_vm0, %v4601_v9, 0.0  ;;  %v4642_v35 = vld [vmem:[%s6954_s0 + $0xa0] sm:$0xff] }
   0xf   :  { %v178_v37 = vadd.f32 %v177_v29, %v4616_v19  ;;  %v121_v45 = vsel %vm80_vm0, %v4627_v25, 0.0  ;;  %v4668_v53 = vld [vmem:[%s6954_s0 + $0x1a0] sm:$0xff] }
  0x10   :  { %v122_v55 = vadd.f32 %v121_v45, %v4642_v35 }
  0x11   :  { %155 = vadd.xlane.f32.xlu0 %v154_v32  ;;  %v4635_v32 = vld [vmem:[%s6954_s0 + $0xb8] sm:$0xff] }
  0x12   :  { %159 = vadd.xlane.f32.xlu1 %v158_v33  ;;  %v181_v33 = vsel %vm80_vm0, %v4609_v16, 0.0 }
  0x13   :  { %v182_v43 = vadd.f32 %v181_v33, %v4622_v24 }
  0x15   :  { %99 = vadd.xlane.f32.xlu0 %v98_v40  ;;  %v4648_v40 = vld [vmem:[%s6954_s0 + $0xb0] sm:$0xff] }
  0x16   :  { %103 = vadd.xlane.f32.xlu1 %v102_v41  ;;  %v4653_v41 = vld [vmem:[%s6954_s0 + $0x1a8] sm:$0xff] }
  0x17   :  { %v185_v63 = vsel %vm80_vm0, %v4653_v41, 0.0 }
  0x18   :  { %v186_v13 = vadd.f32 %v185_v63, %v4668_v53 }
  0x19   :  { %163 = vadd.xlane.f32.xlu0 %v162_v48  ;;  %v4661_v48 = vld [vmem:[%s6954_s0 + $0x1b8] sm:$0xff] }
  0x1a   :  { %167 = vadd.xlane.f32.xlu1 %v166_v52  ;;  %v125_v52 = vsel %vm80_vm0, %v4635_v32, 0.0 }
  0x1b   :  { %v126_v61 = vadd.f32 %v125_v52, %v4648_v40 }
  0x1d   :  { %107 = vadd.xlane.f32.xlu0 %v106_v57  ;;  %v4674_v57 = vld [vmem:[%s6954_s0 + $0x1b0] sm:$0xff] }
  0x1e   :  { %111 = vadd.xlane.f32.xlu1 %v110_v60  ;;  %v4679_v60 = vld [vmem:[%s6954_s0 + $0xc8] sm:$0xff] }
  0x21   :  { %171 = vadd.xlane.f32.xlu0 %v170_v7  ;;  %v4687_v7 = vld [vmem:[%s6954_s0 + $0xd8] sm:$0xff] }
  0x22   :  { %175 = vadd.xlane.f32.xlu1 %v174_v12  ;;  %6992 = vst [vmem:[#allocation5_spill] sm:$0xff] %v4687_v7  ;;  %v189_v12 = vsel %vm80_vm0, %v4661_v48, 0.0 }
  0x23   :  { %v190_v17 = vadd.f32 %v189_v12, %v4674_v57 }
  0x25   :  { %115 = vadd.xlane.f32.xlu0 %v114_v21  ;;  %v4696_v21 = vld [vmem:[%s6954_s0 + $0xc0] sm:$0xff] }
  0x26   :  { %119 = vadd.xlane.f32.xlu1 %v118_v27  ;;  %v129_v27 = vsel %vm80_vm0, %v4679_v60, 0.0 }
  0x29   :  { %179 = vadd.xlane.f32.xlu0 %v178_v37 }
  0x2a   :  { %183 = vadd.xlane.f32.xlu1 %v182_v43 }
  0x2d   :  { %123 = vadd.xlane.f32.xlu0 %v122_v55 }
  0x2e   :  { %127 = vadd.xlane.f32.xlu1 %v126_v61 }
  0x2f   :  { %8 = vsyncpa [#allocation3], 0  ;;  %v4703_v29 = vld [vmem:[%s6954_s0 + $0xd0] sm:$0xff]  ;;  %v133_v33 = vsel %vm80_vm0, %v4687_v7, 0.0  ;;  %v4710_v37 = vld [vmem:[%s6954_s0 + $0x1c8] sm:$0xff]  ;;  %v130_v45 = vadd.f32 %v129_v27, %v4696_v21 }
  0x30   :  { %6993 = vst [vmem:[#allocation6_spill] sm:$0xff] %v4710_v37  ;;  %v4715_v43 = vld [vmem:[%s6954_s0 + $0x1d8] sm:$0xff]  ;;  %v134_v52 = vadd.f32 %v133_v33, %v4703_v29  ;;  %v4722_v55 = vld [vmem:[%s6954_s0 + $0x1c0] sm:$0xff]  ;;  %v193_v61 = vsel %vm80_vm0, %v4710_v37, 0.0  ;;  %v4729_v63 = vld [vmem:[%s6954_s0 + $0x1d0] sm:$0xff] }
  0x31   :  { %6994 = vst [vmem:[#allocation7_spill] sm:$0xff] %v4715_v43  ;;  %187 = vadd.xlane.f32.xlu0 %v186_v13  ;;  %6995 = vst [vmem:[#allocation8_spill] sm:$0xff] %v4722_v55  ;;  %v197_v12 = vsel %vm80_vm0, %v4715_v43, 0.0  ;;  %v4736_v13 = vld [vmem:[%s6954_s0 + $0xe8] sm:$0xff]  ;;  %v194_v27 = vadd.f32 %v193_v61, %v4722_v55  ;;  %v4748_v43 = vld [vmem:[%s6954_s0 + $0xe0] sm:$0xff] }
  0x32   :  { %191 = vadd.xlane.f32.xlu1 %v190_v17  ;;  %6996 = vst [vmem:[#allocation9_spill] sm:$0xff] %v4729_v63  ;;  %6997 = vst [vmem:[#allocation10_spill] sm:$0xff] %v4736_v13  ;;  %v4741_v17 = vld [vmem:[%s6954_s0 + $0xf8] sm:$0xff]  ;;  %v198_v33 = vadd.f32 %v197_v12, %v4729_v63  ;;  %v137_v37 = vsel %vm80_vm0, %v4736_v13, 0.0  ;;  %v4755_v7 = vld [vmem:[%s6954_s0 + $0xf0] sm:$0xff] }
  0x33   :  { %6998 = vst [vmem:[#allocation11_spill] sm:$0xff] %v4741_v17  ;;  %6999 = vst [vmem:[#allocation12_spill] sm:$0xff] %v4755_v7  ;;  %v4767_v61 = vld [vmem:[%s6954_s0 + $0x1f8] sm:$0xff]  ;;  %v138_v12 = vadd.f32 %v137_v37, %v4748_v43  ;;  %v4781_v55 = vld [vmem:[%s6954_s0 + $0x1f0] sm:$0xff] }
  0x34   :  { %7001 = vst [vmem:[#allocation14_spill] sm:$0xff] %v4767_v61  ;;  %7003 = vst [vmem:[#allocation16_spill] sm:$0xff] %v4781_v55 }
  0x35   :  { %131 = vadd.xlane.f32.xlu0 %v130_v45  ;;  %v141_v45 = vsel %vm80_vm0, %v4741_v17, 0.0  ;;  %v4774_v17 = vld [vmem:[%s6954_s0 + $0x1e0] sm:$0xff] }
  0x36   :  { %135 = vadd.xlane.f32.xlu1 %v134_v52  ;;  %v4762_v52 = vld [vmem:[%s6954_s0 + $0x1e8] sm:$0xff]  ;;  %v142_v13 = vadd.f32 %v141_v45, %v4755_v7  ;;  %7002 = vst [vmem:[#allocation15_spill] sm:$0xff] %v4774_v17  ;;  %v3768_v45 = vld [vmem:[%s6955_s1 + $0x4] ss:$24 sps:$4 sm:$0xff]  }
  0x37   :  { %7000 = vst [vmem:[#allocation13_spill] sm:$0xff] %v4762_v52  ;;  %v201_v63 = vsel %vm80_vm0, %v4762_v52, 0.0  ;;  %v3770_v52 = vld [vmem:[%s6955_s1] ss:$24 sps:$4 sm:$0xff]   ;;  %1202 = vmatprep.subr.bf16.mxu0 %v3768_v45  ;;  %3741 = vmatprep.subr.bf16.mxu1 %v3768_v45  ;;  %v3785_v45 = vld [vmem:[%s6955_s1 + $0xf0] ss:$24 sps:$4 sm:$0xff]  }
  0x38   :  { %v202_v37 = vadd.f32 %v201_v63, %v4774_v17  ;;  %1203 = vmatpush1.bf16.msra.mxu0 %v3770_v52  ;;  %3753 = vmatpush1.bf16.msra.mxu1 %v3770_v52  ;;  %v3773_v63 = vld [vmem:[%s6955_s1 + $0x30] ss:$24 sps:$4 sm:$0xff]   ;;  %v3777_v52 = vld [vmem:[%s6955_s1 + $0x94] ss:$24 sps:$4 sm:$0xff]  }
  0x39   :  { %195 = vadd.xlane.f32.xlu0 %v194_v27  ;;  %v205_v27 = vsel %vm80_vm0, %v4767_v61, 0.0  ;;  %v3771_v61 = vld [vmem:[%s6955_s1 + $0x34] ss:$24 sps:$4 sm:$0xff]  }
  0x3a   :  { %199 = vadd.xlane.f32.xlu1 %v198_v33  ;;  %v206_v33 = vadd.f32 %v205_v27, %v4781_v55  ;;  %1204 = vmatprep.subr.bf16.mxu0 %v3771_v61  ;;  %v3780_v27 = vld [vmem:[%s6955_s1 + $0xc4] ss:$24 sps:$4 sm:$0xff]  }
  0x3b   :  { %3742 = vmatprep.subr.bf16.mxu1 %v3771_v61  ;;  %v3779_v61 = vld [vmem:[%s6955_s1 + $0x90] ss:$24 sps:$4 sm:$0xff]  }
  0x3c   :  { %1205 = vmatpush1.bf16.msra.mxu0 %v3773_v63  ;;  %3754 = vmatpush1.bf16.msra.mxu1 %v3773_v63 }
  0x3d   :  { %139 = vadd.xlane.f32.xlu0 %v138_v12  ;;  %v3776_v12 = vld [vmem:[%s6955_s1 + $0x60] ss:$24 sps:$4 sm:$0xff]  }
  0x3e   :  { %143 = vadd.xlane.f32.xlu1 %v142_v13  ;;  %v3774_v13 = vld [vmem:[%s6955_s1 + $0x64] ss:$24 sps:$4 sm:$0xff]  }
  0x3f   :  { %1206 = vmatprep.subr.bf16.mxu0 %v3774_v13  ;;  %3743 = vmatprep.subr.bf16.mxu1 %v3774_v13 }
  0x40   :  { %1207 = vmatpush1.bf16.msra.mxu0 %v3776_v12  ;;  %3755 = vmatpush1.bf16.msra.mxu1 %v3776_v12 }
  0x41   :  { %203 = vadd.xlane.f32.xlu0 %v202_v37  ;;  %1208 = vmatprep.subr.bf16.mxu0 %v3777_v52  ;;  %v3782_v37 = vld [vmem:[%s6955_s1 + $0xc0] ss:$24 sps:$4 sm:$0xff]  }
  0x42   :  { %207 = vadd.xlane.f32.xlu1 %v206_v33  ;;  %3744 = vmatprep.subr.bf16.mxu1 %v3777_v52  ;;  %v3783_v33 = vld [vmem:[%s6955_s1 + $0xf4] ss:$24 sps:$4 sm:$0xff]  }
  0x44   :  { %1209 = vmatpush1.bf16.msra.mxu0 %v3779_v61  ;;  %3756 = vmatpush1.bf16.msra.mxu1 %v3779_v61 }
  0x45   :  { %1210 = vmatprep.subr.bf16.mxu0 %v3780_v27  ;;  %3745 = vmatprep.subr.bf16.mxu1 %v3780_v27 }
  0x48   :  { %1211 = vmatpush1.bf16.msra.mxu0 %v3782_v37  ;;  %3757 = vmatpush1.bf16.msra.mxu1 %v3782_v37 }
  0x49   :  { %1212 = vmatprep.subr.bf16.mxu0 %v3783_v33  ;;  %3746 = vmatprep.subr.bf16.mxu1 %v3783_v33 }
  0x4c   :  { %1213 = vmatpush1.bf16.msra.mxu0 %v3785_v45  ;;  %3758 = vmatpush1.bf16.msra.mxu1 %v3785_v45 }
  0x92   :  { %v84_v63 = vpop.xlane.xlu0 %83 }
  0x93   :  { %v210_v13 = vmul.f32 0.0052083335, %v84_v63  ;;  %v148_v12 = vpop.xlane.xlu1 %147 }
  0x94   :  { %v226_v52 = vmul.f32 0.0052083335, %v148_v12 }
  0x95   :  { %v4824_v61 = vsub.f32 %v4374_v0, %v210_v13  ;;  %v4827_v27 = vsub.f32 %v4379_v1, %v210_v13 }
  0x96   :  { %v4830_v37 = vsub.f32 %v4384_v2, %v226_v52  ;;  %v4833_v55 = vsub.f32 %v4391_v4, %v226_v52  ;;  %v88_v17 = vpop.xlane.xlu0 %87 }
  0x97   :  { %7004 = vst [vmem:[#allocation17_spill] sm:$0xff] %v4824_v61  ;;  %7005 = vst [vmem:[#allocation18_spill] sm:$0xff] %v4827_v27  ;;  %v211_v33 = vmul.f32 0.0052083335, %v88_v17  ;;  %v152_v7 = vpop.xlane.xlu1 %151  ;;  %v306_v45 = vmul.f32 %v4824_v61, %v4824_v61  ;;  %v307_v63 = vmul.f32 %v4827_v27, %v4827_v27 }
  0x98   :  { %7006 = vst [vmem:[#allocation19_spill] sm:$0xff] %v4830_v37  ;;  %7007 = vst [vmem:[#allocation20_spill] sm:$0xff] %v4833_v55  ;;  %v227_v0 = vmul.f32 0.0052083335, %v152_v7  ;;  %v338_v1 = vmul.f32 %v4830_v37, %v4830_v37  ;;  %v339_v2 = vmul.f32 %v4833_v55, %v4833_v55 }
  0x99   :  { %v4844_v13 = vsub.f32 %v4396_v5, %v211_v33  ;;  %v4847_v4 = vsub.f32 %v4401_v6, %v211_v33  ;;  %v370_v17 = vsel %vm80_vm0, %v307_v63, 0.0 }
  0x9a   :  { %v4851_v12 = vsub.f32 %v4411_v10, %v227_v0  ;;  %v4854_v52 = vsub.f32 %v4416_v11, %v227_v0  ;;  %v92_v7 = vpop.xlane.xlu0 %91  ;;  %v371_v61 = vadd.f32 %v370_v17, %v306_v45  ;;  %v434_v37 = vsel %vm80_vm0, %v339_v2, 0.0 }
  0x9b   :  { %v212_v27 = vmul.f32 0.0052083335, %v92_v7  ;;  %v96_v55 = vpop.xlane.xlu1 %95  ;;  %v308_v5 = vmul.f32 %v4844_v13, %v4844_v13  ;;  %v309_v6 = vmul.f32 %v4847_v4, %v4847_v4  ;;  %v435_v63 = vadd.f32 %v434_v37, %v338_v1 }
  0x9c   :  { %7008 = vst [vmem:[#allocation21_spill] sm:$0xff] %v4851_v12  ;;  %372 = vadd.xlane.f32.xlu0 %v371_v61  ;;  %v213_v33 = vmul.f32 0.0052083335, %v96_v55  ;;  %v340_v10 = vmul.f32 %v4851_v12, %v4851_v12  ;;  %v341_v11 = vmul.f32 %v4854_v52, %v4854_v52 }
  0x9d   :  { %v4866_v45 = vsub.f32 %v4436_v18, %v212_v27  ;;  %v4869_v0 = vsub.f32 %v4424_v14, %v212_v27  ;;  %v374_v2 = vsel %vm80_vm0, %v309_v6, 0.0 }
  0x9e   :  { %v4873_v17 = vsub.f32 %v4443_v20, %v213_v33  ;;  %v4876_v55 = vsub.f32 %v4429_v15, %v213_v33  ;;  %v156_v61 = vpop.xlane.xlu0 %155  ;;  %v375_v37 = vadd.f32 %v374_v2, %v308_v5  ;;  %v438_v1 = vsel %vm80_vm0, %v341_v11, 0.0 }
  0x9f   :  { %v228_v7 = vmul.f32 0.0052083335, %v156_v61  ;;  %v160_v12 = vpop.xlane.xlu1 %159  ;;  %v310_v18 = vmul.f32 %v4866_v45, %v4866_v45  ;;  %v311_v14 = vmul.f32 %v4869_v0, %v4869_v0  ;;  %v439_v20 = vadd.f32 %v438_v1, %v340_v10 }
  0xa0   :  { %436 = vadd.xlane.f32.xlu0 %v435_v63  ;;  %376 = vadd.xlane.f32.xlu1 %v375_v37  ;;  %v229_v27 = vmul.f32 0.0052083335, %v160_v12  ;;  %v312_v15 = vmul.f32 %v4873_v17, %v4873_v17  ;;  %v313_v5 = vmul.f32 %v4876_v55, %v4876_v55 }
  0xa1   :  { %v4888_v6 = vsub.f32 %v4462_v26, %v228_v7  ;;  %v4891_v33 = vsub.f32 %v4450_v22, %v228_v7  ;;  %v378_v11 = vsel %vm80_vm0, %v311_v14, 0.0 }
  0xa2   :  { %v4895_v2 = vsub.f32 %v4469_v28, %v229_v27  ;;  %v4898_v12 = vsub.f32 %v4455_v23, %v229_v27  ;;  %v100_v63 = vpop.xlane.xlu0 %99  ;;  %v379_v10 = vadd.f32 %v378_v11, %v310_v18  ;;  %v382_v61 = vsel %vm80_vm0, %v313_v5, 0.0 }
  0xa3   :  { %v214_v37 = vmul.f32 0.0052083335, %v100_v63  ;;  %v104_v1 = vpop.xlane.xlu1 %103  ;;  %v342_v26 = vmul.f32 %v4888_v6, %v4888_v6  ;;  %v343_v22 = vmul.f32 %v4891_v33, %v4891_v33  ;;  %v383_v28 = vadd.f32 %v382_v61, %v312_v15 }
  0xa4   :  { %440 = vadd.xlane.f32.xlu1 %v439_v20  ;;  %380 = vadd.xlane.f32.xlu0 %v379_v10  ;;  %v215_v7 = vmul.f32 0.0052083335, %v104_v1  ;;  %v344_v23 = vmul.f32 %v4895_v2, %v4895_v2  ;;  %v345_v18 = vmul.f32 %v4898_v12, %v4898_v12 }
  0xa5   :  { %v4910_v14 = vsub.f32 %v4488_v34, %v214_v37  ;;  %v4913_v27 = vsub.f32 %v4476_v30, %v214_v37  ;;  %v442_v5 = vsel %vm80_vm0, %v343_v22, 0.0  ;;  %v3786_v22 = vld [vmem:[%s6955_s1 + $0x124] ss:$24 sps:$4 sm:$0xff]  }
  0xa6   :  { %v4917_v11 = vsub.f32 %v4495_v36, %v215_v7  ;;  %v4920_v20 = vsub.f32 %v4481_v31, %v215_v7  ;;  %v164_v15 = vpop.xlane.xlu0 %163  ;;  %v443_v63 = vadd.f32 %v442_v5, %v342_v26  ;;  %v446_v10 = vsel %vm80_vm0, %v345_v18, 0.0  ;;  %1214 = vmatprep.subr.bf16.mxu0 %v3786_v22  ;;  %3747 = vmatprep.subr.bf16.mxu1 %v3786_v22 }
  0xa7   :  { %v230_v61 = vmul.f32 0.0052083335, %v164_v15  ;;  %v168_v1 = vpop.xlane.xlu1 %167  ;;  %v314_v34 = vmul.f32 %v4910_v14, %v4910_v14  ;;  %v315_v30 = vmul.f32 %v4913_v27, %v4913_v27  ;;  %v447_v36 = vadd.f32 %v446_v10, %v344_v23  ;;  %v3788_v23 = vld [vmem:[%s6955_s1 + $0x120] ss:$24 sps:$4 sm:$0xff]  }
  0xa8   :  { %384 = vadd.xlane.f32.xlu1 %v383_v28  ;;  %444 = vadd.xlane.f32.xlu0 %v443_v63  ;;  %v231_v37 = vmul.f32 0.0052083335, %v168_v1  ;;  %v316_v31 = vmul.f32 %v4917_v11, %v4917_v11  ;;  %v317_v26 = vmul.f32 %v4920_v20, %v4920_v20 }
  0xa9   :  { %v4935_v7 = vsub.f32 %v4514_v42, %v230_v61  ;;  %v4938_v18 = vsub.f32 %v4502_v38, %v230_v61  ;;  %v386_v28 = vsel %vm80_vm0, %v315_v30, 0.0  ;;  %1215 = vmatpush1.bf16.msra.mxu0 %v3788_v23  ;;  %3759 = vmatpush1.bf16.msra.mxu1 %v3788_v23 }
  0xaa   :  { %v4945_v5 = vsub.f32 %v4521_v44, %v231_v37  ;;  %v4948_v15 = vsub.f32 %v4507_v39, %v231_v37  ;;  %v108_v63 = vpop.xlane.xlu0 %107  ;;  %v387_v10 = vadd.f32 %v386_v28, %v314_v34  ;;  %v390_v42 = vsel %vm80_vm0, %v317_v26, 0.0 }
  0xab   :  { %v216_v38 = vmul.f32 0.0052083335, %v108_v63  ;;  %v112_v61 = vpop.xlane.xlu1 %111  ;;  %v346_v1 = vmul.f32 %v4935_v7, %v4935_v7  ;;  %v347_v30 = vmul.f32 %v4938_v18, %v4938_v18  ;;  %v391_v44 = vadd.f32 %v390_v42, %v316_v31 }
  0xac   :  { %448 = vadd.xlane.f32.xlu1 %v447_v36  ;;  %388 = vadd.xlane.f32.xlu0 %v387_v10  ;;  %v217_v39 = vmul.f32 0.0052083335, %v112_v61  ;;  %v348_v34 = vmul.f32 %v4945_v5, %v4945_v5  ;;  %v349_v37 = vmul.f32 %v4948_v15, %v4948_v15  ;;  %v3789_v36 = vld [vmem:[%s6955_s1 + $0x154] ss:$24 sps:$4 sm:$0xff]  }
  0xad   :  { %v4960_v26 = vsub.f32 %v4539_v49, %v216_v38  ;;  %v4963_v22 = vsub.f32 %v4528_v46, %v216_v38  ;;  %v450_v28 = vsel %vm80_vm0, %v347_v30, 0.0  ;;  %v3791_v46 = vld [vmem:[%s6955_s1 + $0x150] ss:$24 sps:$4 sm:$0xff]   ;;  %1216 = vmatprep.subr.bf16.mxu0 %v3789_v36  ;;  %3748 = vmatprep.subr.bf16.mxu1 %v3789_v36 }
  0xae   :  { %v4970_v31 = vsub.f32 %v4544_v50, %v217_v39  ;;  %v4973_v23 = vsub.f32 %v4533_v47, %v217_v39  ;;  %v172_v63 = vpop.xlane.xlu0 %171  ;;  %v451_v10 = vadd.f32 %v450_v28, %v346_v1  ;;  %v454_v49 = vsel %vm80_vm0, %v349_v37, 0.0  ;;  %1217 = vmatpush1.bf16.msra.mxu0 %v3791_v46  ;;  %3760 = vmatpush1.bf16.msra.mxu1 %v3791_v46 }
  0xaf   :  { %v232_v42 = vmul.f32 0.0052083335, %v172_v63  ;;  %v176_v38 = vpop.xlane.xlu1 %175  ;;  %v318_v61 = vmul.f32 %v4960_v26, %v4960_v26  ;;  %v319_v50 = vmul.f32 %v4963_v22, %v4963_v22  ;;  %v455_v1 = vadd.f32 %v454_v49, %v348_v34 }
  0xb0   :  { %392 = vadd.xlane.f32.xlu1 %v391_v44  ;;  %452 = vadd.xlane.f32.xlu0 %v451_v10  ;;  %v233_v47 = vmul.f32 0.0052083335, %v176_v38  ;;  %v320_v30 = vmul.f32 %v4970_v31, %v4970_v31  ;;  %v321_v39 = vmul.f32 %v4973_v23, %v4973_v23  ;;  %v3792_v44 = vld [vmem:[%s6955_s1 + $0x184] ss:$24 sps:$4 sm:$0xff]  }
  0xb1   :  { %v4988_v37 = vsub.f32 %v4564_v56, %v232_v42  ;;  %v4991_v28 = vsub.f32 %v4549_v51, %v232_v42  ;;  %v394_v63 = vsel %vm80_vm0, %v319_v50, 0.0  ;;  %v3794_v51 = vld [vmem:[%s6955_s1 + $0x180] ss:$24 sps:$4 sm:$0xff]   ;;  %1218 = vmatprep.subr.bf16.mxu0 %v3792_v44  ;;  %3749 = vmatprep.subr.bf16.mxu1 %v3792_v44 }
  0xb2   :  { %v4998_v34 = vsub.f32 %v4570_v58, %v233_v47  ;;  %v5001_v36 = vsub.f32 %v4557_v54, %v233_v47  ;;  %v116_v10 = vpop.xlane.xlu0 %115  ;;  %v395_v56 = vadd.f32 %v394_v63, %v318_v61  ;;  %v398_v49 = vsel %vm80_vm0, %v321_v39, 0.0  ;;  %1219 = vmatpush1.bf16.msra.mxu0 %v3794_v51  ;;  %3761 = vmatpush1.bf16.msra.mxu1 %v3794_v51 }
  0xb3   :  { %v218_v42 = vmul.f32 0.0052083335, %v116_v10  ;;  %v120_v46 = vpop.xlane.xlu1 %119  ;;  %v350_v38 = vmul.f32 %v4988_v37, %v4988_v37  ;;  %v351_v58 = vmul.f32 %v4991_v28, %v4991_v28  ;;  %v399_v61 = vadd.f32 %v398_v49, %v320_v30 }
  0xb4   :  { %456 = vadd.xlane.f32.xlu1 %v455_v1  ;;  %396 = vadd.xlane.f32.xlu0 %v395_v56  ;;  %v219_v54 = vmul.f32 0.0052083335, %v120_v46  ;;  %v352_v50 = vmul.f32 %v4998_v34, %v4998_v34  ;;  %v353_v47 = vmul.f32 %v5001_v36, %v5001_v36  ;;  %v3795_v1 = vld [vmem:[%s6955_s1 + $0x1b4] ss:$24 sps:$4 sm:$0xff]  }
  0xb5   :  { %v5016_v39 = vsub.f32 %v4590_v3, %v218_v42  ;;  %v5019_v63 = vsub.f32 %v4575_v59, %v218_v42  ;;  %v458_v10 = vsel %vm80_vm0, %v351_v58, 0.0  ;;  %v3797_v59 = vld [vmem:[%s6955_s1 + $0x1b0] ss:$24 sps:$4 sm:$0xff]   ;;  %1220 = vmatprep.subr.bf16.mxu0 %v3795_v1  ;;  %3750 = vmatprep.subr.bf16.mxu1 %v3795_v1 }
  0xb6   :  { %v5026_v30 = vsub.f32 %v4596_v8, %v219_v54  ;;  %v5029_v44 = vsub.f32 %v4583_v62, %v219_v54  ;;  %v180_v56 = vpop.xlane.xlu0 %179  ;;  %v459_v3 = vadd.f32 %v458_v10, %v350_v38  ;;  %v462_v49 = vsel %vm80_vm0, %v353_v47, 0.0  ;;  %1221 = vmatpush1.bf16.msra.mxu0 %v3797_v59  ;;  %3762 = vmatpush1.bf16.msra.mxu1 %v3797_v59 }
  0xb7   :  { %v234_v42 = vmul.f32 0.0052083335, %v180_v56  ;;  %v184_v51 = vpop.xlane.xlu1 %183  ;;  %v322_v46 = vmul.f32 %v5016_v39, %v5016_v39  ;;  %v323_v8 = vmul.f32 %v5019_v63, %v5019_v63  ;;  %v463_v38 = vadd.f32 %v462_v49, %v352_v50 }
  0xb8   :  { %400 = vadd.xlane.f32.xlu1 %v399_v61  ;;  %460 = vadd.xlane.f32.xlu0 %v459_v3  ;;  %v235_v62 = vmul.f32 0.0052083335, %v184_v51  ;;  %v324_v58 = vmul.f32 %v5026_v30, %v5026_v30  ;;  %v325_v54 = vmul.f32 %v5029_v44, %v5029_v44  ;;  %v3798_v61 = vld [vmem:[%s6955_s1 + $0x1e4] ss:$24 sps:$4 sm:$0xff]  }
  0xb9   :  { %v5044_v47 = vsub.f32 %v4616_v19, %v234_v42  ;;  %v5047_v10 = vsub.f32 %v4601_v9, %v234_v42  ;;  %v402_v56 = vsel %vm80_vm0, %v323_v8, 0.0  ;;  %v3800_v9 = vld [vmem:[%s6955_s1 + $0x1e0] ss:$24 sps:$4 sm:$0xff]   ;;  %1222 = vmatprep.subr.bf16.mxu0 %v3798_v61  ;;  %3751 = vmatprep.subr.bf16.mxu1 %v3798_v61 }
  0xba   :  { %v5054_v50 = vsub.f32 %v4622_v24, %v235_v62  ;;  %v5057_v1 = vsub.f32 %v4609_v16, %v235_v62  ;;  %v124_v3 = vpop.xlane.xlu0 %123  ;;  %v403_v19 = vadd.f32 %v402_v56, %v322_v46  ;;  %v406_v49 = vsel %vm80_vm0, %v325_v54, 0.0  ;;  %1223 = vmatpush1.bf16.msra.mxu0 %v3800_v9  ;;  %3763 = vmatpush1.bf16.msra.mxu1 %v3800_v9 }
  0xbb   :  { %v220_v42 = vmul.f32 0.0052083335, %v124_v3  ;;  %v128_v59 = vpop.xlane.xlu1 %127  ;;  %v354_v51 = vmul.f32 %v5044_v47, %v5044_v47  ;;  %v355_v24 = vmul.f32 %v5047_v10, %v5047_v10  ;;  %v407_v46 = vadd.f32 %v406_v49, %v324_v58 }
  0xbc   :  { %464 = vadd.xlane.f32.xlu1 %v463_v38  ;;  %404 = vadd.xlane.f32.xlu0 %v403_v19  ;;  %v221_v16 = vmul.f32 0.0052083335, %v128_v59  ;;  %v356_v8 = vmul.f32 %v5054_v50, %v5054_v50  ;;  %v357_v62 = vmul.f32 %v5057_v1, %v5057_v1  ;;  %v3801_v38 = vld [vmem:[%s6955_s1 + $0x214] ss:$24 sps:$4 sm:$0xff]  }
  0xbd   :  { %v5072_v54 = vsub.f32 %v4642_v35, %v220_v42  ;;  %v5075_v56 = vsub.f32 %v4627_v25, %v220_v42  ;;  %v466_v3 = vsel %vm80_vm0, %v355_v24, 0.0  ;;  %v3803_v25 = vld [vmem:[%s6955_s1 + $0x210] ss:$24 sps:$4 sm:$0xff]   ;;  %1224 = vmatprep.subr.bf16.mxu0 %v3801_v38  ;;  %3752 = vmatprep.subr.bf16.mxu1 %v3801_v38 }
  0xbe   :  { %v5082_v58 = vsub.f32 %v4648_v40, %v221_v16  ;;  %v5085_v61 = vsub.f32 %v4635_v32, %v221_v16  ;;  %v188_v19 = vpop.xlane.xlu0 %187  ;;  %v467_v35 = vadd.f32 %v466_v3, %v354_v51  ;;  %v470_v49 = vsel %vm80_vm0, %v357_v62, 0.0  ;;  %1225 = vmatpush1.bf16.msra.mxu0 %v3803_v25  ;;  %3764 = vmatpush1.bf16.msra.mxu1 %v3803_v25 }
  0xbf   :  { %v236_v42 = vmul.f32 0.0052083335, %v188_v19  ;;  %v192_v9 = vpop.xlane.xlu1 %191  ;;  %v326_v59 = vmul.f32 %v5072_v54, %v5072_v54  ;;  %v327_v40 = vmul.f32 %v5075_v56, %v5075_v56  ;;  %v471_v51 = vadd.f32 %v470_v49, %v356_v8 }
  0xc0   :  { %408 = vadd.xlane.f32.xlu1 %v407_v46  ;;  %468 = vadd.xlane.f32.xlu0 %v467_v35  ;;  %v237_v32 = vmul.f32 0.0052083335, %v192_v9  ;;  %v328_v24 = vmul.f32 %v5082_v58, %v5082_v58  ;;  %v329_v16 = vmul.f32 %v5085_v61, %v5085_v61 }
  0xc1   :  { %v5100_v62 = vsub.f32 %v4668_v53, %v236_v42  ;;  %v5103_v3 = vsub.f32 %v4653_v41, %v236_v42  ;;  %v410_v19 = vsel %vm80_vm0, %v327_v40, 0.0 }
  0xc2   :  { %v5107_v46 = vsub.f32 %v4674_v57, %v237_v32  ;;  %v5110_v8 = vsub.f32 %v4661_v48, %v237_v32  ;;  %v132_v38 = vpop.xlane.xlu0 %131  ;;  %v411_v35 = vadd.f32 %v410_v19, %v326_v59  ;;  %v414_v49 = vsel %vm80_vm0, %v329_v16, 0.0 }
  0xc3   :  { %7009 = vst [vmem:[#allocation22_spill] sm:$0xff] %v5100_v62  ;;  %v222_v9 = vmul.f32 0.0052083335, %v132_v38  ;;  %v136_v53 = vpop.xlane.xlu1 %135  ;;  %v358_v41 = vmul.f32 %v5100_v62, %v5100_v62  ;;  %v359_v42 = vmul.f32 %v5103_v3, %v5103_v3  ;;  %v415_v57 = vadd.f32 %v414_v49, %v328_v24 }
  0xc4   :  { %7010 = vst [vmem:[#allocation23_spill] sm:$0xff] %v5107_v46  ;;  %472 = vadd.xlane.f32.xlu1 %v471_v51  ;;  %412 = vadd.xlane.f32.xlu0 %v411_v35  ;;  %v223_v25 = vmul.f32 0.0052083335, %v136_v53  ;;  %v360_v48 = vmul.f32 %v5107_v46, %v5107_v46  ;;  %v361_v59 = vmul.f32 %v5110_v8, %v5110_v8  ;;  %v7014_v51 = vld [vmem:[#allocation5_spill] sm:$0xff] }
  0xc5   :  { %v5122_v40 = vsub.f32 %v4696_v21, %v222_v9  ;;  %v5125_v32 = vsub.f32 %v4679_v60, %v222_v9  ;;  %v474_v16 = vsel %vm80_vm0, %v359_v42, 0.0 }
  0xc6   :  { %v5129_v19 = vsub.f32 %v4703_v29, %v223_v25  ;;  %v5132_v38 = vsub.f32 %v7014_v51, %v223_v25  ;;  %v196_v24 = vpop.xlane.xlu0 %195  ;;  %v475_v35 = vadd.f32 %v474_v16, %v358_v41  ;;  %v478_v49 = vsel %vm80_vm0, %v361_v59, 0.0  ;;  %v3806_v29 = vld [vmem:[%s6955_s1 + $0xc] ss:$24 sps:$4 sm:$0xff]   ;;  %v7016_v16 = vld [vmem:[#allocation8_spill] sm:$0xff] }
  0xc7   :  { %7011 = vst [vmem:[#allocation24_spill] sm:$0xff] %v5122_v40  ;;  %7012 = vst [vmem:[#allocation25_spill] sm:$0xff] %v5125_v32  ;;  %v238_v53 = vmul.f32 0.0052083335, %v196_v24  ;;  %v200_v46 = vpop.xlane.xlu1 %199  ;;  %v330_v21 = vmul.f32 %v5122_v40, %v5122_v40  ;;  %v331_v60 = vmul.f32 %v5125_v32, %v5125_v32  ;;  %v479_v42 = vadd.f32 %v478_v49, %v360_v48  ;;  %v3809_v59 = vld [vmem:[%s6955_s1 + $0x14] ss:$24 sps:$4 sm:$0xff]  }
  0xc8   :  { %7013 = vst [vmem:[#allocation26_spill] sm:$0xff] %v5129_v19  ;;  %7015 = vst [vmem:[#allocation5_spill] sm:$0xff] %v5132_v38  ;;  %416 = vadd.xlane.f32.xlu1 %v415_v57  ;;  %476 = vadd.xlane.f32.xlu0 %v475_v35  ;;  %v239_v9 = vmul.f32 0.0052083335, %v200_v46  ;;  %v332_v41 = vmul.f32 %v5129_v19, %v5129_v19  ;;  %v333_v25 = vmul.f32 %v5132_v38, %v5132_v38  ;;  %v7018_v24 = vld [vmem:[#allocation6_spill] sm:$0xff]  ;;  %v7019_v46 = vld [vmem:[#allocation9_spill] sm:$0xff] }
  0xc9   :  { %v5150_v51 = vsub.f32 %v7016_v16, %v238_v53  ;;  %v5153_v40 = vsub.f32 %v7018_v24, %v238_v53  ;;  %v418_v57 = vsel %vm80_vm0, %v331_v60, 0.0  ;;  %1395 = vmatprep.subr.bf16.mxu1 %v3806_v29  ;;  %v7021_v35 = vld [vmem:[#allocation7_spill] sm:$0xff]  ;;  %1588 = vmatprep.subr.bf16.mxu0 %v3809_v59 }
  0xca   :  { %v5157_v48 = vsub.f32 %v7019_v46, %v239_v9  ;;  %v5160_v49 = vsub.f32 %v7021_v35, %v239_v9  ;;  %v140_v19 = vpop.xlane.xlu0 %139  ;;  %v419_v38 = vadd.f32 %v418_v57, %v330_v21  ;;  %v422_v32 = vsel %vm80_vm0, %v333_v25, 0.0  ;;  %v7025_v46 = vld [vmem:[#allocation12_spill] sm:$0xff] }
  0xcb   :  { %7017 = vst [vmem:[#allocation8_spill] sm:$0xff] %v5150_v51  ;;  %v224_v62 = vmul.f32 0.0052083335, %v140_v19  ;;  %v144_v16 = vpop.xlane.xlu1 %143  ;;  %v362_v53 = vmul.f32 %v5150_v51, %v5150_v51  ;;  %v363_v60 = vmul.f32 %v5153_v40, %v5153_v40  ;;  %v423_v24 = vadd.f32 %v422_v32, %v332_v41  ;;  %v7023_v19 = vld [vmem:[#allocation10_spill] sm:$0xff] }
  0xcc   :  { %7020 = vst [vmem:[#allocation6_spill] sm:$0xff] %v5157_v48  ;;  %480 = vadd.xlane.f32.xlu1 %v479_v42  ;;  %420 = vadd.xlane.f32.xlu0 %v419_v38  ;;  %v225_v29 = vmul.f32 0.0052083335, %v144_v16  ;;  %v364_v9 = vmul.f32 %v5157_v48, %v5157_v48  ;;  %v365_v21 = vmul.f32 %v5160_v49, %v5160_v49  ;;  %v7027_v38 = vld [vmem:[#allocation11_spill] sm:$0xff] }
  0xcd   :  { %v5172_v25 = vsub.f32 %v4748_v43, %v224_v62  ;;  %v5175_v59 = vsub.f32 %v7023_v19, %v224_v62  ;;  %v482_v57 = vsel %vm80_vm0, %v363_v60, 0.0 }
  0xce   :  { %v5179_v35 = vsub.f32 %v7025_v46, %v225_v29  ;;  %v5182_v42 = vsub.f32 %v7027_v38, %v225_v29  ;;  %v204_v32 = vpop.xlane.xlu0 %203  ;;  %v483_v41 = vadd.f32 %v482_v57, %v362_v53  ;;  %v486_v16 = vsel %vm80_vm0, %v365_v21, 0.0  ;;  %v7028_v57 = vld [vmem:[#allocation15_spill] sm:$0xff]  ;;  %v7030_v46 = vld [vmem:[#allocation13_spill] sm:$0xff] }
  0xcf   :  { %7022 = vst [vmem:[#allocation9_spill] sm:$0xff] %v5172_v25  ;;  %7024 = vst [vmem:[#allocation7_spill] sm:$0xff] %v5175_v59  ;;  %v240_v48 = vmul.f32 0.0052083335, %v204_v32  ;;  %v208_v51 = vpop.xlane.xlu1 %207  ;;  %v334_v43 = vmul.f32 %v5172_v25, %v5172_v25  ;;  %v335_v62 = vmul.f32 %v5175_v59, %v5175_v59  ;;  %v487_v19 = vadd.f32 %v486_v16, %v364_v9  ;;  %v7032_v25 = vld [vmem:[#allocation16_spill] sm:$0xff] }
  0xd0   :  { %7026 = vst [vmem:[#allocation10_spill] sm:$0xff] %v5179_v35  ;;  %424 = vadd.xlane.f32.xlu1 %v423_v24  ;;  %484 = vadd.xlane.f32.xlu0 %v483_v41  ;;  %v241_v60 = vmul.f32 0.0052083335, %v208_v51  ;;  %v336_v29 = vmul.f32 %v5179_v35, %v5179_v35  ;;  %v337_v53 = vmul.f32 %v5182_v42, %v5182_v42  ;;  %v7034_v24 = vld [vmem:[#allocation14_spill] sm:$0xff] }
  0xd1   :  { %v5194_v21 = vsub.f32 %v7028_v57, %v240_v48  ;;  %v5197_v38 = vsub.f32 %v7030_v46, %v240_v48  ;;  %v426_v32 = vsel %vm80_vm0, %v335_v62, 0.0 }
  0xd2   :  { %v5201_v59 = vsub.f32 %v7032_v25, %v241_v60  ;;  %v5204_v51 = vsub.f32 %v7034_v24, %v241_v60  ;;  %v427_v9 = vadd.f32 %v426_v32, %v334_v43  ;;  %v430_v41 = vsel %vm80_vm0, %v337_v53, 0.0 }
  0xd3   :  { %7029 = vst [vmem:[#allocation12_spill] sm:$0xff] %v5194_v21  ;;  %7031 = vst [vmem:[#allocation11_spill] sm:$0xff] %v5197_v38  ;;  %v366_v16 = vmul.f32 %v5194_v21, %v5194_v21  ;;  %v367_v57 = vmul.f32 %v5197_v38, %v5197_v38  ;;  %v431_v48 = vadd.f32 %v430_v41, %v336_v29 }
  0xd4   :  { %7033 = vst [vmem:[#allocation15_spill] sm:$0xff] %v5201_v59  ;;  %7035 = vst [vmem:[#allocation13_spill] sm:$0xff] %v5204_v51  ;;  %488 = vadd.xlane.f32.xlu1 %v487_v19  ;;  %428 = vadd.xlane.f32.xlu0 %v427_v9  ;;  %v368_v62 = vmul.f32 %v5201_v59, %v5201_v59  ;;  %v369_v25 = vmul.f32 %v5204_v51, %v5204_v51 }
  0xd5   :  { %v490_v60 = vsel %vm80_vm0, %v367_v57, 0.0 }
  0xd6   :  { %v491_v43 = vadd.f32 %v490_v60, %v366_v16  ;;  %v494_v53 = vsel %vm80_vm0, %v369_v25, 0.0 }
  0xd7   :  { %v495_v46 = vadd.f32 %v494_v53, %v368_v62 }
  0xd8   :  { %432 = vadd.xlane.f32.xlu1 %v431_v48  ;;  %492 = vadd.xlane.f32.xlu0 %v491_v43 }
  0xdc   :  { %496 = vadd.xlane.f32.xlu1 %v495_v46 }
 0x129   :  { %v373_v32 = vpop.xlane.xlu0 %372 }
 0x12a   :  { %v498_v24 = vmul.f32 0.0052083335, %v373_v32 }
 0x12c   :  { %v530_v19 = vadd.f32 1e-06, %v498_v24 }
 0x12d   :  { %v377_v9 = vpop.xlane.xlu1 %376  ;;  %v437_v29 = vpop.xlane.xlu0 %436 }
 0x12e   :  { %v499_v41 = vmul.f32 0.0052083335, %v377_v9  ;;  %v514_v21 = vmul.f32 0.0052083335, %v437_v29  ;;  %3876 = vrsqrt.f32 %v530_v19 }
 0x130   :  { %v531_v59 = vadd.f32 1e-06, %v499_v41  ;;  %v546_v38 = vadd.f32 1e-06, %v514_v21 }
 0x131   :  { %v441_v51 = vpop.xlane.xlu1 %440  ;;  %v381_v35 = vpop.xlane.xlu0 %380 }
 0x132   :  { %3878 = vrsqrt.f32 %v531_v59  ;;  %v515_v16 = vmul.f32 0.0052083335, %v441_v51  ;;  %v500_v57 = vmul.f32 0.0052083335, %v381_v35 }
 0x133   :  { %3880 = vrsqrt.f32 %v546_v38 }
 0x134   :  { %v547_v48 = vadd.f32 1e-06, %v515_v16  ;;  %v532_v25 = vadd.f32 1e-06, %v500_v57  ;;  %v7036_v16 = vld [vmem:[#allocation18_spill] sm:$0xff] }
 0x135   :  { %v385_v62 = vpop.xlane.xlu1 %384  ;;  %v445_v60 = vpop.xlane.xlu0 %444 }
 0x136   :  { %3882 = vrsqrt.f32 %v547_v48  ;;  %v501_v43 = vmul.f32 0.0052083335, %v385_v62  ;;  %v516_v53 = vmul.f32 0.0052083335, %v445_v60  ;;  %v7037_v62 = vld [vmem:[#allocation17_spill] sm:$0xff] }
 0x137   :  { %3884 = vrsqrt.f32 %v532_v25 }
 0x138   :  { %v533_v46 = vadd.f32 1e-06, %v501_v43  ;;  %v548_v32 = vadd.f32 1e-06, %v516_v53  ;;  %v3877_v9 = vpop.eup %3876 }
 0x139   :  { %v449_v24 = vpop.xlane.xlu1 %448  ;;  %v389_v19 = vpop.xlane.xlu0 %388  ;;  %v595_v57 = vmul.f32 %v3877_v9, %v7036_v16  ;;  %v594_v25 = vmul.f32 %v3877_v9, %v7037_v62  ;;  %v7040_v16 = vld [vmem:[#allocation19_spill] sm:$0xff] }
 0x13a   :  { %3886 = vrsqrt.f32 %v533_v46  ;;  %v517_v21 = vmul.f32 0.0052083335, %v449_v24  ;;  %v502_v29 = vmul.f32 0.0052083335, %v389_v19 }
 0x13b   :  { %3888 = vrsqrt.f32 %v548_v32  ;;  %v3807_v32 = vld [vmem:[%s6955_s1 + $0x10] ss:$24 sps:$4 sm:$0xff]  }
 0x13c   :  { %v3879_v59 = vpop.eup %3878  ;;  %v549_v35 = vadd.f32 1e-06, %v517_v21  ;;  %v534_v38 = vadd.f32 1e-06, %v502_v29 }
 0x13d   :  { %v393_v51 = vpop.xlane.xlu1 %392  ;;  %v453_v41 = vpop.xlane.xlu0 %452  ;;  %v597_v48 = vmul.f32 %v3879_v59, %v4847_v4  ;;  %v596_v60 = vmul.f32 %v3879_v59, %v4844_v13  ;;  %v3815_v13 = vld [vmem:[%s6955_s1 + $0x44] ss:$24 sps:$4 sm:$0xff]  }
 0x13e   :  { %v3881_v43 = vpop.eup %3880  ;;  %3890 = vrsqrt.f32 %v549_v35  ;;  %v503_v53 = vmul.f32 0.0052083335, %v393_v51  ;;  %v518_v46 = vmul.f32 0.0052083335, %v453_v41  ;;  %v7039_v35 = vld [vmem:[#allocation20_spill] sm:$0xff] }
 0x13f   :  { %v5221_v24 = vpack.c.bf16 %v597_v48, %v595_v57  ;;  %v5223_v19 = vpack.c.bf16 %v596_v60, %v594_v25  ;;  %3892 = vrsqrt.f32 %v534_v38  ;;  %v627_v51 = vmul.f32 %v3881_v43, %v7039_v35  ;;  %v7041_v48 = vld [vmem:[#allocation21_spill] sm:$0xff] }
 0x140   :  { %v3883_v21 = vpop.eup %3882  ;;  %v535_v29 = vadd.f32 1e-06, %v503_v53  ;;  %v550_v4 = vadd.f32 1e-06, %v518_v46  ;;  %v626_v57 = vmul.f32 %v3881_v43, %v7040_v16  ;;  %v3804_v53 = vld [vmem:[%s6955_s1 + $0x8] ss:$24 sps:$4 sm:$0xff]  }
 0x141   :  { %7038 = vst [vmem:[#allocation16_spill] sm:$0xff] %v5221_v24  ;;  %v457_v9 = vpop.xlane.xlu1 %456  ;;  %3501 = vmatprep.mubr.msk.bf16.mxu0 %vm80_vm0, %v5221_v24  ;;  %v397_v59 = vpop.xlane.xlu0 %396  ;;  %v629_v41 = vmul.f32 %v3883_v21, %v4854_v52  ;;  %v628_v62 = vmul.f32 %v3883_v21, %v7041_v48  ;;  %v3812_v52 = vld [vmem:[%s6955_s1 + $0x3c] ss:$24 sps:$4 sm:$0xff]   ;;  %v3813_v43 = vld [vmem:[%s6955_s1 + $0x40] ss:$24 sps:$4 sm:$0xff]  }
 0x142   :  { %v3885_v38 = vpop.eup %3884  ;;  %3894 = vrsqrt.f32 %v535_v29  ;;  %v519_v25 = vmul.f32 0.0052083335, %v457_v9  ;;  %v504_v60 = vmul.f32 0.0052083335, %v397_v59  ;;  %1235 = vmatmul.mubr.bf16.vlgmr.msra.gmra.mrb[0].mxu0 %v5223_v19  ;;  %v3821_v59 = vld [vmem:[%s6955_s1 + $0x74] ss:$24 sps:$4 sm:$0xff]  }
 0x143   :  { %v5241_v46 = vpack.c.bf16 %v629_v41, %v627_v51  ;;  %v5243_v24 = vpack.c.bf16 %v628_v62, %v626_v57  ;;  %1589 = vmatpush1.bf16.msra.mxu0 %v3807_v32  ;;  %3896 = vrsqrt.f32 %v550_v4  ;;  %v599_v51 = vmul.f32 %v3885_v38, %v4869_v0  ;;  %v3810_v0 = vld [vmem:[%s6955_s1 + $0x38] ss:$24 sps:$4 sm:$0xff]  }
 0x144   :  { %v3887_v21 = vpop.eup %3886  ;;  %v551_v29 = vadd.f32 1e-06, %v519_v25  ;;  %v536_v9 = vadd.f32 1e-06, %v504_v60  ;;  %1590 = vmatprep.subr.bf16.mxu0 %v3815_v13  ;;  %v598_v16 = vmul.f32 %v3885_v38, %v4866_v45  ;;  %v3818_v45 = vld [vmem:[%s6955_s1 + $0x6c] ss:$24 sps:$4 sm:$0xff]  }
 0x145   :  { %v401_v35 = vpop.xlane.xlu1 %400  ;;  %3509 = vmatprep.mubr.msk.bf16.mxu1 %vm80_vm0, %v5241_v46  ;;  %v461_v32 = vpop.xlane.xlu0 %460  ;;  %v601_v41 = vmul.f32 %v3887_v21, %v4876_v55  ;;  %v600_v4 = vmul.f32 %v3887_v21, %v4873_v17  ;;  %v3819_v17 = vld [vmem:[%s6955_s1 + $0x70] ss:$24 sps:$4 sm:$0xff]  }
 0x146   :  { %v3889_v57 = vpop.eup %3888  ;;  %3898 = vrsqrt.f32 %v551_v29  ;;  %v505_v13 = vmul.f32 0.0052083335, %v401_v35  ;;  %v520_v48 = vmul.f32 0.0052083335, %v461_v32  ;;  %1315 = vmatmul.mubr.bf16.vlgmr.msra.gmra.mrb[0].mxu1 %v5243_v24 }
 0x147   :  { %1396 = vmatpush1.bf16.msra.mxu1 %v3804_v53  ;;  %v5261_v62 = vpack.c.bf16 %v601_v41, %v599_v51  ;;  %v5263_v25 = vpack.c.bf16 %v600_v4, %v598_v16  ;;  %1591 = vmatpush1.bf16.msra.mxu0 %v3813_v43  ;;  %3900 = vrsqrt.f32 %v536_v9  ;;  %v3827_v53 = vld [vmem:[%s6955_s1 + $0xa4] ss:$24 sps:$4 sm:$0xff]   ;;  %v631_v29 = vmul.f32 %v3889_v57, %v4891_v33  ;;  %v3816_v33 = vld [vmem:[%s6955_s1 + $0x68] ss:$24 sps:$4 sm:$0xff]  }
 0x148   :  { %v3891_v55 = vpop.eup %3890  ;;  %v537_v38 = vadd.f32 1e-06, %v505_v13  ;;  %v552_v60 = vadd.f32 1e-06, %v520_v48  ;;  %1397 = vmatprep.subr.bf16.mxu1 %v3812_v52  ;;  %1592 = vmatprep.subr.bf16.mxu0 %v3821_v59  ;;  %v630_v32 = vmul.f32 %v3889_v57, %v4888_v6  ;;  %v3824_v6 = vld [vmem:[%s6955_s1 + $0x9c] ss:$24 sps:$4 sm:$0xff]  }
 0x149   :  { %v465_v21 = vpop.xlane.xlu1 %464  ;;  %3502 = vmatprep.mubr.msk.bf16.mxu0 %vm80_vm0, %v5261_v62  ;;  %v405_v43 = vpop.xlane.xlu0 %404  ;;  %v633_v35 = vmul.f32 %v3891_v55, %v4898_v12  ;;  %v632_v9 = vmul.f32 %v3891_v55, %v4895_v2  ;;  %v3825_v2 = vld [vmem:[%s6955_s1 + $0xa0] ss:$24 sps:$4 sm:$0xff]   ;;  %v3833_v13 = vld [vmem:[%s6955_s1 + $0xd4] ss:$24 sps:$4 sm:$0xff]  }
 0x14a   :  { %v3893_v51 = vpop.eup %3892  ;;  %3902 = vrsqrt.f32 %v537_v38  ;;  %v521_v52 = vmul.f32 0.0052083335, %v465_v21  ;;  %v506_v59 = vmul.f32 0.0052083335, %v405_v43  ;;  %1245 = vmatmul.mubr.bf16.gmra.mrb[4].mxu0 %v5263_v25 }
 0x14b   :  { %1398 = vmatpush1.bf16.msra.mxu1 %v3810_v0  ;;  %v5284_v41 = vpack.c.bf16 %v633_v35, %v631_v29  ;;  %v5286_v16 = vpack.c.bf16 %v632_v9, %v630_v32  ;;  %1593 = vmatpush1.bf16.msra.mxu0 %v3819_v17  ;;  %3904 = vrsqrt.f32 %v552_v60  ;;  %v603_v17 = vmul.f32 %v3893_v51, %v4913_v27  ;;  %v3822_v27 = vld [vmem:[%s6955_s1 + $0x98] ss:$24 sps:$4 sm:$0xff]   ;;  %v3839_v9 = vld [vmem:[%s6955_s1 + $0x104] ss:$24 sps:$4 sm:$0xff]  }
 0x14c   :  { %v3895_v12 = vpop.eup %3894  ;;  %v553_v4 = vadd.f32 1e-06, %v521_v52  ;;  %v538_v57 = vadd.f32 1e-06, %v506_v59  ;;  %1399 = vmatprep.subr.bf16.mxu1 %v3818_v45  ;;  %1594 = vmatprep.subr.bf16.mxu0 %v3827_v53  ;;  %v602_v38 = vmul.f32 %v3893_v51, %v4910_v14  ;;  %v3830_v14 = vld [vmem:[%s6955_s1 + $0xcc] ss:$24 sps:$4 sm:$0xff]  }
 0x14d   :  { %v409_v48 = vpop.xlane.xlu1 %408  ;;  %3510 = vmatprep.mubr.msk.bf16.mxu1 %vm80_vm0, %v5284_v41  ;;  %v469_v0 = vpop.xlane.xlu0 %468  ;;  %v605_v55 = vmul.f32 %v3895_v12, %v4920_v20  ;;  %v604_v60 = vmul.f32 %v3895_v12, %v4917_v11  ;;  %v3831_v11 = vld [vmem:[%s6955_s1 + $0xd0] ss:$24 sps:$4 sm:$0xff]  }
 0x14e   :  { %v3897_v21 = vpop.eup %3896  ;;  %3906 = vrsqrt.f32 %v553_v4  ;;  %v507_v45 = vmul.f32 0.0052083335, %v409_v48  ;;  %v522_v53 = vmul.f32 0.0052083335, %v469_v0  ;;  %1325 = vmatmul.mubr.bf16.gmra.mrb[4].mxu1 %v5286_v16 }
 0x14f   :  { %v5307_v43 = vpack.c.bf16 %v605_v55, %v603_v17  ;;  %1400 = vmatpush1.bf16.msra.mxu1 %v3816_v33  ;;  %v5309_v29 = vpack.c.bf16 %v604_v60, %v602_v38  ;;  %1595 = vmatpush1.bf16.msra.mxu0 %v3825_v2  ;;  %3908 = vrsqrt.f32 %v538_v57  ;;  %v635_v59 = vmul.f32 %v3897_v21, %v4938_v18  ;;  %v3828_v18 = vld [vmem:[%s6955_s1 + $0xc8] ss:$24 sps:$4 sm:$0xff]   ;;  %v3845_v55 = vld [vmem:[%s6955_s1 + $0x134] ss:$24 sps:$4 sm:$0xff]  }
 0x150   :  { %v3899_v20 = vpop.eup %3898  ;;  %v539_v35 = vadd.f32 1e-06, %v507_v45  ;;  %v554_v32 = vadd.f32 1e-06, %v522_v53  ;;  %1401 = vmatprep.subr.bf16.mxu1 %v3824_v6  ;;  %1596 = vmatprep.subr.bf16.mxu0 %v3833_v13  ;;  %v634_v2 = vmul.f32 %v3897_v21, %v4935_v7  ;;  %v3836_v7 = vld [vmem:[%s6955_s1 + $0xfc] ss:$24 sps:$4 sm:$0xff]  }
 0x151   :  { %v473_v51 = vpop.xlane.xlu1 %472  ;;  %3503 = vmatprep.mubr.msk.bf16.mxu0 %vm80_vm0, %v5307_v43  ;;  %v413_v52 = vpop.xlane.xlu0 %412  ;;  %v637_v33 = vmul.f32 %v3899_v20, %v4948_v15  ;;  %v636_v12 = vmul.f32 %v3899_v20, %v4945_v5  ;;  %v3837_v5 = vld [vmem:[%s6955_s1 + $0x100] ss:$24 sps:$4 sm:$0xff]  }
 0x152   :  { %v3901_v4 = vpop.eup %3900  ;;  %3910 = vrsqrt.f32 %v539_v35  ;;  %v523_v6 = vmul.f32 0.0052083335, %v473_v51  ;;  %v508_v57 = vmul.f32 0.0052083335, %v413_v52  ;;  %1255 = vmatmul.mubr.bf16.gmra.mrb[8].mxu0 %v5309_v29  ;;  %v3851_v52 = vld [vmem:[%s6955_s1 + $0x164] ss:$24 sps:$4 sm:$0xff]  }
 0x153   :  { %v5330_v13 = vpack.c.bf16 %v637_v33, %v635_v59  ;;  %v5332_v48 = vpack.c.bf16 %v636_v12, %v634_v2  ;;  %1402 = vmatpush1.bf16.msra.mxu1 %v3822_v27  ;;  %1597 = vmatpush1.bf16.msra.mxu0 %v3831_v11  ;;  %3912 = vrsqrt.f32 %v554_v32  ;;  %v607_v21 = vmul.f32 %v3901_v4, %v4963_v22  ;;  %v3834_v22 = vld [vmem:[%s6955_s1 + $0xf8] ss:$24 sps:$4 sm:$0xff]  }
 0x154   :  { %v3903_v15 = vpop.eup %3902  ;;  %v555_v0 = vadd.f32 1e-06, %v523_v6  ;;  %v540_v17 = vadd.f32 1e-06, %v508_v57  ;;  %1403 = vmatprep.subr.bf16.mxu1 %v3830_v14  ;;  %1598 = vmatprep.subr.bf16.mxu0 %v3839_v9  ;;  %v606_v53 = vmul.f32 %v3901_v4, %v4960_v26  ;;  %v3842_v26 = vld [vmem:[%s6955_s1 + $0x12c] ss:$24 sps:$4 sm:$0xff]  }
 0x155   :  { %v417_v38 = vpop.xlane.xlu1 %416  ;;  %3511 = vmatprep.mubr.msk.bf16.mxu1 %vm80_vm0, %v5330_v13  ;;  %v477_v60 = vpop.xlane.xlu0 %476  ;;  %v609_v45 = vmul.f32 %v3903_v15, %v4973_v23  ;;  %v608_v27 = vmul.f32 %v3903_v15, %v4970_v31  ;;  %v3843_v31 = vld [vmem:[%s6955_s1 + $0x130] ss:$24 sps:$4 sm:$0xff]  }
 0x156   :  { %v3905_v11 = vpop.eup %3904  ;;  %3914 = vrsqrt.f32 %v555_v0  ;;  %v509_v14 = vmul.f32 0.0052083335, %v417_v38  ;;  %v524_v20 = vmul.f32 0.0052083335, %v477_v60  ;;  %1335 = vmatmul.mubr.bf16.gmra.mrb[8].mxu1 %v5332_v48 }
 0x157   :  { %v5353_v35 = vpack.c.bf16 %v609_v45, %v607_v21  ;;  %v5355_v32 = vpack.c.bf16 %v608_v27, %v606_v53  ;;  %1404 = vmatpush1.bf16.msra.mxu1 %v3828_v18  ;;  %1599 = vmatpush1.bf16.msra.mxu0 %v3837_v5  ;;  %3916 = vrsqrt.f32 %v540_v17  ;;  %v639_v2 = vmul.f32 %v3905_v11, %v4991_v28  ;;  %v3840_v28 = vld [vmem:[%s6955_s1 + $0x128] ss:$24 sps:$4 sm:$0xff]  }
 0x158   :  { %v3907_v23 = vpop.eup %3906  ;;  %v541_v9 = vadd.f32 1e-06, %v509_v14  ;;  %v556_v51 = vadd.f32 1e-06, %v524_v20  ;;  %1405 = vmatprep.subr.bf16.mxu1 %v3836_v7  ;;  %1600 = vmatprep.subr.bf16.mxu0 %v3845_v55  ;;  %v638_v4 = vmul.f32 %v3905_v11, %v4988_v37  ;;  %v3848_v37 = vld [vmem:[%s6955_s1 + $0x15c] ss:$24 sps:$4 sm:$0xff]  }
 0x159   :  { %v481_v59 = vpop.xlane.xlu1 %480  ;;  %3504 = vmatprep.mubr.msk.bf16.mxu0 %vm80_vm0, %v5353_v35  ;;  %v421_v33 = vpop.xlane.xlu0 %420  ;;  %v641_v12 = vmul.f32 %v3907_v23, %v5001_v36  ;;  %v640_v6 = vmul.f32 %v3907_v23, %v4998_v34  ;;  %v3849_v34 = vld [vmem:[%s6955_s1 + $0x160] ss:$24 sps:$4 sm:$0xff]   ;;  %v3857_v55 = vld [vmem:[%s6955_s1 + $0x194] ss:$24 sps:$4 sm:$0xff]  }
 0x15a   :  { %v3909_v57 = vpop.eup %3908  ;;  %3918 = vrsqrt.f32 %v541_v9  ;;  %v525_v18 = vmul.f32 0.0052083335, %v481_v59  ;;  %v510_v7 = vmul.f32 0.0052083335, %v421_v33  ;;  %1265 = vmatmul.mubr.bf16.gmra.mrb[12].mxu0 %v5355_v32  ;;  %v3863_v9 = vld [vmem:[%s6955_s1 + $0x1c4] ss:$24 sps:$4 sm:$0xff]  }
 0x15b   :  { %v5376_v5 = vpack.c.bf16 %v641_v12, %v639_v2  ;;  %v5378_v15 = vpack.c.bf16 %v640_v6, %v638_v4  ;;  %1406 = vmatpush1.bf16.msra.mxu1 %v3834_v22  ;;  %1601 = vmatpush1.bf16.msra.mxu0 %v3843_v31  ;;  %3920 = vrsqrt.f32 %v556_v51  ;;  %v611_v21 = vmul.f32 %v3909_v57, %v5019_v63  ;;  %v3846_v63 = vld [vmem:[%s6955_s1 + $0x158] ss:$24 sps:$4 sm:$0xff]  }
 0x15c   :  { %v3911_v36 = vpop.eup %3910  ;;  %v557_v0 = vadd.f32 1e-06, %v525_v18  ;;  %v542_v17 = vadd.f32 1e-06, %v510_v7  ;;  %1407 = vmatprep.subr.bf16.mxu1 %v3842_v26  ;;  %1602 = vmatprep.subr.bf16.mxu0 %v3851_v52  ;;  %v610_v53 = vmul.f32 %v3909_v57, %v5016_v39  ;;  %v3854_v39 = vld [vmem:[%s6955_s1 + $0x18c] ss:$24 sps:$4 sm:$0xff]  }
 0x15d   :  { %v425_v38 = vpop.xlane.xlu1 %424  ;;  %3512 = vmatprep.mubr.msk.bf16.mxu1 %vm80_vm0, %v5376_v5  ;;  %v485_v60 = vpop.xlane.xlu0 %484  ;;  %v613_v45 = vmul.f32 %v3911_v36, %v5029_v44  ;;  %v612_v27 = vmul.f32 %v3911_v36, %v5026_v30  ;;  %v3855_v30 = vld [vmem:[%s6955_s1 + $0x190] ss:$24 sps:$4 sm:$0xff]  }
 0x15e   :  { %v3913_v11 = vpop.eup %3912  ;;  %3922 = vrsqrt.f32 %v557_v0  ;;  %v511_v14 = vmul.f32 0.0052083335, %v425_v38  ;;  %v526_v20 = vmul.f32 0.0052083335, %v485_v60  ;;  %1345 = vmatmul.mubr.bf16.gmra.mrb[12].mxu1 %v5378_v15 }
 0x15f   :  { %v5399_v22 = vpack.c.bf16 %v613_v45, %v611_v21  ;;  %v5401_v26 = vpack.c.bf16 %v612_v27, %v610_v53  ;;  %1408 = vmatpush1.bf16.msra.mxu1 %v3840_v28  ;;  %1603 = vmatpush1.bf16.msra.mxu0 %v3849_v34  ;;  %3924 = vrsqrt.f32 %v542_v17  ;;  %v643_v59 = vmul.f32 %v3913_v11, %v5047_v10  ;;  %v3852_v10 = vld [vmem:[%s6955_s1 + $0x188] ss:$24 sps:$4 sm:$0xff]   ;;  %v3866_v34 = vld [vmem:[%s6955_s1 + $0x1f4] ss:$24 sps:$4 sm:$0xff]  }
 0x160   :  { %v3915_v44 = vpop.eup %3914  ;;  %v543_v31 = vadd.f32 1e-06, %v511_v14  ;;  %v558_v23 = vadd.f32 1e-06, %v526_v20  ;;  %1409 = vmatprep.subr.bf16.mxu1 %v3848_v37  ;;  %1604 = vmatprep.subr.bf16.mxu0 %v3857_v55  ;;  %v642_v2 = vmul.f32 %v3913_v11, %v5044_v47  ;;  %v3860_v47 = vld [vmem:[%s6955_s1 + $0x1bc] ss:$24 sps:$4 sm:$0xff]  }
 0x161   :  { %v489_v51 = vpop.xlane.xlu1 %488  ;;  %3505 = vmatprep.mubr.msk.bf16.mxu0 %vm80_vm0, %v5399_v22  ;;  %v429_v52 = vpop.xlane.xlu0 %428  ;;  %v645_v33 = vmul.f32 %v3915_v44, %v5057_v1  ;;  %v644_v12 = vmul.f32 %v3915_v44, %v5054_v50  ;;  %v3861_v50 = vld [vmem:[%s6955_s1 + $0x1c0] ss:$24 sps:$4 sm:$0xff]  }
 0x162   :  { %v3917_v4 = vpop.eup %3916  ;;  %3926 = vrsqrt.f32 %v543_v31  ;;  %v527_v6 = vmul.f32 0.0052083335, %v489_v51  ;;  %v512_v57 = vmul.f32 0.0052083335, %v429_v52  ;;  %1275 = vmatmul.mubr.bf16.gmra.mrb[16].mxu0 %v5401_v26  ;;  %v7042_v31 = vld [vmem:[#allocation22_spill] sm:$0xff] }
 0x163   :  { %v5422_v18 = vpack.c.bf16 %v645_v33, %v643_v59  ;;  %v5424_v7 = vpack.c.bf16 %v644_v12, %v642_v2  ;;  %1410 = vmatpush1.bf16.msra.mxu1 %v3846_v63  ;;  %1605 = vmatpush1.bf16.msra.mxu0 %v3855_v30  ;;  %3928 = vrsqrt.f32 %v558_v23  ;;  %v615_v17 = vmul.f32 %v3917_v4, %v5075_v56  ;;  %v3858_v56 = vld [vmem:[%s6955_s1 + $0x1b8] ss:$24 sps:$4 sm:$0xff]   ;;  %v3872_v63 = vld [vmem:[%s6955_s1 + $0x224] ss:$24 sps:$4 sm:$0xff]  }
 0x164   :  { %v3919_v1 = vpop.eup %3918  ;;  %v559_v28 = vadd.f32 1e-06, %v527_v6  ;;  %v544_v37 = vadd.f32 1e-06, %v512_v57  ;;  %1411 = vmatprep.subr.bf16.mxu1 %v3854_v39  ;;  %1606 = vmatprep.subr.bf16.mxu0 %v3863_v9  ;;  %v614_v38 = vmul.f32 %v3917_v4, %v5072_v54  ;;  %v3864_v54 = vld [vmem:[%s6955_s1 + $0x1f0] ss:$24 sps:$4 sm:$0xff]  }
 0x165   :  { %v433_v36 = vpop.xlane.xlu1 %432  ;;  %3513 = vmatprep.mubr.msk.bf16.mxu1 %vm80_vm0, %v5422_v18  ;;  %v493_v0 = vpop.xlane.xlu0 %492  ;;  %v617_v55 = vmul.f32 %v3919_v1, %v5085_v61  ;;  %v616_v60 = vmul.f32 %v3919_v1, %v5082_v58  ;;  %v3869_v58 = vld [vmem:[%s6955_s1 + $0x1ec] ss:$24 sps:$4 sm:$0xff]   ;;  %v7043_v9 = vld [vmem:[#allocation23_spill] sm:$0xff]  ;;  %v7046_v1 = vld [vmem:[#allocation24_spill] sm:$0xff] }
 0x166   :  { %v3921_v21 = vpop.eup %3920  ;;  %3930 = vrsqrt.f32 %v559_v28  ;;  %v513_v45 = vmul.f32 0.0052083335, %v433_v36  ;;  %v528_v53 = vmul.f32 0.0052083335, %v493_v0  ;;  %1355 = vmatmul.mubr.bf16.gmra.mrb[16].mxu1 %v5424_v7  ;;  %v3875_v6 = vld [vmem:[%s6955_s1 + $0x21c] ss:$24 sps:$4 sm:$0xff]  }
 0x167   :  { %v5445_v27 = vpack.c.bf16 %v617_v55, %v615_v17  ;;  %v5447_v11 = vpack.c.bf16 %v616_v60, %v614_v38  ;;  %1412 = vmatpush1.bf16.msra.mxu1 %v3852_v10  ;;  %1607 = vmatpush1.bf16.msra.mxu0 %v3861_v50  ;;  %3932 = vrsqrt.f32 %v544_v37  ;;  %v647_v30 = vmul.f32 %v3921_v21, %v5103_v3  ;;  %v3867_v3 = vld [vmem:[%s6955_s1 + $0x1e8] ss:$24 sps:$4 sm:$0xff]   ;;  %v3873_v55 = vld [vmem:[%s6955_s1 + $0x218] ss:$24 sps:$4 sm:$0xff]  }
 0x168   :  { %v3923_v61 = vpop.eup %3922  ;;  %v545_v14 = vadd.f32 1e-06, %v513_v45  ;;  %v560_v20 = vadd.f32 1e-06, %v528_v53  ;;  %1413 = vmatprep.subr.bf16.mxu1 %v3860_v47  ;;  %1608 = vmatprep.subr.bf16.mxu0 %v3866_v34  ;;  %v646_v23 = vmul.f32 %v3921_v21, %v7042_v31  ;;  %v7044_v57 = vld [vmem:[#allocation25_spill] sm:$0xff]  ;;  %v7047_v37 = vld [vmem:[#allocation26_spill] sm:$0xff] }
 0x169   :  { %v497_v39 = vpop.xlane.xlu1 %496  ;;  %3506 = vmatprep.mubr.msk.bf16.mxu0 %vm80_vm0, %v5445_v27  ;;  %v649_v44 = vmul.f32 %v3923_v61, %v5110_v8  ;;  %v648_v51 = vmul.f32 %v3923_v61, %v7043_v9  ;;  %v3925_v52 = vpop.eup %3924  ;;  %v3870_v8 = vld [vmem:[%s6955_s1 + $0x220] ss:$24 sps:$4 sm:$0xff]  }
 0x16a   :  { %3934 = vrsqrt.f32 %v545_v14  ;;  %v529_v59 = vmul.f32 0.0052083335, %v497_v39  ;;  %1285 = vmatmul.mubr.bf16.gmra.mrb[20].mxu0 %v5447_v11  ;;  %v619_v10 = vmul.f32 %v3925_v52, %v7044_v57  ;;  %v7045_v47 = vld [vmem:[#allocation5_spill] sm:$0xff]  ;;  %v618_v28 = vmul.f32 %v3925_v52, %v7046_v1  ;;  %v7048_v45 = vld [vmem:[#allocation8_spill] sm:$0xff]  ;;  %v7056_v57 = vld [vmem:[#allocation15_spill] sm:$0xff] }
 0x16b   :  { %v5468_v33 = vpack.c.bf16 %v649_v44, %v647_v30  ;;  %v5470_v2 = vpack.c.bf16 %v648_v51, %v646_v23  ;;  %1414 = vmatpush1.bf16.msra.mxu1 %v3858_v56  ;;  %1609 = vmatpush1.bf16.msra.mxu0 %v3864_v54  ;;  %3936 = vrsqrt.f32 %v560_v20  ;;  %v7049_v56 = vld [vmem:[#allocation6_spill] sm:$0xff]  ;;  %v7051_v39 = vld [vmem:[#allocation9_spill] sm:$0xff] }
 0x16c   :  { %v3927_v12 = vpop.eup %3926  ;;  %v561_v4 = vadd.f32 1e-06, %v529_v59  ;;  %1415 = vmatprep.subr.bf16.mxu1 %v3869_v58  ;;  %1610 = vmatprep.subr.bf16.mxu0 %v3872_v63  ;;  %v7050_v63 = vld [vmem:[#allocation7_spill] sm:$0xff]  ;;  %v7052_v44 = vld [vmem:[#allocation10_spill] sm:$0xff] }
 0x16d   :  { %3514 = vmatprep.mubr.msk.bf16.mxu1 %vm80_vm0, %v5468_v33  ;;  %v621_v50 = vmul.f32 %v3927_v12, %v7045_v47  ;;  %v620_v34 = vmul.f32 %v3927_v12, %v7047_v37  ;;  %v3929_v36 = vpop.eup %3928  ;;  %v7053_v59 = vld [vmem:[#allocation11_spill] sm:$0xff] }
 0x16e   :  { %3938 = vrsqrt.f32 %v561_v4  ;;  %1365 = vmatmul.mubr.bf16.gmra.mrb[20].mxu1 %v5470_v2  ;;  %v651_v60 = vmul.f32 %v3929_v36, %v5153_v40  ;;  %v650_v53 = vmul.f32 %v3929_v36, %v7048_v45  ;;  %v7055_v4 = vld [vmem:[#allocation12_spill] sm:$0xff] }
 0x16f   :  { %v5488_v0 = vpack.c.bf16 %v621_v50, %v619_v10  ;;  %v5490_v17 = vpack.c.bf16 %v620_v34, %v618_v28  ;;  %1416 = vmatpush1.bf16.msra.mxu1 %v3867_v3  ;;  %1611 = vmatpush1.bf16.msra.mxu0 %v3870_v8  ;;  %v7054_v8 = vld [vmem:[#allocation13_spill] sm:$0xff]  ;;  %v7057_v10 = vld [vmem:[#allocation16_spill] sm:$0xff] }
 0x170   :  { %v3931_v38 = vpop.eup %3930  ;;  %1417 = vmatprep.subr.bf16.mxu1 %v3875_v6 }
 0x171   :  { %3507 = vmatprep.mubr.msk.bf16.mxu0 %vm80_vm0, %v5488_v0  ;;  %v653_v21 = vmul.f32 %v3931_v38, %v5160_v49  ;;  %v652_v54 = vmul.f32 %v3931_v38, %v7049_v56  ;;  %v3933_v58 = vpop.eup %3932 }
 0x172   :  { %1295 = vmatmul.mubr.bf16.gmra.mrb[24].mxu0 %v5490_v17  ;;  %v623_v40 = vmul.f32 %v3933_v58, %v7050_v63  ;;  %v622_v30 = vmul.f32 %v3933_v58, %v7051_v39 }
 0x173   :  { %v5502_v61 = vpack.c.bf16 %v653_v21, %v651_v60  ;;  %v5504_v14 = vpack.c.bf16 %v652_v54, %v650_v53  ;;  %1418 = vmatpush1.bf16.msra.mxu1 %v3873_v55 }
 0x174   :  { %v3935_v20 = vpop.eup %3934 }
 0x175   :  { %3515 = vmatprep.mubr.msk.bf16.mxu1 %vm80_vm0, %v5502_v61  ;;  %v625_v49 = vmul.f32 %v3935_v20, %v5182_v42  ;;  %v624_v31 = vmul.f32 %v3935_v20, %v7052_v44  ;;  %v3937_v23 = vpop.eup %3936 }
 0x176   :  { %1375 = vmatmul.mubr.bf16.gmra.mrb[24].mxu1 %v5504_v14  ;;  %v655_v3 = vmul.f32 %v3937_v23, %v7053_v59  ;;  %v654_v6 = vmul.f32 %v3937_v23, %v7055_v4 }
 0x177   :  { %v673_v9 = vpack.c.bf16 %v625_v49, %v623_v40  ;;  %v672_v51 = vpack.c.bf16 %v624_v31, %v622_v30 }
 0x178   :  { %v3939_v52 = vpop.eup %3938 }
 0x179   :  { %3508 = vmatprep.mubr.msk.bf16.mxu0 %vm80_vm0, %v673_v9  ;;  %v657_v12 = vmul.f32 %v3939_v52, %v7054_v8  ;;  %v656_v42 = vmul.f32 %v3939_v52, %v7056_v57 }
 0x17a   :  { %1305 = vmatmul.mubr.bf16.gmra.mrb[28].mxu0 %v672_v51 }
 0x17b   :  { %3533 = vmatprep.mubr.msk.bf16.mxu0 %vm80_vm0, %v7057_v10  ;;  %v5520_v47 = vpack.c.bf16 %v657_v12, %v655_v3  ;;  %v5522_v50 = vpack.c.bf16 %v656_v42, %v654_v6 }
 0x17d   :  { %3516 = vmatprep.mubr.msk.bf16.mxu1 %vm80_vm0, %v5520_v47 }
 0x17e   :  { %1385 = vmatmul.mubr.bf16.gmra.mrb[28].mxu1 %v5522_v50 }
 0x17f   :  { %3517 = vmatprep.mubr.msk.bf16.mxu1 %vm80_vm0, %v7057_v10 }
 0x182   :  { %1621 = vmatmul.mubr.bf16.vlgmr.msra.gmra.mrb[32].mxu0 %v5223_v19 }
 0x183   :  { %3534 = vmatprep.mubr.msk.bf16.mxu0 %vm80_vm0, %v5261_v62 }
 0x186   :  { %1428 = vmatmul.mubr.bf16.vlgmr.msra.gmra.mrb[32].mxu1 %v5223_v19 }
 0x187   :  { %3518 = vmatprep.mubr.msk.bf16.mxu1 %vm80_vm0, %v5261_v62  ;;  %v5623_v62 = vld [vmem:[%s6956_s2] sm:$0x3f]  ;;  %s4348_s2 = smov [#allocation2]  }
 0x188   :  { %s3418_s9 = sshll.u32 %s4348_s2, 4  ;;  %s3419_s9 = int_to_ptr.vmem [resolvable:$true] %s3418_s9 }
 0x189   :  { %s4324_s10 = scalar_lea.vmem %s3419_s9, 12288  ;;  %p4329_p1 = scmp.lt.s32.totalorder %s3419_s9, %s3419_s9 }
 0x18a   :  { %1631 = vmatmul.mubr.bf16.gmra.mrb[36].mxu0 %v5263_v25  ;;  %p4325_p0 = scmp.ne.s32.totalorder %s3419_s9, %s4324_s10  ;;  %p4330_p2 = scmp.lt.s32.totalorder %s4324_s10, %s4324_s10 }
 0x18b   :  { %3535 = vmatprep.mubr.msk.bf16.mxu0 %vm80_vm0, %v5307_v43 }
 0x18c   :  { %p4331_p3 = por %p4330_p2, %p4329_p1 }
 0x18e   :  { %1438 = vmatmul.mubr.bf16.gmra.mrb[36].mxu1 %v5263_v25  ;;  %p4332_p4 = pnand %p4331_p3, %p4325_p0 }
 0x18f   :  { %3519 = vmatprep.mubr.msk.bf16.mxu1 %vm80_vm0, %v5307_v43 }
 0x192   :  { %1641 = vmatmul.mubr.bf16.gmra.mrb[40].mxu0 %v5309_v29 }
 0x193   :  { %3536 = vmatprep.mubr.msk.bf16.mxu0 %vm80_vm0, %v5353_v35 }
 0x196   :  { %1448 = vmatmul.mubr.bf16.gmra.mrb[40].mxu1 %v5309_v29 }
 0x197   :  { %3520 = vmatprep.mubr.msk.bf16.mxu1 %vm80_vm0, %v5353_v35 }
 0x19a   :  { %1651 = vmatmul.mubr.bf16.gmra.mrb[44].mxu0 %v5355_v32 }
 0x19b   :  { %3537 = vmatprep.mubr.msk.bf16.mxu0 %vm80_vm0, %v5399_v22 }
 0x19e   :  { %1458 = vmatmul.mubr.bf16.gmra.mrb[44].mxu1 %v5355_v32 }
 0x19f   :  { %3521 = vmatprep.mubr.msk.bf16.mxu1 %vm80_vm0, %v5399_v22 }
 0x1a2   :  { %1661 = vmatmul.mubr.bf16.gmra.mrb[48].mxu0 %v5401_v26 }
 0x1a3   :  { %3538 = vmatprep.mubr.msk.bf16.mxu0 %vm80_vm0, %v5445_v27 }
 0x1a6   :  { %1468 = vmatmul.mubr.bf16.gmra.mrb[48].mxu1 %v5401_v26 }
 0x1a7   :  { %3522 = vmatprep.mubr.msk.bf16.mxu1 %vm80_vm0, %v5445_v27 }
 0x1aa   :  { %1671 = vmatmul.mubr.bf16.gmra.mrb[52].mxu0 %v5447_v11 }
 0x1ab   :  { %3539 = vmatprep.mubr.msk.bf16.mxu0 %vm80_vm0, %v5488_v0 }
 0x1ae   :  { %1478 = vmatmul.mubr.bf16.gmra.mrb[52].mxu1 %v5447_v11 }
 0x1af   :  { %3523 = vmatprep.mubr.msk.bf16.mxu1 %vm80_vm0, %v5488_v0 }
 0x1b2   :  { %1681 = vmatmul.mubr.bf16.gmra.mrb[56].mxu0 %v5490_v17 }
 0x1b3   :  { %3540 = vmatprep.mubr.msk.bf16.mxu0 %vm80_vm0, %v673_v9 }
 0x1b6   :  { %1488 = vmatmul.mubr.bf16.gmra.mrb[56].mxu1 %v5490_v17 }
 0x1b7   :  { %3524 = vmatprep.mubr.msk.bf16.mxu1 %vm80_vm0, %v673_v9 }
 0x1ba   :  { %1691 = vmatmul.mubr.bf16.gmra.mrb[60].mxu0 %v672_v51 }
 0x1bb   :  { %3541 = vmatprep.mubr.msk.bf16.mxu0 %vm80_vm0, %v5241_v46 }
 0x1be   :  { %1498 = vmatmul.mubr.bf16.gmra.mrb[60].mxu1 %v672_v51 }
 0x1bf   :  { %3525 = vmatprep.mubr.msk.bf16.mxu1 %vm80_vm0, %v5241_v46 }
 0x1c2   :  { %1701 = vmatmul.mubr.bf16.gmra.mrb[64].mxu0 %v5243_v24 }
 0x1c3   :  { %3542 = vmatprep.mubr.msk.bf16.mxu0 %vm80_vm0, %v5284_v41 }
 0x1c6   :  { %1508 = vmatmul.mubr.bf16.gmra.mrb[64].mxu1 %v5243_v24  ;;  %v764_v24 = vlaneseq }
 0x1c7   :  { %3526 = vmatprep.mubr.msk.bf16.mxu1 %vm80_vm0, %v5284_v41 }
 0x1c8   :  { %v5617_v19 = vshrl.u32 %v764_v24, 7 }
 0x1ca   :  { %1711 = vmatmul.mubr.bf16.gmra.mrb[68].mxu0 %v5286_v16  ;;  %v766_v46 = vsub.s32 0, %v5617_v19  ;;  %v770_v25 = vsub.s32 1, %v5617_v19  ;;  %v782_v29 = vsub.s32 4, %v5617_v19  ;;  %v786_v35 = vsub.s32 5, %v5617_v19 }
 0x1cb   :  { %3543 = vmatprep.mubr.msk.bf16.mxu0 %vm80_vm0, %v5330_v13  ;;  %v774_v0 = vsub.s32 2, %v5617_v19  ;;  %v778_v60 = vsub.s32 3, %v5617_v19 }
 0x1cc   :  { %v5627_v41 = vrot.slane %v5623_v62, %v766_v46  ;;  %v5639_v11 = vrot.slane %v5623_v62, %v782_v29  ;;  %v5643_v28 = vrot.slane %v5623_v62, %v786_v35 }
 0x1ce   :  { %1518 = vmatmul.mubr.bf16.gmra.mrb[68].mxu1 %v5286_v16  ;;  %v5630_v16 = vrot.slane %v5623_v62, %v770_v25 }
 0x1cf   :  { %3527 = vmatprep.mubr.msk.bf16.mxu1 %vm80_vm0, %v5330_v13 }
 0x1d2   :  { %1721 = vmatmul.mubr.bf16.gmra.mrb[72].mxu0 %v5332_v48 }
 0x1d3   :  { %3544 = vmatprep.mubr.msk.bf16.mxu0 %vm80_vm0, %v5376_v5 }
 0x1d6   :  { %1528 = vmatmul.mubr.bf16.gmra.mrb[72].mxu1 %v5332_v48 }
 0x1d7   :  { %3528 = vmatprep.mubr.msk.bf16.mxu1 %vm80_vm0, %v5376_v5 }
 0x1da   :  { %1731 = vmatmul.mubr.bf16.gmra.mrb[76].mxu0 %v5378_v15 }
 0x1db   :  { %3545 = vmatprep.mubr.msk.bf16.mxu0 %vm80_vm0, %v5422_v18 }
 0x1de   :  { %1538 = vmatmul.mubr.bf16.gmra.mrb[76].mxu1 %v5378_v15 }
 0x1df   :  { %3529 = vmatprep.mubr.msk.bf16.mxu1 %vm80_vm0, %v5422_v18 }
 0x1e2   :  { %1741 = vmatmul.mubr.bf16.gmra.mrb[80].mxu0 %v5424_v7 }
 0x1e3   :  { %3546 = vmatprep.mubr.msk.bf16.mxu0 %vm80_vm0, %v5468_v33 }
 0x1e6   :  { %1548 = vmatmul.mubr.bf16.gmra.mrb[80].mxu1 %v5424_v7 }
 0x1e7   :  { %3530 = vmatprep.mubr.msk.bf16.mxu1 %vm80_vm0, %v5468_v33 }
 0x1ea   :  { %1751 = vmatmul.mubr.bf16.gmra.mrb[84].mxu0 %v5470_v2 }
 0x1eb   :  { %3547 = vmatprep.mubr.msk.bf16.mxu0 %vm80_vm0, %v5502_v61 }
 0x1ee   :  { %1558 = vmatmul.mubr.bf16.gmra.mrb[84].mxu1 %v5470_v2 }
 0x1ef   :  { %3531 = vmatprep.mubr.msk.bf16.mxu1 %vm80_vm0, %v5502_v61 }
 0x1f2   :  { %1761 = vmatmul.mubr.bf16.gmra.mrb[88].mxu0 %v5504_v14 }
 0x1f3   :  { %3548 = vmatprep.mubr.msk.bf16.mxu0 %vm80_vm0, %v5520_v47 }
 0x1f6   :  { %1568 = vmatmul.mubr.bf16.gmra.mrb[88].mxu1 %v5504_v14 }
 0x1f7   :  { %3532 = vmatprep.mubr.msk.bf16.mxu1 %vm80_vm0, %v5520_v47 }
 0x1fa   :  { %1771 = vmatmul.mubr.bf16.gmra.mrb[92].mxu0 %v5522_v50 }
 0x1fe   :  { %1578 = vmatmul.mubr.bf16.gmra.mrb[92].mxu1 %v5522_v50 }
 0x215   :  { %v1236_v43 = vpop.f32.mrb[0].mxu0 }
 0x216   :  { %v1237_v13 = vadd.f32 %v1236_v43, %v5627_v41  ;;  %v1238_v48 = vpop.f32.mrb[1].mxu0 }
 0x217   :  { %v1239_v32 = vadd.f32 %v1238_v48, %v5630_v16  ;;  %v1240_v5 = vpop.f32.mrb[2].mxu0 }
 0x218   :  { %v1973_v15 = vmul.f32 0.70710677, %v1237_v13  ;;  %v1241_v22 = vadd.f32 %v1240_v5, %v5627_v41  ;;  %v1242_v26 = vpop.f32.mrb[3].mxu0  ;;  %v1781_v21 = vmul.f32 0.5, %v1237_v13 }
 0x219   :  { %v1974_v18 = vmul.f32 0.70710677, %v1239_v32  ;;  %v1243_v7 = vadd.f32 %v1242_v26, %v5630_v16  ;;  %v1316_v27 = vpop.f32.mrb[0].mxu1  ;;  %v1782_v54 = vmul.f32 0.5, %v1239_v32 }
 0x21a   :  { %3940 = verf.f32 %v1973_v15  ;;  %v1979_v33 = vmul.f32 0.70710677, %v1241_v22  ;;  %v1317_v2 = vadd.f32 %v1316_v27, %v5627_v41  ;;  %v1318_v1 = vpop.f32.mrb[1].mxu1  ;;  %v1787_v20 = vmul.f32 0.5, %v1241_v22 }
 0x21b   :  { %3942 = verf.f32 %v1974_v18  ;;  %v1980_v37 = vmul.f32 0.70710677, %v1243_v7  ;;  %v1319_v34 = vadd.f32 %v1318_v1, %v5630_v16  ;;  %v1320_v36 = vpop.f32.mrb[2].mxu1  ;;  %v1788_v39 = vmul.f32 0.5, %v1243_v7 }
 0x21c   :  { %3944 = verf.f32 %v1979_v33  ;;  %v2069_v17 = vmul.f32 0.70710677, %v1317_v2  ;;  %v1321_v55 = vadd.f32 %v1320_v36, %v5627_v41  ;;  %v1322_v38 = vpop.f32.mrb[3].mxu1  ;;  %v1877_v23 = vmul.f32 0.5, %v1317_v2 }
 0x21d   :  { %3946 = verf.f32 %v1980_v37  ;;  %v2070_v45 = vmul.f32 0.70710677, %v1319_v34  ;;  %v1323_v53 = vadd.f32 %v1322_v38, %v5630_v16  ;;  %v1246_v56 = vpop.f32.mrb[4].mxu0  ;;  %v1878_v59 = vmul.f32 0.5, %v1319_v34 }
 0x21e   :  { %3948 = verf.f32 %v2069_v17  ;;  %v2075_v58 = vmul.f32 0.70710677, %v1321_v55  ;;  %v1247_v61 = vadd.f32 %v1246_v56, %v5627_v41  ;;  %v1248_v14 = vpop.f32.mrb[5].mxu0  ;;  %v1883_v4 = vmul.f32 0.5, %v1321_v55 }
 0x21f   :  { %3950 = verf.f32 %v2070_v45  ;;  %v2076_v63 = vmul.f32 0.70710677, %v1323_v53  ;;  %v1249_v40 = vadd.f32 %v1248_v14, %v5630_v16  ;;  %v1250_v49 = vpop.f32.mrb[6].mxu0  ;;  %v5660_v47 = vmul.f32 0.5, %v1323_v53 }
 0x220   :  { %3952 = verf.f32 %v2075_v58  ;;  %v1985_v30 = vmul.f32 0.70710677, %v1247_v61  ;;  %v1251_v44 = vadd.f32 %v1250_v49, %v5627_v41  ;;  %v1252_v31 = vpop.f32.mrb[7].mxu0  ;;  %v1793_v29 = vmul.f32 0.5, %v1247_v61 }
 0x221   :  { %3954 = verf.f32 %v2076_v63  ;;  %v1986_v9 = vmul.f32 0.70710677, %v1249_v40  ;;  %v1253_v51 = vadd.f32 %v1252_v31, %v5630_v16  ;;  %v1326_v52 = vpop.f32.mrb[4].mxu1  ;;  %v5667_v5 = vmul.f32 0.5, %v1249_v40 }
 0x222   :  { %3956 = verf.f32 %v1985_v30  ;;  %v1991_v3 = vmul.f32 0.70710677, %v1251_v44  ;;  %v5655_v8 = vadd.f32 %v1326_v52, %v5627_v41  ;;  %v1328_v12 = vpop.f32.mrb[5].mxu1  ;;  %v1799_v45 = vmul.f32 0.5, %v1251_v44 }
 0x223   :  { %3958 = verf.f32 %v1986_v9  ;;  %v1992_v6 = vmul.f32 0.70710677, %v1253_v51  ;;  %v5658_v57 = vadd.f32 %v1328_v12, %v5630_v16  ;;  %v1330_v42 = vpop.f32.mrb[6].mxu1  ;;  %v1800_v63 = vmul.f32 0.5, %v1253_v51 }
 0x224   :  { %v3941_v10 = vpop.eup %3940  ;;  %3960 = verf.f32 %v1991_v3  ;;  %v2081_v50 = vmul.f32 0.70710677, %v5655_v8  ;;  %v5664_v24 = vadd.f32 %v1330_v42, %v5627_v41  ;;  %v1332_v46 = vpop.f32.mrb[7].mxu1 }
 0x225   :  { %v3943_v25 = vpop.eup %3942  ;;  %v2357_v43 = vadd.f32 1.0, %v3941_v10  ;;  %3962 = verf.f32 %v1992_v6  ;;  %v2082_v13 = vmul.f32 0.70710677, %v5658_v57  ;;  %v1256_v48 = vpop.f32.mrb[8].mxu0  ;;  %v5671_v27 = vadd.f32 %v1332_v46, %v5630_v16 }
 0x226   :  { %v3945_v35 = vpop.eup %3944  ;;  %v2358_v32 = vadd.f32 1.0, %v3943_v25  ;;  %3964 = verf.f32 %v2081_v50  ;;  %v2087_v15 = vmul.f32 0.70710677, %v5664_v24  ;;  %v1258_v22 = vpop.f32.mrb[9].mxu0  ;;  %v5674_v34 = vadd.f32 %v1256_v48, %v5627_v41 }
 0x227   :  { %v3947_v26 = vpop.eup %3946  ;;  %v2549_v18 = vmul.f32 %v2357_v43, %v1781_v21  ;;  %v2363_v7 = vadd.f32 1.0, %v3945_v35  ;;  %3966 = verf.f32 %v2082_v13  ;;  %v1260_v33 = vpop.f32.mrb[10].mxu0  ;;  %v2088_v21 = vmul.f32 0.70710677, %v5671_v27 }
 0x228   :  { %v3949_v2 = vpop.eup %3948  ;;  %v2550_v1 = vmul.f32 %v2358_v32, %v1782_v54  ;;  %v2364_v37 = vadd.f32 1.0, %v3947_v26  ;;  %3968 = verf.f32 %v2087_v15  ;;  %v1262_v36 = vpop.f32.mrb[11].mxu0  ;;  %v1997_v31 = vmul.f32 0.70710677, %v5674_v34 }
 0x229   :  { %v3951_v17 = vpop.eup %3950  ;;  %v2555_v55 = vmul.f32 %v2363_v7, %v1787_v20  ;;  %v2453_v38 = vadd.f32 1.0, %v3949_v2  ;;  %v5677_v53 = vpop.f32.mrb[8].mxu1  ;;  %3970 = verf.f32 %v2088_v21  ;;  %v5681_v12 = vadd.f32 %v1258_v22, %v5630_v16 }
 0x22a   :  { %v3953_v56 = vpop.eup %3952  ;;  %v3645_v58 = vpack.c.bf16 %v2550_v1, %v2549_v18  ;;  %v2556_v61 = vmul.f32 %v2364_v37, %v1788_v39  ;;  %v2454_v14 = vadd.f32 1.0, %v3951_v17  ;;  %v1338_v54 = vpop.f32.mrb[9].mxu1  ;;  %3972 = verf.f32 %v1997_v31 }
 0x22b   :  { %v3955_v40 = vpop.eup %3954  ;;  %v2645_v49 = vmul.f32 %v2453_v38, %v1877_v23  ;;  %v2459_v30 = vadd.f32 1.0, %v3953_v56  ;;  %v1340_v9 = vpop.f32.mrb[10].mxu1  ;;  %v5684_v23 = vadd.f32 %v1260_v33, %v5627_v41  ;;  %v1889_v43 = vmul.f32 0.5, %v5655_v8 }
 0x22c   :  { %v3957_v20 = vpop.eup %3956  ;;  %3317 = vst [vmem:[#allocation2] sm:$0xff] %v3645_v58  ;;  %v3648_v44 = vpack.c.bf16 %v2556_v61, %v2555_v55  ;;  %v2646_v52 = vmul.f32 %v2454_v14, %v1878_v59  ;;  %v2460_v3 = vadd.f32 1.0, %v3955_v40  ;;  %v1342_v6 = vpop.f32.mrb[11].mxu1  ;;  %v1890_v32 = vmul.f32 0.5, %v5658_v57 }
 0x22d   :  { %v3959_v39 = vpop.eup %3958  ;;  %v2651_v42 = vmul.f32 %v2459_v30, %v1883_v4  ;;  %v2369_v51 = vadd.f32 1.0, %v3957_v20  ;;  %v5686_v10 = vpop.f32.mrb[12].mxu0  ;;  %v1998_v15 = vmul.f32 0.70710677, %v5681_v12  ;;  %v2003_v33 = vmul.f32 0.70710677, %v5684_v23 }
 0x22e   :  { %v3961_v50 = vpop.eup %3960  ;;  %3320 = vst [vmem:[#allocation2 + $0x18] sm:$0xff] %v3648_v44  ;;  %v3693_v46 = vpack.c.bf16 %v2646_v52, %v2645_v49  ;;  %v2652_v25 = vmul.f32 %v2460_v3, %v5660_v47  ;;  %v2370_v59 = vadd.f32 1.0, %v3959_v39  ;;  %v5690_v13 = vpop.f32.mrb[13].mxu0  ;;  %v1263_v57 = vadd.f32 %v1262_v36, %v5630_v16 }
 0x22f   :  { %v3963_v48 = vpop.eup %3962  ;;  %v2561_v35 = vmul.f32 %v2369_v51, %v1793_v29  ;;  %v2375_v4 = vadd.f32 1.0, %v3961_v50  ;;  %v5694_v22 = vpop.f32.mrb[14].mxu0  ;;  %3974 = verf.f32 %v1998_v15  ;;  %v1895_v58 = vmul.f32 0.5, %v5664_v24 }
 0x230   :  { %v3965_v26 = vpop.eup %3964  ;;  %3365 = vst [vmem:[#allocation2 + $0x180] sm:$0xff] %v3693_v46  ;;  %v3696_v18 = vpack.c.bf16 %v2652_v25, %v2651_v42  ;;  %v2562_v7 = vmul.f32 %v2370_v59, %v5667_v5  ;;  %v2376_v47 = vadd.f32 1.0, %v3963_v48  ;;  %v5698_v8 = vpop.f32.mrb[15].mxu0  ;;  %3976 = verf.f32 %v2003_v33 }
 0x231   :  { %v3967_v2 = vpop.eup %3966  ;;  %v2567_v1 = vmul.f32 %v2375_v4, %v1799_v45  ;;  %v2465_v29 = vadd.f32 1.0, %v3965_v26  ;;  %v5701_v37 = vpop.f32.mrb[12].mxu1  ;;  %v2004_v14 = vmul.f32 0.70710677, %v1263_v57  ;;  %v1337_v36 = vadd.f32 %v5677_v53, %v5627_v41 }
 0x232   :  { %v3969_v17 = vpop.eup %3968  ;;  %3368 = vst [vmem:[#allocation2 + $0x198] sm:$0xff] %v3696_v18  ;;  %v3651_v55 = vpack.c.bf16 %v2562_v7, %v2561_v35  ;;  %v2568_v38 = vmul.f32 %v2376_v47, %v1800_v63  ;;  %v2466_v21 = vadd.f32 1.0, %v3967_v2  ;;  %v5703_v5 = vpop.f32.mrb[13].mxu1  ;;  %v1339_v30 = vadd.f32 %v1338_v54, %v5630_v16 }
 0x233   :  { %v2657_v56 = vmul.f32 %v2465_v29, %v1889_v43  ;;  %v2471_v61 = vadd.f32 1.0, %v3969_v17  ;;  %v1350_v45 = vpop.f32.mrb[14].mxu1  ;;  %v3971_v63 = vpop.eup %3970  ;;  %v1896_v20 = vmul.f32 0.5, %v5671_v27  ;;  %3978 = verf.f32 %v2004_v14 }
 0x234   :  { %3323 = vst [vmem:[#allocation2 + $0x30] sm:$0xff] %v3651_v55  ;;  %v3654_v40 = vpack.c.bf16 %v2568_v38, %v2567_v1  ;;  %v2658_v49 = vmul.f32 %v2466_v21, %v1890_v32  ;;  %v5709_v31 = vpop.f32.mrb[15].mxu1  ;;  %v5713_v44 = vadd.f32 %v1340_v9, %v5627_v41  ;;  %v5716_v24 = vadd.f32 %v1342_v6, %v5630_v16  ;;  %v3973_v51 = vpop.eup %3972 }
 0x235   :  { %v5718_v52 = vpop.f32.mrb[16].mxu0  ;;  %v2663_v39 = vmul.f32 %v2471_v61, %v1895_v58  ;;  %v2472_v53 = vadd.f32 1.0, %v3971_v63  ;;  %v2093_v42 = vmul.f32 0.70710677, %v1337_v36  ;;  %v2094_v50 = vmul.f32 0.70710677, %v1339_v30 }
 0x236   :  { %3326 = vst [vmem:[#allocation2 + $0x48] sm:$0xff] %v3654_v40  ;;  %v3699_v3 = vpack.c.bf16 %v2658_v49, %v2657_v56  ;;  %v5720_v54 = vpop.f32.mrb[17].mxu0  ;;  %v2099_v27 = vmul.f32 0.70710677, %v5713_v44  ;;  %v5726_v9 = vrot.slane %v5623_v62, %v774_v0  ;;  %v5731_v6 = vrot.slane %v5623_v62, %v778_v60 }
 0x237   :  { %v2664_v46 = vmul.f32 %v2472_v53, %v1896_v20  ;;  %v1805_v25 = vmul.f32 0.5, %v5674_v34  ;;  %v2381_v59 = vadd.f32 1.0, %v3973_v51  ;;  %3980 = verf.f32 %v2093_v42  ;;  %v5734_v43 = vpop.f32.mrb[18].mxu0 }
 0x238   :  { %3371 = vst [vmem:[#allocation2 + $0x1b0] sm:$0xff] %v3699_v3  ;;  %3982 = verf.f32 %v2094_v50  ;;  %v2100_v48 = vmul.f32 0.70710677, %v5716_v24  ;;  %v5739_v0 = vadd.f32 %v5686_v10, %v5627_v41  ;;  %v5743_v19 = vadd.f32 %v5690_v13, %v5630_v16  ;;  %v5745_v62 = vpop.f32.mrb[19].mxu0 }
 0x239   :  { %v5747_v60 = vpop.f32.mrb[16].mxu1  ;;  %v3702_v34 = vpack.c.bf16 %v2664_v46, %v2663_v39  ;;  %v1806_v35 = vmul.f32 0.5, %v5681_v12  ;;  %3984 = verf.f32 %v2099_v27  ;;  %v5752_v4 = vadd.f32 %v5694_v22, %v5627_v41  ;;  %v3975_v10 = vpop.eup %3974 }
 0x23a   :  { %v5754_v32 = vpop.f32.mrb[17].mxu1  ;;  %v1811_v15 = vmul.f32 0.5, %v5684_v23  ;;  %v1812_v26 = vmul.f32 0.5, %v1263_v57  ;;  %3986 = verf.f32 %v2100_v48  ;;  %v2009_v13 = vmul.f32 0.70710677, %v5739_v0  ;;  %v3977_v7 = vpop.eup %3976 }
 0x23b   :  { %v5758_v18 = vpop.f32.mrb[18].mxu1  ;;  %3374 = vst [vmem:[#allocation2 + $0x1c8] sm:$0xff] %v3702_v34  ;;  %v2573_v47 = vmul.f32 %v2381_v59, %v1805_v25  ;;  %v2382_v12 = vadd.f32 1.0, %v3975_v10  ;;  %v2010_v33 = vmul.f32 0.70710677, %v5743_v19  ;;  %v2387_v2 = vadd.f32 1.0, %v3977_v7 }
 0x23c   :  { %v2015_v22 = vmul.f32 0.70710677, %v5752_v4  ;;  %3988 = verf.f32 %v2009_v13  ;;  %v5764_v1 = vadd.f32 %v5698_v8, %v5630_v16  ;;  %v5768_v23 = vadd.f32 %v5701_v37, %v5627_v41  ;;  %v5770_v29 = vpop.f32.mrb[19].mxu1 }
 0x23d   :  { %v5772_v57 = vpop.f32.mrb[20].mxu0  ;;  %v2574_v17 = vmul.f32 %v2382_v12, %v1806_v35  ;;  %3990 = verf.f32 %v2010_v33  ;;  %v5776_v55 = vadd.f32 %v5703_v5, %v5630_v16  ;;  %v5779_v38 = vadd.f32 %v1350_v45, %v5627_v41  ;;  %v3979_v8 = vpop.eup %3978 }
 0x23e   :  { %v5781_v21 = vpop.f32.mrb[21].mxu0  ;;  %v1901_v56 = vmul.f32 0.5, %v1337_v36  ;;  %v1902_v58 = vmul.f32 0.5, %v1339_v30  ;;  %3992 = verf.f32 %v2015_v22  ;;  %v2016_v37 = vmul.f32 0.70710677, %v5764_v1 }
 0x23f   :  { %v5784_v61 = vpop.f32.mrb[22].mxu0  ;;  %v3657_v14 = vpack.c.bf16 %v2574_v17, %v2573_v47  ;;  %v2579_v40 = vmul.f32 %v2387_v2, %v1811_v15  ;;  %v2388_v49 = vadd.f32 1.0, %v3979_v8  ;;  %v2105_v63 = vmul.f32 0.70710677, %v5768_v23 }
 0x240   :  { %v5787_v5 = vpop.f32.mrb[23].mxu0  ;;  %v1907_v45 = vmul.f32 0.5, %v5713_v44  ;;  %v1908_v20 = vmul.f32 0.5, %v5716_v24  ;;  %3994 = verf.f32 %v2016_v37  ;;  %v2106_v36 = vmul.f32 0.70710677, %v5776_v55 }
 0x241   :  { %v5792_v30 = vpop.f32.mrb[20].mxu1  ;;  %v3981_v3 = vpop.eup %3980  ;;  %3329 = vst [vmem:[#allocation2 + $0x60] sm:$0xff] %v3657_v14  ;;  %v2580_v39 = vmul.f32 %v2388_v49, %v1812_v26  ;;  %3996 = verf.f32 %v2105_v63  ;;  %v2111_v53 = vmul.f32 0.70710677, %v5779_v38  ;;  %v5797_v42 = vadd.f32 %v5709_v31, %v5630_v16 }
 0x242   :  { %v5799_v51 = vpop.f32.mrb[21].mxu1  ;;  %v3983_v44 = vpop.eup %3982  ;;  %v2477_v50 = vadd.f32 1.0, %v3981_v3  ;;  %3998 = verf.f32 %v2106_v36  ;;  %v5803_v24 = vadd.f32 %v5718_v52, %v5627_v41  ;;  %v5807_v27 = vadd.f32 %v5720_v54, %v5630_v16 }
 0x243   :  { %v5809_v46 = vpop.f32.mrb[22].mxu1  ;;  %v3985_v25 = vpop.eup %3984  ;;  %v3660_v59 = vpack.c.bf16 %v2580_v39, %v2579_v40  ;;  %v2478_v48 = vadd.f32 1.0, %v3983_v44  ;;  %v1817_v31 = vmul.f32 0.5, %v5739_v0  ;;  %4000 = verf.f32 %v2111_v53 }
 0x244   :  { %v5812_v34 = vpop.f32.mrb[23].mxu1  ;;  %v3987_v35 = vpop.eup %3986  ;;  %v2669_v10 = vmul.f32 %v2477_v50, %v1901_v56  ;;  %v2483_v15 = vadd.f32 1.0, %v3985_v25  ;;  %v1818_v52 = vmul.f32 0.5, %v5743_v19  ;;  %v2112_v26 = vmul.f32 0.70710677, %v5797_v42 }
 0x245   :  { %v5816_v13 = vpop.f32.mrb[24].mxu0  ;;  %3332 = vst [vmem:[#allocation2 + $0x78] sm:$0xff] %v3660_v59  ;;  %v2670_v54 = vmul.f32 %v2478_v48, %v1902_v58  ;;  %v2484_v7 = vadd.f32 1.0, %v3987_v35  ;;  %v1823_v47 = vmul.f32 0.5, %v5752_v4  ;;  %v2021_v12 = vmul.f32 0.70710677, %v5803_v24 }
 0x246   :  { %v5820_v0 = vpop.f32.mrb[25].mxu0  ;;  %v3989_v33 = vpop.eup %3988  ;;  %v2675_v22 = vmul.f32 %v2483_v15, %v1907_v45  ;;  %4002 = verf.f32 %v2112_v26  ;;  %v2022_v2 = vmul.f32 0.70710677, %v5807_v27  ;;  %v5825_v19 = vadd.f32 %v5734_v43, %v5627_v41 }
 0x247   :  { %v5827_v17 = vpop.f32.mrb[26].mxu0  ;;  %v3991_v8 = vpop.eup %3990  ;;  %v3705_v56 = vpack.c.bf16 %v2670_v54, %v2669_v10  ;;  %v2676_v58 = vmul.f32 %v2484_v7, %v1908_v20  ;;  %v2393_v37 = vadd.f32 1.0, %v3989_v33  ;;  %4004 = verf.f32 %v2021_v12 }
 0x248   :  { %v5829_v4 = vpop.f32.mrb[27].mxu0  ;;  %v3993_v14 = vpop.eup %3992  ;;  %v2394_v40 = vadd.f32 1.0, %v3991_v8  ;;  %v1824_v49 = vmul.f32 0.5, %v5764_v1  ;;  %4006 = verf.f32 %v2022_v2  ;;  %v2027_v63 = vmul.f32 0.70710677, %v5825_v19 }
 0x249   :  { %v5833_v45 = vpop.f32.mrb[24].mxu1  ;;  %3377 = vst [vmem:[#allocation2 + $0x1e0] sm:$0xff] %v3705_v56  ;;  %v3708_v43 = vpack.c.bf16 %v2676_v58, %v2675_v22  ;;  %v2585_v36 = vmul.f32 %v2393_v37, %v1817_v31  ;;  %v2399_v3 = vadd.f32 1.0, %v3993_v14  ;;  %v5837_v20 = vadd.f32 %v5745_v62, %v5630_v16 }
 0x24a   :  { %v5839_v39 = vpop.f32.mrb[25].mxu1  ;;  %v3995_v53 = vpop.eup %3994  ;;  %v2586_v44 = vmul.f32 %v2394_v40, %v1818_v52  ;;  %4008 = verf.f32 %v2027_v63  ;;  %v5843_v1 = vadd.f32 %v5747_v60, %v5627_v41  ;;  %v5847_v50 = vadd.f32 %v5754_v32, %v5630_v16 }
 0x24b   :  { %v5849_v25 = vpop.f32.mrb[26].mxu1  ;;  %v3997_v59 = vpop.eup %3996  ;;  %3380 = vst [vmem:[#allocation2 + $0x1f8] sm:$0xff] %v3708_v43  ;;  %v2591_v48 = vmul.f32 %v2399_v3, %v1823_v47  ;;  %v2400_v62 = vadd.f32 1.0, %v3995_v53  ;;  %v1913_v31 = vmul.f32 0.5, %v5768_v23  ;;  %v2028_v35 = vmul.f32 0.70710677, %v5837_v20 }
 0x24c   :  { %v5853_v10 = vpop.f32.mrb[27].mxu1  ;;  %v3999_v15 = vpop.eup %3998  ;;  %v3663_v52 = vpack.c.bf16 %v2586_v44, %v2585_v36  ;;  %v2489_v60 = vadd.f32 1.0, %v3997_v59  ;;  %v1914_v26 = vmul.f32 0.5, %v5776_v55  ;;  %v2117_v32 = vmul.f32 0.70710677, %v5843_v1 }
 0x24d   :  { %v5857_v54 = vpop.f32.mrb[28].mxu0  ;;  %v4001_v7 = vpop.eup %4000  ;;  %v2592_v12 = vmul.f32 %v2400_v62, %v1824_v49  ;;  %v2490_v33 = vadd.f32 1.0, %v3999_v15  ;;  %v1919_v47 = vmul.f32 0.5, %v5779_v38  ;;  %4010 = verf.f32 %v2028_v35 }
 0x24e   :  { %v5860_v23 = vpop.f32.mrb[29].mxu0  ;;  %3335 = vst [vmem:[#allocation2 + $0x90] sm:$0xff] %v3663_v52  ;;  %v2681_v22 = vmul.f32 %v2489_v60, %v1913_v31  ;;  %v2495_v2 = vadd.f32 1.0, %v4001_v7  ;;  %4012 = verf.f32 %v2117_v32  ;;  %v2118_v8 = vmul.f32 0.70710677, %v5847_v50 }
 0x24f   :  { %v5863_v56 = vpop.f32.mrb[30].mxu0  ;;  %v3666_v55 = vpack.c.bf16 %v2592_v12, %v2591_v48  ;;  %v2682_v58 = vmul.f32 %v2490_v33, %v1914_v26  ;;  %v5867_v37 = vadd.f32 %v5758_v18, %v5627_v41  ;;  %v5871_v38 = vadd.f32 %v5770_v29, %v5630_v16 }
 0x250   :  { %v5873_v14 = vpop.f32.mrb[31].mxu0  ;;  %v4003_v40 = vpop.eup %4002  ;;  %v1920_v49 = vmul.f32 0.5, %v5797_v42  ;;  %4014 = verf.f32 %v2118_v8  ;;  %v5878_v63 = vadd.f32 %v5772_v57, %v5627_v41  ;;  %v5882_v43 = vadd.f32 %v5781_v21, %v5630_v16 }
 0x251   :  { %v5884_v18 = vpop.f32.mrb[28].mxu1  ;;  %v4005_v36 = vpop.eup %4004  ;;  %3338 = vst [vmem:[#allocation2 + $0xa8] sm:$0xff] %v3666_v55  ;;  %v3711_v29 = vpack.c.bf16 %v2682_v58, %v2681_v22  ;;  %v2687_v3 = vmul.f32 %v2495_v2, %v1919_v47  ;;  %v2496_v53 = vadd.f32 1.0, %v4003_v40  ;;  %v2123_v44 = vmul.f32 0.70710677, %v5867_v37 }
 0x252   :  { %v5887_v59 = vpop.f32.mrb[29].mxu1  ;;  %v4007_v42 = vpop.eup %4006  ;;  %v1829_v48 = vmul.f32 0.5, %v5803_v24  ;;  %v2405_v57 = vadd.f32 1.0, %v4005_v36  ;;  %v1830_v62 = vmul.f32 0.5, %v5807_v27  ;;  %v2124_v21 = vmul.f32 0.70710677, %v5871_v38 }
 0x253   :  { %v5892_v31 = vpop.f32.mrb[30].mxu1  ;;  %3383 = vst [vmem:[#allocation2 + $0x210] sm:$0xff] %v3711_v29  ;;  %v2688_v35 = vmul.f32 %v2496_v53, %v1920_v49  ;;  %v2406_v15 = vadd.f32 1.0, %v4007_v42  ;;  %4016 = verf.f32 %v2123_v44  ;;  %v2033_v52 = vmul.f32 0.70710677, %v5878_v63 }
 0x254   :  { %v5895_v60 = vpop.f32.mrb[31].mxu1  ;;  %v4009_v26 = vpop.eup %4008  ;;  %v2597_v32 = vmul.f32 %v2405_v57, %v1829_v48  ;;  %v1835_v7 = vmul.f32 0.5, %v5825_v19  ;;  %4018 = verf.f32 %v2124_v21  ;;  %v2034_v24 = vmul.f32 0.70710677, %v5882_v43 }
 0x255   :  { %v5899_v27 = vpop.f32.mrb[32].mxu0  ;;  %v3714_v12 = vpack.c.bf16 %v2688_v35, %v2687_v3  ;;  %v2598_v33 = vmul.f32 %v2406_v15, %v1830_v62  ;;  %v2411_v47 = vadd.f32 1.0, %v4009_v26  ;;  %4020 = verf.f32 %v2033_v52 }
 0x256   :  { %v5901_v22 = vpop.f32.mrb[33].mxu0  ;;  %4022 = verf.f32 %v2034_v24  ;;  %v1291_v2 = vadd.f32 %v5784_v61, %v5627_v41  ;;  %v5907_v8 = vadd.f32 %v5787_v5, %v5630_v16  ;;  %v5911_v19 = vadd.f32 %v5792_v30, %v5627_v41 }
 0x257   :  { %v5913_v55 = vpop.f32.mrb[34].mxu0  ;;  %v4011_v58 = vpop.eup %4010  ;;  %3386 = vst [vmem:[#allocation2 + $0x228] sm:$0xff] %v3714_v12  ;;  %v3669_v40 = vpack.c.bf16 %v2598_v33, %v2597_v32  ;;  %v1836_v49 = vmul.f32 0.5, %v5837_v20  ;;  %v1925_v36 = vmul.f32 0.5, %v5843_v1  ;;  %v5919_v61 = vadd.f32 %v5799_v51, %v5630_v16 }
 0x258   :  { %v5921_v29 = vpop.f32.mrb[35].mxu0  ;;  %v4013_v5 = vpop.eup %4012  ;;  %v2603_v3 = vmul.f32 %v2411_v47, %v1835_v7  ;;  %v2412_v53 = vadd.f32 1.0, %v4011_v58  ;;  %v2039_v30 = vmul.f32 0.70710677, %v1291_v2  ;;  %v5925_v44 = vadd.f32 %v5809_v46, %v5627_v41 }
 0x259   :  { %v5927_v42 = vpop.f32.mrb[32].mxu1  ;;  %3341 = vst [vmem:[#allocation2 + $0xc0] sm:$0xff] %v3669_v40  ;;  %v2501_v20 = vadd.f32 1.0, %v4013_v5  ;;  %v1926_v1 = vmul.f32 0.5, %v5847_v50  ;;  %v2040_v48 = vmul.f32 0.70710677, %v5907_v8  ;;  %v5942_v24 = vadd.f32 %v5812_v34, %v5630_v16 }
 0x25a   :  { %v2129_v51 = vmul.f32 0.70710677, %v5911_v19  ;;  %v4015_v57 = vpop.eup %4014  ;;  %v2604_v62 = vmul.f32 %v2412_v53, %v1836_v49  ;;  %v1931_v21 = vmul.f32 0.5, %v5867_v37  ;;  %4024 = verf.f32 %v2039_v30  ;;  %v5934_v15 = vpop.f32.mrb[33].mxu1 }
 0x25b   :  { %v2130_v35 = vmul.f32 0.70710677, %v5919_v61  ;;  %v2693_v46 = vmul.f32 %v2501_v20, %v1925_v36  ;;  %v2502_v52 = vadd.f32 1.0, %v4015_v57  ;;  %v1932_v26 = vmul.f32 0.5, %v5871_v38  ;;  %v5937_v32 = vpop.f32.mrb[34].mxu1 }
 0x25c   :  { %4026 = verf.f32 %v2040_v48  ;;  %v3672_v50 = vpack.c.bf16 %v2604_v62, %v2603_v3  ;;  %v2135_v7 = vmul.f32 0.70710677, %v5925_v44  ;;  %v5944_v37 = vpop.f32.mrb[35].mxu1  ;;  %v5950_v38 = vadd.f32 %v5816_v13, %v5627_v41 }
 0x25d   :  { %4028 = verf.f32 %v2129_v51  ;;  %v5946_v12 = vpop.f32.mrb[36].mxu0  ;;  %v4017_v33 = vpop.eup %4016  ;;  %v2694_v47 = vmul.f32 %v2502_v52, %v1926_v1  ;;  %v5954_v58 = vadd.f32 %v5820_v0, %v5630_v16  ;;  %v1841_v36 = vmul.f32 0.5, %v5878_v63 }
 0x25e   :  { %4030 = verf.f32 %v2130_v35  ;;  %v5956_v40 = vpop.f32.mrb[37].mxu0  ;;  %v4019_v49 = vpop.eup %4018  ;;  %3344 = vst [vmem:[#allocation2 + $0xd8] sm:$0xff] %v3672_v50  ;;  %v2507_v34 = vadd.f32 1.0, %v4017_v33  ;;  %v2136_v5 = vmul.f32 0.70710677, %v5942_v24  ;;  %v1842_v20 = vmul.f32 0.5, %v5882_v43 }
 0x25f   :  { %4032 = verf.f32 %v2135_v7  ;;  %v5960_v3 = vpop.f32.mrb[38].mxu0  ;;  %v4021_v53 = vpop.eup %4020  ;;  %v3717_v30 = vpack.c.bf16 %v2694_v47, %v2693_v46  ;;  %v2508_v13 = vadd.f32 1.0, %v4019_v49  ;;  %v2045_v0 = vmul.f32 0.70710677, %v5950_v38 }
 0x260   :  { %v5964_v1 = vpop.f32.mrb[39].mxu0  ;;  %v4023_v48 = vpop.eup %4022  ;;  %v2699_v51 = vmul.f32 %v2507_v34, %v1931_v21  ;;  %v2417_v57 = vadd.f32 1.0, %v4021_v53  ;;  %v1847_v62 = vmul.f32 0.5, %v1291_v2  ;;  %4034 = verf.f32 %v2136_v5 }
 0x261   :  { %v5966_v63 = vpop.f32.mrb[36].mxu1  ;;  %3389 = vst [vmem:[#allocation2 + $0x240] sm:$0xff] %v3717_v30  ;;  %v2700_v35 = vmul.f32 %v2508_v13, %v1932_v26  ;;  %v2418_v52 = vadd.f32 1.0, %v4023_v48  ;;  %4036 = verf.f32 %v2045_v0  ;;  %v2046_v46 = vmul.f32 0.70710677, %v5954_v58 }
 0x262   :  { %v5969_v50 = vpop.f32.mrb[37].mxu1  ;;  %v2609_v43 = vmul.f32 %v2417_v57, %v1841_v36  ;;  %v5973_v7 = vadd.f32 %v5827_v17, %v5627_v41  ;;  %v5977_v21 = vadd.f32 %v5829_v4, %v5630_v16  ;;  %v5981_v2 = vadd.f32 %v5833_v45, %v5627_v41 }
 0x263   :  { %v5983_v26 = vpop.f32.mrb[38].mxu1  ;;  %v3720_v33 = vpack.c.bf16 %v2700_v35, %v2699_v51  ;;  %v2610_v47 = vmul.f32 %v2418_v52, %v1842_v20  ;;  %4038 = verf.f32 %v2046_v46  ;;  %v5987_v49 = vadd.f32 %v5839_v39, %v5630_v16 }
 0x264   :  { %v5989_v34 = vpop.f32.mrb[39].mxu1  ;;  %v4025_v17 = vpop.eup %4024  ;;  %v1848_v36 = vmul.f32 0.5, %v5907_v8  ;;  %v1937_v4 = vmul.f32 0.5, %v5911_v19  ;;  %v2051_v5 = vmul.f32 0.70710677, %v5973_v7  ;;  %v1938_v20 = vmul.f32 0.5, %v5919_v61 }
 0x265   :  { %v2052_v45 = vmul.f32 0.70710677, %v5977_v21  ;;  %3392 = vst [vmem:[#allocation2 + $0x258] sm:$0xff] %v3720_v33  ;;  %v3675_v30 = vpack.c.bf16 %v2610_v47, %v2609_v43  ;;  %v2423_v13 = vadd.f32 1.0, %v4025_v17  ;;  %v2141_v39 = vmul.f32 0.70710677, %v5981_v2 }
 0x266   :  { %v4027_v53 = vpop.eup %4026  ;;  %v5997_v0 = vpop.f32.mrb[40].mxu0  ;;  %v1943_v8 = vmul.f32 0.5, %v5925_v44  ;;  %4040 = verf.f32 %v2051_v5  ;;  %v2142_v19 = vmul.f32 0.70710677, %v5987_v49  ;;  %v6005_v61 = vadd.f32 %v5849_v25, %v5627_v41 }
 0x267   :  { %v4029_v48 = vpop.eup %4028  ;;  %v2424_v51 = vadd.f32 1.0, %v4027_v53  ;;  %v6001_v57 = vpop.f32.mrb[41].mxu0  ;;  %3347 = vst [vmem:[#allocation2 + $0xf0] sm:$0xff] %v3675_v30  ;;  %v2615_v52 = vmul.f32 %v2423_v13, %v1847_v62  ;;  %4042 = verf.f32 %v2052_v45  ;;  %v6011_v44 = vadd.f32 %v5853_v10, %v5630_v16 }
 0x268   :  { %v4031_v35 = vpop.eup %4030  ;;  %v2513_v46 = vadd.f32 1.0, %v4029_v48  ;;  %v6007_v43 = vpop.f32.mrb[42].mxu0  ;;  %4044 = verf.f32 %v2141_v39  ;;  %v1944_v30 = vmul.f32 0.5, %v5942_v24  ;;  %v1853_v39 = vmul.f32 0.5, %v5950_v38 }
 0x269   :  { %7058 = vst [vmem:[#allocation14_spill] sm:$0xff] %v6007_v43  ;;  %v4033_v33 = vpop.eup %4032  ;;  %v2616_v47 = vmul.f32 %v2424_v51, %v1848_v36  ;;  %v2514_v17 = vadd.f32 1.0, %v4031_v35  ;;  %v6013_v5 = vpop.f32.mrb[43].mxu0  ;;  %4046 = verf.f32 %v2142_v19  ;;  %v2147_v51 = vmul.f32 0.70710677, %v6005_v61 }
 0x26a   :  { %7059 = vst [vmem:[#allocation18_spill] sm:$0xff] %v6013_v5  ;;  %v6015_v53 = vpop.f32.mrb[40].mxu1  ;;  %v2705_v62 = vmul.f32 %v2513_v46, %v1937_v4  ;;  %v2519_v45 = vadd.f32 1.0, %v4033_v33  ;;  %v4035_v13 = vpop.eup %4034  ;;  %v2148_v4 = vmul.f32 0.70710677, %v6011_v44  ;;  %v6027_v24 = vadd.f32 %v5857_v54, %v5627_v41 }
 0x26b   :  { %v6018_v25 = vpop.f32.mrb[41].mxu1  ;;  %v3678_v48 = vpack.c.bf16 %v2616_v47, %v2615_v52  ;;  %v2706_v36 = vmul.f32 %v2514_v17, %v1938_v20  ;;  %v4037_v35 = vpop.eup %4036  ;;  %v2520_v43 = vadd.f32 1.0, %v4035_v13  ;;  %4048 = verf.f32 %v2147_v51 }
 0x26c   :  { %v6022_v10 = vpop.f32.mrb[42].mxu1  ;;  %v2711_v5 = vmul.f32 %v2519_v45, %v1943_v8  ;;  %v2429_v20 = vadd.f32 1.0, %v4037_v35  ;;  %v6033_v38 = vadd.f32 %v5860_v23, %v5630_v16  ;;  %v1854_v47 = vmul.f32 0.5, %v5954_v58 }
 0x26d   :  { %v6029_v19 = vpop.f32.mrb[43].mxu1  ;;  %3350 = vst [vmem:[#allocation2 + $0x108] sm:$0xff] %v3678_v48  ;;  %v3723_v52 = vpack.c.bf16 %v2706_v36, %v2705_v62  ;;  %v6035_v46 = vpop.f32.mrb[44].mxu0  ;;  %v2712_v33 = vmul.f32 %v2520_v43, %v1944_v30  ;;  %4050 = verf.f32 %v2148_v4  ;;  %v2057_v54 = vmul.f32 0.70710677, %v6027_v24 }
 0x26e   :  { %v4039_v8 = vpop.eup %4038  ;;  %v6039_v17 = vpop.f32.mrb[45].mxu0  ;;  %v2621_v45 = vmul.f32 %v2429_v20, %v1853_v39  ;;  %v1859_v13 = vmul.f32 0.5, %v5973_v7  ;;  %v2058_v48 = vmul.f32 0.70710677, %v6033_v38  ;;  %v6047_v43 = vadd.f32 %v5863_v56, %v5627_v41 }
 0x26f   :  { %3395 = vst [vmem:[#allocation2 + $0x270] sm:$0xff] %v3723_v52  ;;  %v2430_v62 = vadd.f32 1.0, %v4039_v8  ;;  %v6043_v23 = vpop.f32.mrb[46].mxu0  ;;  %v3726_v36 = vpack.c.bf16 %v2712_v33, %v2711_v5  ;;  %4052 = verf.f32 %v2057_v54  ;;  %v6051_v58 = vadd.f32 %v5873_v14, %v5630_v16 }
 0x270   :  { %v6053_v30 = vpop.f32.mrb[47].mxu0  ;;  %v4041_v39 = vpop.eup %4040  ;;  %v1860_v7 = vmul.f32 0.5, %v5977_v21  ;;  %4054 = verf.f32 %v2058_v48  ;;  %v6058_v35 = vadd.f32 %v5884_v18, %v5627_v41  ;;  %v1949_v52 = vmul.f32 0.5, %v5981_v2 }
 0x271   :  { %v2622_v51 = vmul.f32 %v2430_v62, %v1854_v47  ;;  %v6060_v5 = vpop.f32.mrb[44].mxu1  ;;  %v4043_v4 = vpop.eup %4042  ;;  %3398 = vst [vmem:[#allocation2 + $0x288] sm:$0xff] %v3726_v36  ;;  %v2435_v56 = vadd.f32 1.0, %v4041_v39  ;;  %v2063_v14 = vmul.f32 0.70710677, %v6047_v43  ;;  %v6066_v20 = vadd.f32 %v5887_v59, %v5630_v16 }
 0x272   :  { %7060 = vst [vmem:[#allocation17_spill] sm:$0xff] %v6060_v5  ;;  %v6068_v8 = vpop.f32.mrb[45].mxu1  ;;  %v4045_v21 = vpop.eup %4044  ;;  %v2436_v47 = vadd.f32 1.0, %v4043_v4  ;;  %v1950_v18 = vmul.f32 0.5, %v5987_v49  ;;  %v2064_v54 = vmul.f32 0.70710677, %v6051_v58 }
 0x273   :  { %7061 = vst [vmem:[#allocation20_spill] sm:$0xff] %v6068_v8  ;;  %v3681_v33 = vpack.c.bf16 %v2622_v51, %v2621_v45  ;;  %v6072_v62 = vpop.f32.mrb[46].mxu1  ;;  %v4047_v48 = vpop.eup %4046  ;;  %v2627_v36 = vmul.f32 %v2435_v56, %v1859_v13  ;;  %v2525_v2 = vadd.f32 1.0, %v4045_v21  ;;  %4056 = verf.f32 %v2063_v14 }
 0x274   :  { %v2153_v39 = vmul.f32 0.70710677, %v6058_v35  ;;  %v6075_v5 = vpop.f32.mrb[47].mxu1  ;;  %v2628_v59 = vmul.f32 %v2436_v47, %v1860_v7  ;;  %v2526_v8 = vadd.f32 1.0, %v4047_v48  ;;  %v1955_v45 = vmul.f32 0.5, %v6005_v61 }
 0x275   :  { %3353 = vst [vmem:[#allocation2 + $0x120] sm:$0xff] %v3681_v33  ;;  %4058 = verf.f32 %v2064_v54  ;;  %v6078_v51 = vpop.f32.mrb[48].mxu0  ;;  %v2717_v49 = vmul.f32 %v2525_v2, %v1949_v52  ;;  %v2154_v4 = vmul.f32 0.70710677, %v6066_v20  ;;  %v6083_v13 = vadd.f32 %v5892_v31, %v5627_v41  ;;  %v4049_v14 = vpop.eup %4048 }
 0x276   :  { %4060 = verf.f32 %v2153_v39  ;;  %v6085_v56 = vpop.f32.mrb[49].mxu0  ;;  %v3684_v21 = vpack.c.bf16 %v2628_v59, %v2627_v36  ;;  %v2718_v33 = vmul.f32 %v2526_v8, %v1950_v18  ;;  %v6089_v7 = vadd.f32 %v5895_v60, %v5630_v16 }
 0x277   :  { %v6093_v61 = vadd.f32 %v5899_v27, %v5639_v11  ;;  %v6095_v52 = vpop.f32.mrb[50].mxu0  ;;  %v4051_v47 = vpop.eup %4050  ;;  %v2531_v54 = vadd.f32 1.0, %v4049_v14  ;;  %v1956_v41 = vmul.f32 0.5, %v6011_v44  ;;  %4062 = verf.f32 %v2154_v4 }
 0x278   :  { %v2159_v31 = vmul.f32 0.70710677, %v6083_v13  ;;  %v6099_v48 = vpop.f32.mrb[51].mxu0  ;;  %3356 = vst [vmem:[#allocation2 + $0x138] sm:$0xff] %v3684_v21  ;;  %v3729_v8 = vpack.c.bf16 %v2718_v33, %v2717_v49  ;;  %v2532_v18 = vadd.f32 1.0, %v4051_v47  ;;  %v1865_v16 = vmul.f32 0.5, %v6027_v24 }
 0x279   :  { %v2160_v60 = vmul.f32 0.70710677, %v6089_v7  ;;  %v6103_v27 = vpop.f32.mrb[48].mxu1  ;;  %v4053_v36 = vpop.eup %4052  ;;  %v2723_v2 = vmul.f32 %v2531_v54, %v1955_v45  ;;  %v1866_v39 = vmul.f32 0.5, %v6033_v38  ;;  %v1977_v44 = vmul.f32 0.70710677, %v6093_v61 }
 0x27a   :  { %4064 = verf.f32 %v2159_v31  ;;  %v6107_v59 = vpop.f32.mrb[49].mxu1  ;;  %v4055_v4 = vpop.eup %4054  ;;  %3401 = vst [vmem:[#allocation2 + $0x2a0] sm:$0xff] %v3729_v8  ;;  %v2724_v14 = vmul.f32 %v2532_v18, %v1956_v41  ;;  %v2441_v49 = vadd.f32 1.0, %v4053_v36  ;;  %v6111_v24 = vadd.f32 %v5901_v22, %v5643_v28 }
 0x27b   :  { %4066 = verf.f32 %v2160_v60  ;;  %v6113_v21 = vpop.f32.mrb[50].mxu1  ;;  %v2442_v33 = vadd.f32 1.0, %v4055_v4  ;;  %v6117_v38 = vadd.f32 %v5913_v55, %v5639_v11  ;;  %v6121_v45 = vadd.f32 %v5921_v29, %v5643_v28 }
 0x27c   :  { %4068 = verf.f32 %v1977_v44  ;;  %v6123_v47 = vpop.f32.mrb[51].mxu1  ;;  %v3732_v54 = vpack.c.bf16 %v2724_v14, %v2723_v2  ;;  %v2633_v41 = vmul.f32 %v2441_v49, %v1865_v16  ;;  %v1871_v31 = vmul.f32 0.5, %v6047_v43 }
 0x27d   :  { %v1978_v22 = vmul.f32 0.70710677, %v6111_v24  ;;  %v6127_v8 = vpop.f32.mrb[52].mxu0  ;;  %v4057_v18 = vpop.eup %4056  ;;  %v2634_v60 = vmul.f32 %v2442_v33, %v1866_v39  ;;  %v1872_v36 = vmul.f32 0.5, %v6051_v58  ;;  %v1961_v55 = vmul.f32 0.5, %v6058_v35 }
 0x27e   :  { %v1983_v44 = vmul.f32 0.70710677, %v6117_v38  ;;  %v6132_v29 = vpop.f32.mrb[53].mxu0  ;;  %3404 = vst [vmem:[#allocation2 + $0x2b8] sm:$0xff] %v3732_v54  ;;  %v2447_v2 = vadd.f32 1.0, %v4057_v18  ;;  %v6137_v16 = vadd.f32 %v5927_v42, %v5726_v9  ;;  %v6143_v35 = vadd.f32 %v5934_v15, %v5731_v6 }
 0x27f   :  { %7062 = vst [vmem:[#allocation19_spill] sm:$0xff] %v6132_v29  ;;  %v4059_v4 = vpop.eup %4058  ;;  %4070 = verf.f32 %v1978_v22  ;;  %v1984_v43 = vmul.f32 0.70710677, %v6121_v45  ;;  %v6139_v14 = vpop.f32.mrb[54].mxu0  ;;  %v3687_v58 = vpack.c.bf16 %v2634_v60, %v2633_v41  ;;  %v1962_v18 = vmul.f32 0.5, %v6066_v20 }
 0x280   :  { %7063 = vst [vmem:[#allocation21_spill] sm:$0xff] %v6139_v14  ;;  %v4061_v39 = vpop.eup %4060  ;;  %v2448_v49 = vadd.f32 1.0, %v4059_v4  ;;  %4072 = verf.f32 %v1983_v44  ;;  %v6145_v33 = vpop.f32.mrb[55].mxu0  ;;  %v2639_v54 = vmul.f32 %v2447_v2, %v1871_v31  ;;  %v1967_v41 = vmul.f32 0.5, %v6083_v13 }
 0x281   :  { %7064 = vst [vmem:[#allocation22_spill] sm:$0xff] %v6145_v33  ;;  %v2537_v22 = vadd.f32 1.0, %v4061_v39  ;;  %4074 = verf.f32 %v1984_v43  ;;  %v6148_v29 = vpop.f32.mrb[52].mxu1  ;;  %v4063_v42 = vpop.eup %4062  ;;  %3359 = vst [vmem:[#allocation2 + $0x150] sm:$0xff] %v3687_v58  ;;  %v1975_v60 = vmul.f32 0.70710677, %v6137_v16  ;;  %v6157_v31 = vadd.f32 %v5937_v32, %v5726_v9 }
 0x282   :  { %v2640_v14 = vmul.f32 %v2448_v49, %v1872_v36  ;;  %v1976_v44 = vmul.f32 0.70710677, %v6143_v35  ;;  %v6153_v15 = vpop.f32.mrb[53].mxu1  ;;  %v2538_v33 = vadd.f32 1.0, %v4063_v42  ;;  %v6161_v20 = vadd.f32 %v5944_v37, %v5731_v6 }
 0x283   :  { %v2729_v4 = vmul.f32 %v2537_v22, %v1961_v55  ;;  %v6163_v2 = vpop.f32.mrb[54].mxu1  ;;  %v1968_v43 = vmul.f32 0.5, %v6089_v7  ;;  %4076 = verf.f32 %v1975_v60  ;;  %v6168_v39 = vadd.f32 %v5946_v12, %v5639_v11 }
 0x284   :  { %v4065_v36 = vpop.eup %4064  ;;  %v3690_v13 = vpack.c.bf16 %v2640_v14, %v2639_v54  ;;  %v6170_v55 = vpop.f32.mrb[55].mxu1  ;;  %v2730_v32 = vmul.f32 %v2538_v33, %v1962_v18  ;;  %4078 = verf.f32 %v1976_v44  ;;  %v6174_v37 = vadd.f32 %v5956_v40, %v5643_v28 }
 0x285   :  { %7065 = vst [vmem:[#allocation23_spill] sm:$0xff] %v6170_v55  ;;  %v4067_v58 = vpop.eup %4066  ;;  %v2543_v49 = vadd.f32 1.0, %v4065_v36  ;;  %v6176_v22 = vpop.f32.mrb[56].mxu0  ;;  %v1785_v54 = vmul.f32 0.5, %v6093_v61  ;;  %v1981_v12 = vmul.f32 0.70710677, %v6157_v31 }
 0x286   :  { %7066 = vst [vmem:[#allocation25_spill] sm:$0xff] %v6176_v22  ;;  %v4069_v14 = vpop.eup %4068  ;;  %3362 = vst [vmem:[#allocation2 + $0x168] sm:$0xff] %v3690_v13  ;;  %v2544_v7 = vadd.f32 1.0, %v4067_v58  ;;  %v1982_v42 = vmul.f32 0.70710677, %v6161_v20  ;;  %v3735_v60 = vpack.c.bf16 %v2730_v32, %v2729_v4  ;;  %v1786_v18 = vmul.f32 0.5, %v6111_v24 }
 0x287   :  { %v2735_v55 = vmul.f32 %v2543_v49, %v1967_v41  ;;  %v2361_v33 = vadd.f32 1.0, %v4069_v14  ;;  %v6182_v44 = vpop.f32.mrb[57].mxu0  ;;  %v1791_v36 = vmul.f32 0.5, %v6117_v38  ;;  %4080 = verf.f32 %v1981_v12 }
 0x288   :  { %v2736_v40 = vmul.f32 %v2544_v7, %v1968_v43  ;;  %v1989_v13 = vmul.f32 0.70710677, %v6168_v39  ;;  %v6186_v58 = vpop.f32.mrb[58].mxu0  ;;  %3407 = vst [vmem:[#allocation2 + $0x2d0] sm:$0xff] %v3735_v60  ;;  %4082 = verf.f32 %v1982_v42  ;;  %v1990_v4 = vmul.f32 0.70710677, %v6174_v37 }
 0x289   :  { %v4071_v61 = vpop.eup %4070  ;;  %v2553_v22 = vmul.f32 %v2361_v33, %v1785_v54  ;;  %v6191_v41 = vadd.f32 %v5960_v3, %v5639_v11  ;;  %v6193_v24 = vpop.f32.mrb[59].mxu0  ;;  %v6199_v14 = vadd.f32 %v5964_v1, %v5643_v28  ;;  %v1792_v42 = vmul.f32 0.5, %v6121_v45 }
 0x28a   :  { %v6195_v43 = vpop.f32.mrb[56].mxu1  ;;  %v4073_v38 = vpop.eup %4072  ;;  %v3738_v32 = vpack.c.bf16 %v2736_v40, %v2735_v55  ;;  %v2362_v49 = vadd.f32 1.0, %v4071_v61  ;;  %4084 = verf.f32 %v1989_v13  ;;  %v1783_v40 = vmul.f32 0.5, %v6137_v16 }
 0x28b   :  { %v6201_v7 = vpop.f32.mrb[57].mxu1  ;;  %v4075_v54 = vpop.eup %4074  ;;  %v2367_v12 = vadd.f32 1.0, %v4073_v38  ;;  %4086 = verf.f32 %v1990_v4  ;;  %v1995_v3 = vmul.f32 0.70710677, %v6191_v41  ;;  %v1996_v13 = vmul.f32 0.70710677, %v6199_v14 }
 0x28c   :  { %v6205_v60 = vpop.f32.mrb[58].mxu1  ;;  %3410 = vst [vmem:[#allocation2 + $0x2e8] sm:$0xff] %v3738_v32  ;;  %v2554_v33 = vmul.f32 %v2362_v49, %v1786_v18  ;;  %v2368_v55 = vadd.f32 1.0, %v4075_v54  ;;  %v6213_v38 = vadd.f32 %v5966_v63, %v5726_v9  ;;  %v6217_v45 = vadd.f32 %v5969_v50, %v5731_v6 }
 0x28d   :  { %v6209_v1 = vpop.f32.mrb[59].mxu1  ;;  %v2559_v61 = vmul.f32 %v2367_v12, %v1791_v36  ;;  %4088 = verf.f32 %v1995_v3  ;;  %v6219_v4 = vpop.f32.mrb[60].mxu0  ;;  %v6223_v16 = vadd.f32 %v5983_v26, %v5726_v9  ;;  %v1784_v63 = vmul.f32 0.5, %v6143_v35 }
 0x28e   :  { %7067 = vst [vmem:[#allocation5_spill] sm:$0xff] %v6209_v1  ;;  %v4077_v18 = vpop.eup %4076  ;;  %v3647_v32 = vpack.c.bf16 %v2554_v33, %v2553_v22  ;;  %v2560_v49 = vmul.f32 %v2368_v55, %v1792_v42  ;;  %4090 = verf.f32 %v1996_v13  ;;  %v6225_v36 = vpop.f32.mrb[61].mxu0  ;;  %v1789_v3 = vmul.f32 0.5, %v6157_v31 }
 0x28f   :  { %7068 = vst [vmem:[#allocation24_spill] sm:$0xff] %v6225_v36  ;;  %v4079_v54 = vpop.eup %4078  ;;  %v2359_v12 = vadd.f32 1.0, %v4077_v18  ;;  %v1987_v50 = vmul.f32 0.70710677, %v6213_v38  ;;  %v6230_v1 = vpop.f32.mrb[62].mxu0  ;;  %v1790_v33 = vmul.f32 0.5, %v6161_v20  ;;  %v6239_v35 = vadd.f32 %v5989_v34, %v5731_v6 }
 0x290   :  { %7069 = vst [vmem:[#allocation26_spill] sm:$0xff] %v6230_v1  ;;  %3319 = vst [vmem:[#allocation2 + $0x10] sm:$0xff] %v3647_v32  ;;  %v3650_v22 = vpack.c.bf16 %v2560_v49, %v2559_v61  ;;  %v2360_v42 = vadd.f32 1.0, %v4079_v54  ;;  %v1988_v26 = vmul.f32 0.70710677, %v6217_v45  ;;  %v6234_v55 = vpop.f32.mrb[63].mxu0  ;;  %v6245_v20 = vadd.f32 %v5997_v0, %v5639_v11 }
 0x291   :  { %7070 = vst [vmem:[#allocation8_spill] sm:$0xff] %v6234_v55  ;;  %v2551_v13 = vmul.f32 %v2359_v12, %v1783_v40  ;;  %4092 = verf.f32 %v1987_v50  ;;  %v1993_v18 = vmul.f32 0.70710677, %v6223_v16  ;;  %v6241_v31 = vpop.f32.mrb[60].mxu1  ;;  %v4081_v1 = vpop.eup %4080  ;;  %v6249_v40 = vadd.f32 %v6001_v57, %v5643_v28 }
 0x292   :  { %7071 = vst [vmem:[#allocation6_spill] sm:$0xff] %v6241_v31  ;;  %3322 = vst [vmem:[#allocation2 + $0x28] sm:$0xff] %v3650_v22  ;;  %v2552_v61 = vmul.f32 %v2360_v42, %v1784_v63  ;;  %4094 = verf.f32 %v1988_v26  ;;  %v6251_v32 = vpop.f32.mrb[61].mxu1  ;;  %v4083_v49 = vpop.eup %4082  ;;  %v2365_v54 = vadd.f32 1.0, %v4081_v1  ;;  %v1797_v34 = vmul.f32 0.5, %v6168_v39 }
 0x293   :  { %7072 = vst [vmem:[#allocation7_spill] sm:$0xff] %v6251_v32  ;;  %4096 = verf.f32 %v1993_v18  ;;  %v1994_v12 = vmul.f32 0.70710677, %v6239_v35  ;;  %v6255_v50 = vpop.f32.mrb[62].mxu1  ;;  %v2366_v42 = vadd.f32 1.0, %v4083_v49  ;;  %v1798_v0 = vmul.f32 0.5, %v6174_v37 }
 0x294   :  { %7073 = vst [vmem:[#allocation9_spill] sm:$0xff] %v6255_v50  ;;  %v4085_v63 = vpop.eup %4084  ;;  %v3646_v22 = vpack.c.bf16 %v2552_v61, %v2551_v13  ;;  %v2001_v26 = vmul.f32 0.70710677, %v6245_v20  ;;  %v6259_v57 = vpop.f32.mrb[63].mxu1  ;;  %v2557_v32 = vmul.f32 %v2365_v54, %v1789_v3  ;;  %v1803_v1 = vmul.f32 0.5, %v6191_v41  ;;  %v7077_v3 = vld [vmem:[#allocation18_spill] sm:$0xff] }
 0x295   :  { %7074 = vst [vmem:[#allocation10_spill] sm:$0xff] %v6259_v57  ;;  %v4087_v31 = vpop.eup %4086  ;;  %v2373_v55 = vadd.f32 1.0, %v4085_v63  ;;  %4098 = verf.f32 %v1994_v12  ;;  %v6262_v39 = vpop.f32.mrb[64].mxu0  ;;  %v2558_v18 = vmul.f32 %v2366_v42, %v1790_v33  ;;  %v2002_v13 = vmul.f32 0.70710677, %v6249_v40  ;;  %v7076_v57 = vld [vmem:[#allocation14_spill] sm:$0xff] }
 0x296   :  { %3318 = vst [vmem:[#allocation2 + $0x8] sm:$0xff] %v3646_v22  ;;  %v2374_v50 = vadd.f32 1.0, %v4087_v31  ;;  %4100 = verf.f32 %v2001_v26  ;;  %v6265_v61 = vpop.f32.mrb[65].mxu0  ;;  %v6269_v36 = vadd.f32 %v7076_v57, %v5639_v11  ;;  %v6273_v41 = vadd.f32 %v7077_v3, %v5643_v28 }
 0x297   :  { %7075 = vst [vmem:[#allocation11_spill] sm:$0xff] %v6265_v61  ;;  %v4089_v37 = vpop.eup %4088  ;;  %v2565_v49 = vmul.f32 %v2373_v55, %v1797_v34  ;;  %v6277_v54 = vadd.f32 %v6015_v53, %v5726_v9  ;;  %v6279_v33 = vpop.f32.mrb[66].mxu0  ;;  %v3649_v12 = vpack.c.bf16 %v2558_v18, %v2557_v32  ;;  %4102 = verf.f32 %v2002_v13 }
 0x298   :  { %7078 = vst [vmem:[#allocation13_spill] sm:$0xff] %v6279_v33  ;;  %v4091_v31 = vpop.eup %4090  ;;  %v2566_v63 = vmul.f32 %v2374_v50, %v1798_v0  ;;  %v2379_v22 = vadd.f32 1.0, %v4089_v37  ;;  %v6281_v55 = vpop.f32.mrb[67].mxu0  ;;  %v1804_v34 = vmul.f32 0.5, %v6199_v14  ;;  %v1795_v26 = vmul.f32 0.5, %v6213_v38 }
 0x299   :  { %v2380_v42 = vadd.f32 1.0, %v4091_v31  ;;  %v2007_v57 = vmul.f32 0.70710677, %v6269_v36  ;;  %v6286_v3 = vpop.f32.mrb[64].mxu1  ;;  %3321 = vst [vmem:[#allocation2 + $0x20] sm:$0xff] %v3649_v12  ;;  %v1796_v33 = vmul.f32 0.5, %v6217_v45  ;;  %v6295_v38 = vadd.f32 %v6018_v25, %v5731_v6 }
 0x29a   :  { %v3653_v53 = vpack.c.bf16 %v2566_v63, %v2565_v49  ;;  %v2571_v61 = vmul.f32 %v2379_v22, %v1803_v1  ;;  %v2008_v32 = vmul.f32 0.70710677, %v6273_v41  ;;  %v6290_v50 = vpop.f32.mrb[65].mxu1  ;;  %v1999_v14 = vmul.f32 0.70710677, %v6277_v54 }
 0x29b   :  { %v4093_v0 = vpop.eup %4092  ;;  %v2572_v18 = vmul.f32 %v2380_v42, %v1804_v34  ;;  %4104 = verf.f32 %v2007_v57  ;;  %v6297_v13 = vpop.f32.mrb[66].mxu1  ;;  %v6301_v45 = vadd.f32 %v6022_v10, %v5726_v9  ;;  %v6305_v49 = vadd.f32 %v6029_v19, %v5731_v6 }
 0x29c   :  { %v4095_v37 = vpop.eup %4094  ;;  %3325 = vst [vmem:[#allocation2 + $0x40] sm:$0xff] %v3653_v53  ;;  %v2371_v1 = vadd.f32 1.0, %v4093_v0  ;;  %4106 = verf.f32 %v2008_v32  ;;  %v6307_v31 = vpop.f32.mrb[67].mxu1  ;;  %v1801_v22 = vmul.f32 0.5, %v6223_v16  ;;  %v1802_v53 = vmul.f32 0.5, %v6239_v35 }
 0x29d   :  { %7079 = vst [vmem:[#allocation12_spill] sm:$0xff] %v6307_v31  ;;  %v4097_v12 = vpop.eup %4096  ;;  %v3656_v63 = vpack.c.bf16 %v2572_v18, %v2571_v61  ;;  %v2372_v25 = vadd.f32 1.0, %v4095_v37  ;;  %4108 = verf.f32 %v1999_v14  ;;  %v6310_v34 = vpop.f32.mrb[68].mxu0  ;;  %v2000_v10 = vmul.f32 0.70710677, %v6295_v38 }
 0x29e   :  { %v2563_v42 = vmul.f32 %v2371_v1, %v1795_v26  ;;  %v2377_v57 = vadd.f32 1.0, %v4097_v12  ;;  %v6314_v32 = vpop.f32.mrb[69].mxu0  ;;  %v1809_v31 = vmul.f32 0.5, %v6245_v20  ;;  %v2005_v61 = vmul.f32 0.70710677, %v6301_v45 }
 0x29f   :  { %v4099_v19 = vpop.eup %4098  ;;  %3328 = vst [vmem:[#allocation2 + $0x58] sm:$0xff] %v3656_v63  ;;  %v2564_v0 = vmul.f32 %v2372_v25, %v1796_v33  ;;  %v2006_v16 = vmul.f32 0.70710677, %v6305_v49  ;;  %v6319_v18 = vpop.f32.mrb[70].mxu0  ;;  %4110 = verf.f32 %v2000_v10  ;;  %v6323_v35 = vadd.f32 %v6035_v46, %v5639_v11 }
 0x2a0   :  { %7080 = vst [vmem:[#allocation15_spill] sm:$0xff] %v6319_v18  ;;  %v4101_v14 = vpop.eup %4100  ;;  %v2569_v26 = vmul.f32 %v2377_v57, %v1801_v22  ;;  %v2378_v37 = vadd.f32 1.0, %v4099_v19  ;;  %v6325_v1 = vpop.f32.mrb[71].mxu0  ;;  %4112 = verf.f32 %v2005_v61  ;;  %v6329_v20 = vadd.f32 %v6039_v17, %v5643_v28 }
 0x2a1   :  { %v3652_v12 = vpack.c.bf16 %v2564_v0, %v2563_v42  ;;  %v2385_v33 = vadd.f32 1.0, %v4101_v14  ;;  %v6331_v63 = vpop.f32.mrb[68].mxu1  ;;  %v4103_v25 = vpop.eup %4102  ;;  %v1810_v22 = vmul.f32 0.5, %v6249_v40  ;;  %4114 = verf.f32 %v2006_v16 }
 0x2a2   :  { %v2570_v18 = vmul.f32 %v2378_v37, %v1802_v53  ;;  %v2013_v57 = vmul.f32 0.70710677, %v6323_v35  ;;  %v6335_v46 = vpop.f32.mrb[69].mxu1  ;;  %v2386_v42 = vadd.f32 1.0, %v4103_v25  ;;  %v1815_v19 = vmul.f32 0.5, %v6269_v36  ;;  %v7083_v36 = vld [vmem:[#allocation17_spill] sm:$0xff] }
 0x2a3   :  { %3324 = vst [vmem:[#allocation2 + $0x38] sm:$0xff] %v3652_v12  ;;  %v2577_v10 = vmul.f32 %v2385_v33, %v1809_v31  ;;  %v2014_v0 = vmul.f32 0.70710677, %v6329_v20  ;;  %v6339_v17 = vpop.f32.mrb[70].mxu1  ;;  %v6343_v53 = vadd.f32 %v6043_v23, %v5639_v11  ;;  %v6347_v40 = vadd.f32 %v6053_v30, %v5643_v28 }
 0x2a4   :  { %7081 = vst [vmem:[#allocation16_spill] sm:$0xff] %v6339_v17  ;;  %v3655_v61 = vpack.c.bf16 %v2570_v18, %v2569_v26  ;;  %4116 = verf.f32 %v2013_v57  ;;  %v6349_v16 = vpop.f32.mrb[71].mxu1  ;;  %v2578_v14 = vmul.f32 %v2386_v42, %v1810_v22  ;;  %v6353_v37 = vadd.f32 %v7083_v36, %v5726_v9  ;;  %v7084_v18 = vld [vmem:[#allocation20_spill] sm:$0xff] }
 0x2a5   :  { %7082 = vst [vmem:[#allocation14_spill] sm:$0xff] %v6349_v16  ;;  %v4105_v31 = vpop.eup %4104  ;;  %4118 = verf.f32 %v2014_v0  ;;  %v6357_v26 = vadd.f32 %v7084_v18, %v5731_v6  ;;  %v6359_v12 = vpop.f32.mrb[72].mxu0  ;;  %v1816_v30 = vmul.f32 0.5, %v6273_v41  ;;  %v1807_v25 = vmul.f32 0.5, %v6277_v54 }
 0x2a6   :  { %7085 = vst [vmem:[#allocation18_spill] sm:$0xff] %v6359_v12  ;;  %v4107_v23 = vpop.eup %4106  ;;  %3327 = vst [vmem:[#allocation2 + $0x50] sm:$0xff] %v3655_v61  ;;  %v2391_v33 = vadd.f32 1.0, %v4105_v31  ;;  %v2019_v22 = vmul.f32 0.70710677, %v6343_v53  ;;  %v6364_v57 = vpop.f32.mrb[73].mxu0  ;;  %v3659_v0 = vpack.c.bf16 %v2578_v14, %v2577_v10 }
 0x2a7   :  { %7086 = vst [vmem:[#allocation17_spill] sm:$0xff] %v6364_v57  ;;  %v4109_v42 = vpop.eup %4108  ;;  %v2392_v36 = vadd.f32 1.0, %v4107_v23  ;;  %v1808_v16 = vmul.f32 0.5, %v6295_v38  ;;  %v2020_v18 = vmul.f32 0.70710677, %v6347_v40  ;;  %v6368_v17 = vpop.f32.mrb[74].mxu0 }
 0x2a8   :  { %v2583_v12 = vmul.f32 %v2391_v33, %v1815_v19  ;;  %v2383_v61 = vadd.f32 1.0, %v4109_v42  ;;  %4120 = verf.f32 %v2019_v22  ;;  %v2011_v41 = vmul.f32 0.70710677, %v6353_v37  ;;  %v6371_v31 = vpop.f32.mrb[75].mxu0  ;;  %3331 = vst [vmem:[#allocation2 + $0x70] sm:$0xff] %v3659_v0 }
 0x2a9   :  { %v2584_v54 = vmul.f32 %v2392_v36, %v1816_v30  ;;  %v1813_v57 = vmul.f32 0.5, %v6301_v45  ;;  %4122 = verf.f32 %v2020_v18  ;;  %v2012_v10 = vmul.f32 0.70710677, %v6357_v26  ;;  %v6375_v14 = vpop.f32.mrb[72].mxu1  ;;  %v4111_v38 = vpop.eup %4110 }
 0x2aa   :  { %v2575_v23 = vmul.f32 %v2383_v61, %v1807_v25  ;;  %4124 = verf.f32 %v2011_v41  ;;  %v6379_v19 = vadd.f32 %v6072_v62, %v5726_v9  ;;  %v6383_v33 = vadd.f32 %v6075_v5, %v5731_v6  ;;  %v6385_v22 = vpop.f32.mrb[73].mxu1  ;;  %v4113_v30 = vpop.eup %4112 }
 0x2ab   :  { %7087 = vst [vmem:[#allocation20_spill] sm:$0xff] %v6385_v22  ;;  %v3662_v45 = vpack.c.bf16 %v2584_v54, %v2583_v12  ;;  %v2384_v42 = vadd.f32 1.0, %v4111_v38  ;;  %4126 = verf.f32 %v2012_v10  ;;  %v6389_v0 = vadd.f32 %v6078_v51, %v5639_v11  ;;  %v6391_v25 = vpop.f32.mrb[74].mxu1  ;;  %v4115_v36 = vpop.eup %4114 }
 0x2ac   :  { %7088 = vst [vmem:[#allocation27_spill] sm:$0xff] %v6391_v25  ;;  %v2389_v18 = vadd.f32 1.0, %v4113_v30  ;;  %v1814_v62 = vmul.f32 0.5, %v6305_v49  ;;  %v1821_v61 = vmul.f32 0.5, %v6323_v35  ;;  %v2017_v5 = vmul.f32 0.70710677, %v6379_v19 }
 0x2ad   :  { %v6396_v41 = vpop.f32.mrb[75].mxu1  ;;  %3334 = vst [vmem:[#allocation2 + $0x88] sm:$0xff] %v3662_v45  ;;  %v2576_v12 = vmul.f32 %v2384_v42, %v1808_v16  ;;  %v2390_v54 = vadd.f32 1.0, %v4115_v36  ;;  %v1822_v10 = vmul.f32 0.5, %v6329_v20  ;;  %v2018_v51 = vmul.f32 0.70710677, %v6383_v33 }
 0x2ae   :  { %7089 = vst [vmem:[#allocation28_spill] sm:$0xff] %v6396_v41  ;;  %v6400_v38 = vpop.f32.mrb[76].mxu0  ;;  %v4117_v25 = vpop.eup %4116  ;;  %v2581_v22 = vmul.f32 %v2389_v18, %v1813_v57  ;;  %4128 = verf.f32 %v2017_v5  ;;  %v2025_v49 = vmul.f32 0.70710677, %v6389_v0  ;;  %v6405_v35 = vadd.f32 %v6085_v56, %v5643_v28 }
 0x2af   :  { %7090 = vst [vmem:[#allocation29_spill] sm:$0xff] %v6400_v38  ;;  %v6407_v30 = vpop.f32.mrb[77].mxu0  ;;  %v4119_v45 = vpop.eup %4118  ;;  %v3658_v16 = vpack.c.bf16 %v2576_v12, %v2575_v23  ;;  %v2582_v42 = vmul.f32 %v2390_v54, %v1814_v62  ;;  %v2397_v36 = vadd.f32 1.0, %v4117_v25  ;;  %4130 = verf.f32 %v2018_v51 }
 0x2b0   :  { %7091 = vst [vmem:[#allocation30_spill] sm:$0xff] %v6407_v30  ;;  %v6409_v20 = vpop.f32.mrb[78].mxu0  ;;  %v2398_v41 = vadd.f32 1.0, %v4119_v45  ;;  %v1827_v38 = vmul.f32 0.5, %v6343_v53  ;;  %4132 = verf.f32 %v2025_v49  ;;  %v2026_v57 = vmul.f32 0.70710677, %v6405_v35 }
 0x2b1   :  { %v6413_v18 = vpop.f32.mrb[79].mxu0  ;;  %3330 = vst [vmem:[#allocation2 + $0x68] sm:$0xff] %v3658_v16  ;;  %v3661_v56 = vpack.c.bf16 %v2582_v42, %v2581_v22  ;;  %v2589_v5 = vmul.f32 %v2397_v36, %v1821_v61  ;;  %v6417_v30 = vadd.f32 %v6095_v52, %v5639_v11  ;;  %v6421_v23 = vadd.f32 %v6099_v48, %v5643_v28  ;;  %v6423_v25 = vpop.f32.mrb[76].mxu1 }
 0x2b2   :  { %v4121_v62 = vpop.eup %4120  ;;  %v2590_v53 = vmul.f32 %v2398_v41, %v1822_v10  ;;  %v1828_v12 = vmul.f32 0.5, %v6347_v40  ;;  %4134 = verf.f32 %v2026_v57  ;;  %v6428_v54 = vadd.f32 %v6103_v27, %v5726_v9  ;;  %v6430_v22 = vpop.f32.mrb[77].mxu1 }
 0x2b3   :  { %v4123_v61 = vpop.eup %4122  ;;  %3333 = vst [vmem:[#allocation2 + $0x80] sm:$0xff] %v3661_v56  ;;  %v2403_v52 = vadd.f32 1.0, %v4121_v62  ;;  %v1819_v51 = vmul.f32 0.5, %v6353_v37  ;;  %v2031_v48 = vmul.f32 0.70710677, %v6417_v30  ;;  %v6436_v49 = vadd.f32 %v6107_v59, %v5731_v6  ;;  %v6438_v41 = vpop.f32.mrb[78].mxu1 }
 0x2b4   :  { %7092 = vst [vmem:[#allocation31_spill] sm:$0xff] %v6438_v41  ;;  %v4125_v40 = vpop.eup %4124  ;;  %v3665_v10 = vpack.c.bf16 %v2590_v53, %v2589_v5  ;;  %v2404_v45 = vadd.f32 1.0, %v4123_v61  ;;  %v1820_v27 = vmul.f32 0.5, %v6357_v26  ;;  %v2032_v16 = vmul.f32 0.70710677, %v6421_v23  ;;  %v6442_v42 = vpop.f32.mrb[79].mxu1 }
 0x2b5   :  { %v4127_v36 = vpop.eup %4126  ;;  %v2595_v57 = vmul.f32 %v2403_v52, %v1827_v38  ;;  %v2395_v37 = vadd.f32 1.0, %v4125_v40  ;;  %4136 = verf.f32 %v2031_v48  ;;  %v2023_v56 = vmul.f32 0.70710677, %v6428_v54  ;;  %v6445_v62 = vpop.f32.mrb[80].mxu0 }
 0x2b6   :  { %3337 = vst [vmem:[#allocation2 + $0xa0] sm:$0xff] %v3665_v10  ;;  %v2596_v59 = vmul.f32 %v2404_v45, %v1828_v12  ;;  %v2396_v41 = vadd.f32 1.0, %v4127_v36  ;;  %v1825_v5 = vmul.f32 0.5, %v6379_v19  ;;  %4138 = verf.f32 %v2032_v16  ;;  %v6448_v53 = vpop.f32.mrb[81].mxu0 }
 0x2b7   :  { %v2587_v26 = vmul.f32 %v2395_v37, %v1819_v51  ;;  %4140 = verf.f32 %v2023_v56  ;;  %v2024_v61 = vmul.f32 0.70710677, %v6436_v49  ;;  %v6453_v38 = vadd.f32 %v6113_v21, %v5726_v9  ;;  %v6455_v52 = vpop.f32.mrb[82].mxu0 }
 0x2b8   :  { %v4129_v48 = vpop.eup %4128  ;;  %v3668_v40 = vpack.c.bf16 %v2596_v59, %v2595_v57  ;;  %v2588_v10 = vmul.f32 %v2396_v41, %v1820_v27  ;;  %v6459_v12 = vadd.f32 %v6123_v47, %v5731_v6  ;;  %v6463_v19 = vadd.f32 %v6127_v8, %v5639_v11  ;;  %v6465_v51 = vpop.f32.mrb[83].mxu0 }
 0x2b9   :  { %7093 = vst [vmem:[#allocation32_spill] sm:$0xff] %v6465_v51  ;;  %v4131_v45 = vpop.eup %4130  ;;  %v2401_v16 = vadd.f32 1.0, %v4129_v48  ;;  %v1826_v21 = vmul.f32 0.5, %v6383_v33  ;;  %4142 = verf.f32 %v2024_v61  ;;  %v2029_v36 = vmul.f32 0.70710677, %v6453_v38  ;;  %v6469_v37 = vpop.f32.mrb[80].mxu1 }
 0x2ba   :  { %7094 = vst [vmem:[#allocation33_spill] sm:$0xff] %v6469_v37  ;;  %v4133_v41 = vpop.eup %4132  ;;  %3340 = vst [vmem:[#allocation2 + $0xb8] sm:$0xff] %v3668_v40  ;;  %v3664_v27 = vpack.c.bf16 %v2588_v10, %v2587_v26  ;;  %v2402_v47 = vadd.f32 1.0, %v4131_v45  ;;  %v1833_v57 = vmul.f32 0.5, %v6389_v0  ;;  %v2030_v8 = vmul.f32 0.70710677, %v6459_v12 }
 0x2bb   :  { %v6473_v56 = vpop.f32.mrb[81].mxu1  ;;  %v2593_v59 = vmul.f32 %v2401_v16, %v1825_v5  ;;  %v2409_v51 = vadd.f32 1.0, %v4133_v41  ;;  %v1834_v48 = vmul.f32 0.5, %v6405_v35  ;;  %4144 = verf.f32 %v2029_v36  ;;  %v7096_v40 = vld [vmem:[#allocation19_spill] sm:$0xff]  ;;  %v7098_v16 = vld [vmem:[#allocation21_spill] sm:$0xff]  ;;  %v7099_v36 = vld [vmem:[#allocation22_spill] sm:$0xff] }
 0x2bc   :  { %v6476_v33 = vpop.f32.mrb[82].mxu1  ;;  %v4135_v61 = vpop.eup %4134  ;;  %3336 = vst [vmem:[#allocation2 + $0x98] sm:$0xff] %v3664_v27  ;;  %v2594_v37 = vmul.f32 %v2402_v47, %v1826_v21  ;;  %4146 = verf.f32 %v2030_v8  ;;  %v2037_v26 = vmul.f32 0.70710677, %v6463_v19  ;;  %v6481_v0 = vadd.f32 %v7096_v40, %v5643_v28 }
 0x2bd   :  { %7095 = vst [vmem:[#allocation34_spill] sm:$0xff] %v6476_v33  ;;  %v6483_v10 = vpop.f32.mrb[83].mxu1  ;;  %v2601_v45 = vmul.f32 %v2409_v51, %v1833_v57  ;;  %v2410_v5 = vadd.f32 1.0, %v4135_v61  ;;  %v6487_v35 = vadd.f32 %v7098_v16, %v5639_v11  ;;  %v6491_v41 = vadd.f32 %v7099_v36, %v5643_v28  ;;  %v6493_v21 = vpop.f32.mrb[84].mxu0 }
 0x2be   :  { %7097 = vst [vmem:[#allocation19_spill] sm:$0xff] %v6483_v10  ;;  %v3667_v27 = vpack.c.bf16 %v2594_v37, %v2593_v59  ;;  %v1839_v47 = vmul.f32 0.5, %v6417_v30  ;;  %4148 = verf.f32 %v2037_v26  ;;  %v2038_v8 = vmul.f32 0.70710677, %v6481_v0  ;;  %v6497_v40 = vpop.f32.mrb[85].mxu0 }
 0x2bf   :  { %7100 = vst [vmem:[#allocation21_spill] sm:$0xff] %v6497_v40  ;;  %v4137_v51 = vpop.eup %4136  ;;  %v2602_v57 = vmul.f32 %v2410_v5, %v1834_v48  ;;  %v1840_v61 = vmul.f32 0.5, %v6421_v23  ;;  %v1831_v16 = vmul.f32 0.5, %v6428_v54  ;;  %v2043_v10 = vmul.f32 0.70710677, %v6487_v35  ;;  %v6502_v36 = vpop.f32.mrb[86].mxu0 }
 0x2c0   :  { %7101 = vst [vmem:[#allocation22_spill] sm:$0xff] %v6502_v36  ;;  %v4139_v33 = vpop.eup %4138  ;;  %3339 = vst [vmem:[#allocation2 + $0xb0] sm:$0xff] %v3667_v27  ;;  %v2415_v37 = vadd.f32 1.0, %v4137_v51  ;;  %4150 = verf.f32 %v2038_v8  ;;  %v2044_v30 = vmul.f32 0.70710677, %v6491_v41  ;;  %v6507_v59 = vadd.f32 %v6148_v29, %v5726_v9  ;;  %v6509_v26 = vpop.f32.mrb[87].mxu0 }
 0x2c1   :  { %7102 = vst [vmem:[#allocation35_spill] sm:$0xff] %v6509_v26  ;;  %v4141_v48 = vpop.eup %4140  ;;  %v3671_v23 = vpack.c.bf16 %v2602_v57, %v2601_v45  ;;  %v2416_v5 = vadd.f32 1.0, %v4139_v33  ;;  %4152 = verf.f32 %v2043_v10  ;;  %v6513_v54 = vadd.f32 %v6153_v15, %v5731_v6  ;;  %v6515_v36 = vpop.f32.mrb[84].mxu1 }
 0x2c2   :  { %7103 = vst [vmem:[#allocation36_spill] sm:$0xff] %v6515_v36  ;;  %v2607_v27 = vmul.f32 %v2415_v37, %v1839_v47  ;;  %v2407_v8 = vadd.f32 1.0, %v4141_v48  ;;  %v1832_v51 = vmul.f32 0.5, %v6436_v49  ;;  %4154 = verf.f32 %v2044_v30  ;;  %v6518_v40 = vpop.f32.mrb[85].mxu1  ;;  %v7105_v49 = vld [vmem:[#allocation23_spill] sm:$0xff] }
 0x2c3   :  { %v4143_v29 = vpop.eup %4142  ;;  %3343 = vst [vmem:[#allocation2 + $0xd0] sm:$0xff] %v3671_v23  ;;  %v2608_v26 = vmul.f32 %v2416_v5, %v1840_v61  ;;  %v1837_v45 = vmul.f32 0.5, %v6453_v38  ;;  %v2035_v33 = vmul.f32 0.70710677, %v6507_v59  ;;  %v2036_v10 = vmul.f32 0.70710677, %v6513_v54 }
 0x2c4   :  { %v6523_v15 = vpop.f32.mrb[86].mxu1  ;;  %v2599_v57 = vmul.f32 %v2407_v8, %v1831_v16  ;;  %v2408_v36 = vadd.f32 1.0, %v4143_v29  ;;  %v6527_v47 = vadd.f32 %v6163_v2, %v5726_v9  ;;  %v6531_v37 = vadd.f32 %v7105_v49, %v5731_v6  ;;  %v7107_v23 = vld [vmem:[#allocation25_spill] sm:$0xff] }
 0x2c5   :  { %7104 = vst [vmem:[#allocation37_spill] sm:$0xff] %v6523_v15  ;;  %v6533_v30 = vpop.f32.mrb[87].mxu1  ;;  %v4145_v61 = vpop.eup %4144  ;;  %v3674_v38 = vpack.c.bf16 %v2608_v26, %v2607_v27  ;;  %v1838_v48 = vmul.f32 0.5, %v6459_v12  ;;  %4156 = verf.f32 %v2035_v33  ;;  %v6538_v5 = vadd.f32 %v7107_v23, %v5639_v11 }
 0x2c6   :  { %7106 = vst [vmem:[#allocation23_spill] sm:$0xff] %v6533_v30  ;;  %v6540_v16 = vpop.f32.mrb[88].mxu0  ;;  %v4147_v8 = vpop.eup %4146  ;;  %v2600_v2 = vmul.f32 %v2408_v36, %v1832_v51  ;;  %v2413_v29 = vadd.f32 1.0, %v4145_v61  ;;  %4158 = verf.f32 %v2036_v10  ;;  %v6544_v49 = vadd.f32 %v6182_v44, %v5643_v28 }
 0x2c7   :  { %7108 = vst [vmem:[#allocation25_spill] sm:$0xff] %v6540_v16  ;;  %v6546_v30 = vpop.f32.mrb[89].mxu0  ;;  %3346 = vst [vmem:[#allocation2 + $0xe8] sm:$0xff] %v3674_v38  ;;  %v2414_v26 = vadd.f32 1.0, %v4147_v8  ;;  %v1845_v12 = vmul.f32 0.5, %v6463_v19  ;;  %v1846_v36 = vmul.f32 0.5, %v6481_v0  ;;  %v6563_v0 = vadd.f32 %v6186_v58, %v5639_v11 }
 0x2c8   :  { %7109 = vst [vmem:[#allocation38_spill] sm:$0xff] %v6546_v30  ;;  %v2041_v27 = vmul.f32 0.70710677, %v6527_v47  ;;  %v2042_v33 = vmul.f32 0.70710677, %v6531_v37  ;;  %v4149_v23 = vpop.eup %4148  ;;  %v3670_v16 = vpack.c.bf16 %v2600_v2, %v2599_v57  ;;  %v2605_v15 = vmul.f32 %v2413_v29, %v1837_v45  ;;  %v6553_v10 = vpop.f32.mrb[90].mxu0 }
 0x2c9   :  { %v2049_v51 = vmul.f32 0.70710677, %v6538_v5  ;;  %v2606_v44 = vmul.f32 %v2414_v26, %v1838_v48  ;;  %v2421_v61 = vadd.f32 1.0, %v4149_v23  ;;  %v1851_v38 = vmul.f32 0.5, %v6487_v35  ;;  %v6556_v8 = vpop.f32.mrb[91].mxu0  ;;  %v6558_v19 = vpop.f32.mrb[88].mxu1 }
 0x2ca   :  { %4160 = verf.f32 %v2041_v27  ;;  %7110 = vst [vmem:[#allocation39_spill] sm:$0xff] %v6556_v8  ;;  %7111 = vst [vmem:[#allocation40_spill] sm:$0xff] %v6558_v19  ;;  %v4151_v30 = vpop.eup %4150  ;;  %v2050_v45 = vmul.f32 0.70710677, %v6544_v49  ;;  %v6567_v57 = vadd.f32 %v6193_v24, %v5643_v28  ;;  %v6569_v48 = vpop.f32.mrb[89].mxu1  ;;  %v1852_v23 = vmul.f32 0.5, %v6491_v41 }
 0x2cb   :  { %3342 = vst [vmem:[#allocation2 + $0xc8] sm:$0xff] %v3670_v16  ;;  %4162 = verf.f32 %v2042_v33  ;;  %7112 = vst [vmem:[#allocation41_spill] sm:$0xff] %v6569_v48  ;;  %v4153_v35 = vpop.eup %4152  ;;  %v3673_v2 = vpack.c.bf16 %v2606_v44, %v2605_v15  ;;  %v2613_v29 = vmul.f32 %v2421_v61, %v1845_v12  ;;  %v2422_v26 = vadd.f32 1.0, %v4151_v30  ;;  %v6571_v27 = vpop.f32.mrb[90].mxu1 }
 0x2cc   :  { %4164 = verf.f32 %v2049_v51  ;;  %v4155_v16 = vpop.eup %4154  ;;  %v2427_v33 = vadd.f32 1.0, %v4153_v35  ;;  %v2055_v58 = vmul.f32 0.70710677, %v6563_v0  ;;  %v6575_v19 = vpop.f32.mrb[91].mxu1  ;;  %v1843_v48 = vmul.f32 0.5, %v6507_v59 }
 0x2cd   :  { %4166 = verf.f32 %v2050_v45  ;;  %3345 = vst [vmem:[#allocation2 + $0xe0] sm:$0xff] %v3673_v2  ;;  %v2614_v24 = vmul.f32 %v2422_v26, %v1846_v36  ;;  %v2428_v8 = vadd.f32 1.0, %v4155_v16  ;;  %v2056_v15 = vmul.f32 0.70710677, %v6567_v57  ;;  %v6579_v30 = vpop.f32.mrb[92].mxu0 }
 0x2ce   :  { %v2619_v12 = vmul.f32 %v2427_v33, %v1851_v38  ;;  %4168 = verf.f32 %v2055_v58  ;;  %v6583_v51 = vadd.f32 %v6195_v43, %v5726_v9  ;;  %v6587_v41 = vadd.f32 %v6201_v7, %v5731_v6  ;;  %v6589_v44 = vpop.f32.mrb[93].mxu0 }
 0x2cf   :  { %7113 = vst [vmem:[#allocation42_spill] sm:$0xff] %v6589_v44  ;;  %v4157_v36 = vpop.eup %4156  ;;  %v3677_v61 = vpack.c.bf16 %v2614_v24, %v2613_v29  ;;  %v2620_v45 = vmul.f32 %v2428_v8, %v1852_v23  ;;  %4170 = verf.f32 %v2056_v15  ;;  %v6593_v59 = vadd.f32 %v6205_v60, %v5726_v9  ;;  %v6595_v38 = vpop.f32.mrb[94].mxu0 }
 0x2d0   :  { %7114 = vst [vmem:[#allocation43_spill] sm:$0xff] %v6595_v38  ;;  %v4159_v35 = vpop.eup %4158  ;;  %v2419_v2 = vadd.f32 1.0, %v4157_v36  ;;  %v1844_v43 = vmul.f32 0.5, %v6513_v54  ;;  %v1849_v26 = vmul.f32 0.5, %v6527_v47  ;;  %v2047_v7 = vmul.f32 0.70710677, %v6583_v51 }
 0x2d1   :  { %v6600_v16 = vpop.f32.mrb[95].mxu0  ;;  %3349 = vst [vmem:[#allocation2 + $0x100] sm:$0xff] %v3677_v61  ;;  %v3680_v29 = vpack.c.bf16 %v2620_v45, %v2619_v12  ;;  %v2420_v8 = vadd.f32 1.0, %v4159_v35  ;;  %v1850_v33 = vmul.f32 0.5, %v6531_v37  ;;  %v2048_v60 = vmul.f32 0.70710677, %v6587_v41 }
 0x2d2   :  { %7115 = vst [vmem:[#allocation44_spill] sm:$0xff] %v6600_v16  ;;  %v6604_v23 = vpop.f32.mrb[92].mxu1  ;;  %v2611_v58 = vmul.f32 %v2419_v2, %v1843_v48  ;;  %4172 = verf.f32 %v2047_v7  ;;  %v2053_v24 = vmul.f32 0.70710677, %v6593_v59  ;;  %v7117_v54 = vld [vmem:[#allocation5_spill] sm:$0xff]  ;;  %v6615_v37 = vadd.f32 %v6219_v4, %v5639_v11  ;;  %v7119_v61 = vld [vmem:[#allocation24_spill] sm:$0xff] }
 0x2d3   :  { %7116 = vst [vmem:[#allocation45_spill] sm:$0xff] %v6604_v23  ;;  %v6609_v47 = vadd.f32 %v7117_v54, %v5731_v6  ;;  %v6611_v15 = vpop.f32.mrb[93].mxu1  ;;  %3352 = vst [vmem:[#allocation2 + $0x118] sm:$0xff] %v3680_v29  ;;  %v2612_v12 = vmul.f32 %v2420_v8, %v1844_v43  ;;  %4174 = verf.f32 %v2048_v60  ;;  %v6619_v48 = vadd.f32 %v7119_v61, %v5643_v28 }
 0x2d4   :  { %7118 = vst [vmem:[#allocation5_spill] sm:$0xff] %v6611_v15  ;;  %v4161_v36 = vpop.eup %4160  ;;  %v6621_v45 = vpop.f32.mrb[94].mxu1  ;;  %v1857_v7 = vmul.f32 0.5, %v6538_v5  ;;  %4176 = verf.f32 %v2053_v24  ;;  %v1858_v4 = vmul.f32 0.5, %v6544_v49  ;;  %v2061_v15 = vmul.f32 0.70710677, %v6615_v37 }
 0x2d5   :  { %7120 = vst [vmem:[#allocation24_spill] sm:$0xff] %v6621_v45  ;;  %v4163_v35 = vpop.eup %4162  ;;  %v2425_v2 = vadd.f32 1.0, %v4161_v36  ;;  %v2054_v54 = vmul.f32 0.70710677, %v6609_v47  ;;  %v6625_v29 = vpop.f32.mrb[95].mxu1  ;;  %v3676_v8 = vpack.c.bf16 %v2612_v12, %v2611_v58  ;;  %v1863_v45 = vmul.f32 0.5, %v6563_v0 }
 0x2d6   :  { %7121 = vst [vmem:[#allocation46_spill] sm:$0xff] %v6625_v29  ;;  %v4165_v43 = vpop.eup %4164  ;;  %v2426_v60 = vadd.f32 1.0, %v4163_v35  ;;  %v2062_v36 = vmul.f32 0.70710677, %v6619_v48  ;;  %v7122_v58 = vld [vmem:[#allocation26_spill] sm:$0xff]  ;;  %v7123_v49 = vld [vmem:[#allocation8_spill] sm:$0xff] }
 0x2d7   :  { %v4167_v61 = vpop.eup %4166  ;;  %v2617_v23 = vmul.f32 %v2425_v2, %v1849_v26  ;;  %v2433_v16 = vadd.f32 1.0, %v4165_v43  ;;  %4178 = verf.f32 %v2054_v54  ;;  %3348 = vst [vmem:[#allocation2 + $0xf8] sm:$0xff] %v3676_v8  ;;  %v1697_v12 = vadd.f32 %v7122_v58, %v5639_v11  ;;  %v7124_v26 = vld [vmem:[#allocation6_spill] sm:$0xff] }
 0x2d8   :  { %v2618_v5 = vmul.f32 %v2426_v60, %v1850_v33  ;;  %v2434_v24 = vadd.f32 1.0, %v4167_v61  ;;  %4180 = verf.f32 %v2061_v15  ;;  %v4169_v29 = vpop.eup %4168  ;;  %v6635_v35 = vadd.f32 %v7123_v49, %v5643_v28 }
 0x2d9   :  { %v2625_v38 = vmul.f32 %v2433_v16, %v1857_v7  ;;  %v6639_v2 = vadd.f32 %v7124_v26, %v5726_v9  ;;  %v4171_v0 = vpop.eup %4170  ;;  %v2439_v43 = vadd.f32 1.0, %v4169_v29  ;;  %4182 = verf.f32 %v2062_v36  ;;  %v7125_v29 = vld [vmem:[#allocation7_spill] sm:$0xff] }
 0x2da   :  { %v3679_v54 = vpack.c.bf16 %v2618_v5, %v2617_v23  ;;  %v2626_v33 = vmul.f32 %v2434_v24, %v1858_v4  ;;  %v1864_v15 = vmul.f32 0.5, %v6567_v57  ;;  %v2440_v8 = vadd.f32 1.0, %v4171_v0 }
 0x2db   :  { %v1855_v16 = vmul.f32 0.5, %v6583_v51  ;;  %v2067_v7 = vmul.f32 0.70710677, %v1697_v12  ;;  %v2631_v61 = vmul.f32 %v2439_v43, %v1863_v45  ;;  %v1856_v58 = vmul.f32 0.5, %v6587_v41  ;;  %v7126_v51 = vld [vmem:[#allocation9_spill] sm:$0xff]  ;;  %v7127_v45 = vld [vmem:[#allocation10_spill] sm:$0xff] }
 0x2dc   :  { %3351 = vst [vmem:[#allocation2 + $0x110] sm:$0xff] %v3679_v54  ;;  %v3683_v60 = vpack.c.bf16 %v2626_v33, %v2625_v38  ;;  %v2068_v49 = vmul.f32 0.70710677, %v6635_v35  ;;  %v4173_v26 = vpop.eup %4172  ;;  %v2632_v44 = vmul.f32 %v2440_v8, %v1864_v15  ;;  %v2059_v23 = vmul.f32 0.70710677, %v6639_v2 }
 0x2dd   :  { %4184 = verf.f32 %v2067_v7  ;;  %v1502_v4 = vadd.f32 %v7125_v29, %v5731_v6  ;;  %v4175_v57 = vpop.eup %4174  ;;  %v2431_v5 = vadd.f32 1.0, %v4173_v26  ;;  %v1504_v38 = vadd.f32 %v7126_v51, %v5726_v9 }
 0x2de   :  { %3355 = vst [vmem:[#allocation2 + $0x130] sm:$0xff] %v3683_v60  ;;  %4186 = verf.f32 %v2068_v49  ;;  %v6652_v41 = vadd.f32 %v7127_v45, %v5731_v6  ;;  %v4177_v24 = vpop.eup %4176  ;;  %v3686_v36 = vpack.c.bf16 %v2632_v44, %v2631_v61  ;;  %v2432_v0 = vadd.f32 1.0, %v4175_v57 }
 0x2df   :  { %v1861_v54 = vmul.f32 0.5, %v6593_v59  ;;  %4188 = verf.f32 %v2059_v23  ;;  %v2623_v33 = vmul.f32 %v2431_v5, %v1855_v16  ;;  %v2437_v43 = vadd.f32 1.0, %v4177_v24 }
 0x2e0   :  { %v1862_v15 = vmul.f32 0.5, %v6609_v47  ;;  %v2060_v8 = vmul.f32 0.70710677, %v1502_v4  ;;  %3358 = vst [vmem:[#allocation2 + $0x148] sm:$0xff] %v3686_v36  ;;  %v2624_v60 = vmul.f32 %v2432_v0, %v1856_v58  ;;  %v1869_v49 = vmul.f32 0.5, %v6615_v37  ;;  %v7128_v47 = vld [vmem:[#allocation11_spill] sm:$0xff] }
 0x2e1   :  { %v4179_v7 = vpop.eup %4178  ;;  %v2065_v26 = vmul.f32 0.70710677, %v1504_v38  ;;  %v2066_v29 = vmul.f32 0.70710677, %v6652_v41  ;;  %v2629_v45 = vmul.f32 %v2437_v43, %v1861_v54  ;;  %v1703_v59 = vadd.f32 %v6262_v39, %v5639_v11  ;;  %v7129_v39 = vld [vmem:[#allocation13_spill] sm:$0xff] }
 0x2e2   :  { %v4181_v51 = vpop.eup %4180  ;;  %v2438_v44 = vadd.f32 1.0, %v4179_v7  ;;  %4190 = verf.f32 %v2060_v8  ;;  %v3682_v16 = vpack.c.bf16 %v2624_v60, %v2623_v33  ;;  %v1705_v23 = vadd.f32 %v7128_v47, %v5643_v28 }
 0x2e3   :  { %v2445_v61 = vadd.f32 1.0, %v4181_v51  ;;  %4192 = verf.f32 %v2065_v26  ;;  %v4183_v57 = vpop.eup %4182  ;;  %v1870_v37 = vmul.f32 0.5, %v6619_v48  ;;  %v2073_v5 = vmul.f32 0.70710677, %v1703_v59 }
 0x2e4   :  { %v2630_v58 = vmul.f32 %v2438_v44, %v1862_v15  ;;  %4194 = verf.f32 %v2066_v29  ;;  %3354 = vst [vmem:[#allocation2 + $0x128] sm:$0xff] %v3682_v16  ;;  %v2446_v36 = vadd.f32 1.0, %v4183_v57  ;;  %v1875_v0 = vmul.f32 0.5, %v1697_v12 }
 0x2e5   :  { %v2637_v24 = vmul.f32 %v2445_v61, %v1869_v49  ;;  %v2074_v54 = vmul.f32 0.70710677, %v1705_v23  ;;  %4196 = verf.f32 %v2073_v5  ;;  %v1707_v33 = vadd.f32 %v7129_v39, %v5639_v11 }
 0x2e6   :  { %v3685_v43 = vpack.c.bf16 %v2630_v58, %v2629_v45  ;;  %v6667_v8 = vadd.f32 %v6281_v55, %v5643_v28  ;;  %v2638_v15 = vmul.f32 %v2446_v36, %v1870_v37  ;;  %v6671_v48 = vadd.f32 %v6286_v3, %v5726_v9 }
 0x2e7   :  { %v4185_v7 = vpop.eup %4184  ;;  %4198 = verf.f32 %v2074_v54  ;;  %v6675_v12 = vadd.f32 %v6290_v50, %v5731_v6  ;;  %v1876_v26 = vmul.f32 0.5, %v6635_v35  ;;  %v1867_v29 = vmul.f32 0.5, %v6639_v2 }
 0x2e8   :  { %v4187_v60 = vpop.eup %4186  ;;  %3357 = vst [vmem:[#allocation2 + $0x140] sm:$0xff] %v3685_v43  ;;  %v2451_v49 = vadd.f32 1.0, %v4185_v7  ;;  %v2079_v55 = vmul.f32 0.70710677, %v1707_v33  ;;  %v3689_v45 = vpack.c.bf16 %v2638_v15, %v2637_v24  ;;  %v1868_v16 = vmul.f32 0.5, %v1502_v4  ;;  %v7130_v4 = vld [vmem:[#allocation12_spill] sm:$0xff] }
 0x2e9   :  { %v4189_v51 = vpop.eup %4188  ;;  %v2452_v44 = vadd.f32 1.0, %v4187_v60  ;;  %v2080_v61 = vmul.f32 0.70710677, %v6667_v8  ;;  %v2071_v50 = vmul.f32 0.70710677, %v6671_v48  ;;  %v1873_v58 = vmul.f32 0.5, %v1504_v38 }
 0x2ea   :  { %v2643_v3 = vmul.f32 %v2451_v49, %v1875_v0  ;;  %v2443_v47 = vadd.f32 1.0, %v4189_v51  ;;  %4200 = verf.f32 %v2079_v55  ;;  %3361 = vst [vmem:[#allocation2 + $0x160] sm:$0xff] %v3689_v45  ;;  %v2072_v35 = vmul.f32 0.70710677, %v6675_v12 }
 0x2eb   :  { %v2644_v57 = vmul.f32 %v2452_v44, %v1876_v26  ;;  %4202 = verf.f32 %v2080_v61  ;;  %v1514_v5 = vadd.f32 %v6297_v13, %v5726_v9  ;;  %v6686_v24 = vadd.f32 %v7130_v4, %v5731_v6 }
 0x2ec   :  { %v4191_v37 = vpop.eup %4190  ;;  %v2635_v2 = vmul.f32 %v2443_v47, %v1867_v29  ;;  %4204 = verf.f32 %v2071_v50  ;;  %v6690_v38 = vadd.f32 %v6310_v34, %v5639_v11  ;;  %v1874_v7 = vmul.f32 0.5, %v6652_v41 }
 0x2ed   :  { %v4193_v36 = vpop.eup %4192  ;;  %v3692_v0 = vpack.c.bf16 %v2644_v57, %v2643_v3  ;;  %v2444_v54 = vadd.f32 1.0, %v4191_v37  ;;  %4206 = verf.f32 %v2072_v35  ;;  %v1881_v15 = vmul.f32 0.5, %v1703_v59  ;;  %v7131_v57 = vld [vmem:[#allocation15_spill] sm:$0xff] }
 0x2ee   :  { %v4195_v43 = vpop.eup %4194  ;;  %v2449_v39 = vadd.f32 1.0, %v4193_v36  ;;  %v2077_v60 = vmul.f32 0.70710677, %v1514_v5  ;;  %v1882_v26 = vmul.f32 0.5, %v1705_v23  ;;  %v2078_v29 = vmul.f32 0.70710677, %v6686_v24 }
 0x2ef   :  { %3364 = vst [vmem:[#allocation2 + $0x178] sm:$0xff] %v3692_v0  ;;  %v2636_v13 = vmul.f32 %v2444_v54, %v1868_v16  ;;  %v2450_v49 = vadd.f32 1.0, %v4195_v43  ;;  %v4197_v55 = vpop.eup %4196  ;;  %v2085_v45 = vmul.f32 0.70710677, %v6690_v38  ;;  %v1715_v34 = vadd.f32 %v6314_v32, %v5643_v28 }
 0x2f0   :  { %v2641_v51 = vmul.f32 %v2449_v39, %v1873_v58  ;;  %4208 = verf.f32 %v2077_v60  ;;  %v2457_v41 = vadd.f32 1.0, %v4197_v55  ;;  %v1887_v47 = vmul.f32 0.5, %v1707_v33 }
 0x2f1   :  { %v4199_v44 = vpop.eup %4198  ;;  %v3688_v61 = vpack.c.bf16 %v2636_v13, %v2635_v2  ;;  %v2642_v3 = vmul.f32 %v2450_v49, %v1874_v7  ;;  %4210 = verf.f32 %v2078_v29  ;;  %v2086_v16 = vmul.f32 0.70710677, %v1715_v34 }
 0x2f2   :  { %v2458_v59 = vadd.f32 1.0, %v4199_v44  ;;  %4212 = verf.f32 %v2085_v45  ;;  %v2649_v50 = vmul.f32 %v2457_v41, %v1881_v15  ;;  %v6699_v58 = vadd.f32 %v7131_v57, %v5639_v11 }
 0x2f3   :  { %3360 = vst [vmem:[#allocation2 + $0x158] sm:$0xff] %v3688_v61  ;;  %v3691_v23 = vpack.c.bf16 %v2642_v3, %v2641_v51  ;;  %v6703_v35 = vadd.f32 %v6325_v1, %v5643_v28  ;;  %v1888_v2 = vmul.f32 0.5, %v6667_v8  ;;  %4214 = verf.f32 %v2086_v16  ;;  %v7132_v51 = vld [vmem:[#allocation16_spill] sm:$0xff]  ;;  %v7133_v3 = vld [vmem:[#allocation14_spill] sm:$0xff] }
 0x2f4   :  { %v4201_v32 = vpop.eup %4200  ;;  %v2650_v37 = vmul.f32 %v2458_v59, %v1882_v26  ;;  %v1520_v33 = vadd.f32 %v6331_v63, %v5726_v9  ;;  %v1879_v0 = vmul.f32 0.5, %v6671_v48  ;;  %v2091_v54 = vmul.f32 0.70710677, %v6699_v58  ;;  %v7134_v59 = vld [vmem:[#allocation18_spill] sm:$0xff] }
 0x2f5   :  { %v4203_v4 = vpop.eup %4202  ;;  %3363 = vst [vmem:[#allocation2 + $0x170] sm:$0xff] %v3691_v23  ;;  %v2463_v36 = vadd.f32 1.0, %v4201_v32  ;;  %v6712_v43 = vadd.f32 %v6335_v46, %v5731_v6  ;;  %v1880_v8 = vmul.f32 0.5, %v6675_v12  ;;  %v2092_v15 = vmul.f32 0.70710677, %v6703_v35 }
 0x2f6   :  { %v4205_v1 = vpop.eup %4204  ;;  %v3695_v39 = vpack.c.bf16 %v2650_v37, %v2649_v50  ;;  %v2464_v7 = vadd.f32 1.0, %v4203_v4  ;;  %4216 = verf.f32 %v2091_v54  ;;  %v2083_v49 = vmul.f32 0.70710677, %v1520_v33 }
 0x2f7   :  { %v4207_v60 = vpop.eup %4206  ;;  %v2655_v63 = vmul.f32 %v2463_v36, %v1887_v47  ;;  %v2455_v13 = vadd.f32 1.0, %v4205_v1  ;;  %v1885_v29 = vmul.f32 0.5, %v1514_v5  ;;  %4218 = verf.f32 %v2092_v15 }
 0x2f8   :  { %3367 = vst [vmem:[#allocation2 + $0x190] sm:$0xff] %v3695_v39  ;;  %v2656_v48 = vmul.f32 %v2464_v7, %v1888_v2  ;;  %v2456_v26 = vadd.f32 1.0, %v4207_v60  ;;  %4220 = verf.f32 %v2083_v49  ;;  %v2084_v46 = vmul.f32 0.70710677, %v6712_v43  ;;  %v7135_v7 = vld [vmem:[#allocation17_spill] sm:$0xff] }
 0x2f9   :  { %v2647_v55 = vmul.f32 %v2455_v13, %v1879_v0  ;;  %v1524_v45 = vadd.f32 %v7132_v51, %v5726_v9  ;;  %v6721_v41 = vadd.f32 %v7133_v3, %v5731_v6  ;;  %v6725_v47 = vadd.f32 %v7134_v59, %v5639_v11  ;;  %v7136_v3 = vld [vmem:[#allocation20_spill] sm:$0xff] }
 0x2fa   :  { %v4209_v12 = vpop.eup %4208  ;;  %v3698_v44 = vpack.c.bf16 %v2656_v48, %v2655_v63  ;;  %v2648_v61 = vmul.f32 %v2456_v26, %v1880_v8  ;;  %v1886_v23 = vmul.f32 0.5, %v6686_v24  ;;  %4222 = verf.f32 %v2084_v46 }
 0x2fb   :  { %v4211_v5 = vpop.eup %4210  ;;  %v2461_v16 = vadd.f32 1.0, %v4209_v12  ;;  %v2089_v50 = vmul.f32 0.70710677, %v1524_v45  ;;  %v1893_v2 = vmul.f32 0.5, %v6690_v38  ;;  %v2090_v4 = vmul.f32 0.70710677, %v6721_v41 }
 0x2fc   :  { %v4213_v57 = vpop.eup %4212  ;;  %3370 = vst [vmem:[#allocation2 + $0x1a8] sm:$0xff] %v3698_v44  ;;  %v3694_v32 = vpack.c.bf16 %v2648_v61, %v2647_v55  ;;  %v2462_v37 = vadd.f32 1.0, %v4211_v5  ;;  %v1894_v54 = vmul.f32 0.5, %v1715_v34  ;;  %v2097_v24 = vmul.f32 0.70710677, %v6725_v47 }
 0x2fd   :  { %v2653_v36 = vmul.f32 %v2461_v16, %v1885_v29  ;;  %v2469_v0 = vadd.f32 1.0, %v4213_v57  ;;  %4224 = verf.f32 %v2089_v50  ;;  %v4215_v1 = vpop.eup %4214  ;;  %v1725_v8 = vadd.f32 %v7135_v7, %v5643_v28 }
 0x2fe   :  { %3366 = vst [vmem:[#allocation2 + $0x188] sm:$0xff] %v3694_v32  ;;  %v2654_v39 = vmul.f32 %v2462_v37, %v1886_v23  ;;  %4226 = verf.f32 %v2090_v4  ;;  %v2470_v60 = vadd.f32 1.0, %v4215_v1  ;;  %v1727_v38 = vadd.f32 %v6368_v17, %v5639_v11 }
 0x2ff   :  { %v2661_v15 = vmul.f32 %v2469_v0, %v1893_v2  ;;  %v6737_v63 = vadd.f32 %v6371_v31, %v5643_v28  ;;  %v1899_v13 = vmul.f32 0.5, %v6699_v58  ;;  %4228 = verf.f32 %v2097_v24  ;;  %v7137_v2 = vld [vmem:[#allocation27_spill] sm:$0xff] }
 0x300   :  { %v3697_v34 = vpack.c.bf16 %v2654_v39, %v2653_v36  ;;  %v2098_v49 = vmul.f32 0.70710677, %v1725_v8  ;;  %v4217_v48 = vpop.eup %4216  ;;  %v2662_v26 = vmul.f32 %v2470_v60, %v1894_v54  ;;  %v1900_v29 = vmul.f32 0.5, %v6703_v35  ;;  %v7138_v36 = vld [vmem:[#allocation28_spill] sm:$0xff]  ;;  %v7139_v39 = vld [vmem:[#allocation29_spill] sm:$0xff]  ;;  %v7140_v60 = vld [vmem:[#allocation30_spill] sm:$0xff] }
 0x301   :  { %v1891_v55 = vmul.f32 0.5, %v1520_v33  ;;  %v2103_v46 = vmul.f32 0.70710677, %v1727_v38  ;;  %v4219_v51 = vpop.eup %4218  ;;  %v2475_v12 = vadd.f32 1.0, %v4217_v48  ;;  %v2104_v17 = vmul.f32 0.70710677, %v6737_v63 }
 0x302   :  { %3369 = vst [vmem:[#allocation2 + $0x1a0] sm:$0xff] %v3697_v34  ;;  %4230 = verf.f32 %v2098_v49  ;;  %v1530_v31 = vadd.f32 %v6375_v14, %v5726_v9  ;;  %v4221_v44 = vpop.eup %4220  ;;  %v3701_v61 = vpack.c.bf16 %v2662_v26, %v2661_v15  ;;  %v2476_v58 = vadd.f32 1.0, %v4219_v51 }
 0x303   :  { %4232 = verf.f32 %v2103_v46  ;;  %v6746_v59 = vadd.f32 %v7136_v3, %v5731_v6  ;;  %v2667_v35 = vmul.f32 %v2475_v12, %v1899_v13  ;;  %v2467_v33 = vadd.f32 1.0, %v4221_v44 }
 0x304   :  { %v1892_v5 = vmul.f32 0.5, %v6712_v43  ;;  %4234 = verf.f32 %v2104_v17  ;;  %v4223_v16 = vpop.eup %4222  ;;  %3373 = vst [vmem:[#allocation2 + $0x1c0] sm:$0xff] %v3701_v61  ;;  %v2668_v23 = vmul.f32 %v2476_v58, %v1900_v29  ;;  %v1897_v50 = vmul.f32 0.5, %v1524_v45 }
 0x305   :  { %v2095_v57 = vmul.f32 0.70710677, %v1530_v31  ;;  %v2096_v14 = vmul.f32 0.70710677, %v6746_v59  ;;  %v2659_v32 = vmul.f32 %v2467_v33, %v1891_v55  ;;  %v2468_v37 = vadd.f32 1.0, %v4223_v16 }
 0x306   :  { %v1534_v4 = vadd.f32 %v7137_v2, %v5726_v9  ;;  %v1536_v0 = vadd.f32 %v7138_v36, %v5731_v6  ;;  %v3704_v1 = vpack.c.bf16 %v2668_v23, %v2667_v35  ;;  %v1898_v43 = vmul.f32 0.5, %v6721_v41 }
 0x307   :  { %v4225_v54 = vpop.eup %4224  ;;  %4236 = verf.f32 %v2095_v57  ;;  %v6757_v24 = vadd.f32 %v7139_v39, %v5639_v11  ;;  %v2660_v7 = vmul.f32 %v2468_v37, %v1892_v5  ;;  %v6761_v34 = vadd.f32 %v7140_v60, %v5643_v28 }
 0x308   :  { %v4227_v45 = vpop.eup %4226  ;;  %v2473_v15 = vadd.f32 1.0, %v4225_v54  ;;  %4238 = verf.f32 %v2096_v14  ;;  %3376 = vst [vmem:[#allocation2 + $0x1d8] sm:$0xff] %v3704_v1  ;;  %v1905_v49 = vmul.f32 0.5, %v6725_v47  ;;  %v2101_v48 = vmul.f32 0.70710677, %v1534_v4  ;;  %v7141_v1 = vld [vmem:[#allocation31_spill] sm:$0xff] }
 0x309   :  { %v2474_v13 = vadd.f32 1.0, %v4227_v45  ;;  %v2102_v26 = vmul.f32 0.70710677, %v1536_v0  ;;  %v4229_v41 = vpop.eup %4228  ;;  %v3700_v29 = vpack.c.bf16 %v2660_v7, %v2659_v32  ;;  %v1906_v46 = vmul.f32 0.5, %v1725_v8 }
 0x30a   :  { %v2665_v55 = vmul.f32 %v2473_v15, %v1897_v50  ;;  %v2109_v51 = vmul.f32 0.70710677, %v6757_v24  ;;  %v2481_v17 = vadd.f32 1.0, %v4229_v41  ;;  %v1911_v44 = vmul.f32 0.5, %v1727_v38 }
 0x30b   :  { %v2666_v12 = vmul.f32 %v2474_v13, %v1898_v43  ;;  %4240 = verf.f32 %v2101_v48  ;;  %3372 = vst [vmem:[#allocation2 + $0x1b8] sm:$0xff] %v3700_v29  ;;  %v2110_v58 = vmul.f32 0.70710677, %v6761_v34  ;;  %v1737_v47 = vadd.f32 %v6409_v20, %v5639_v11 }
 0x30c   :  { %v4231_v61 = vpop.eup %4230  ;;  %4242 = verf.f32 %v2102_v26  ;;  %v6770_v3 = vadd.f32 %v6413_v18, %v5643_v28  ;;  %v2673_v33 = vmul.f32 %v2481_v17, %v1905_v49  ;;  %v1912_v23 = vmul.f32 0.5, %v6737_v63 }
 0x30d   :  { %v4233_v35 = vpop.eup %4232  ;;  %v3703_v8 = vpack.c.bf16 %v2666_v12, %v2665_v55  ;;  %v2482_v5 = vadd.f32 1.0, %v4231_v61  ;;  %4244 = verf.f32 %v2109_v51  ;;  %v2115_v50 = vmul.f32 0.70710677, %v1737_v47 }
 0x30e   :  { %v4235_v16 = vpop.eup %4234  ;;  %v2487_v38 = vadd.f32 1.0, %v4233_v35  ;;  %4246 = verf.f32 %v2110_v58  ;;  %v1903_v32 = vmul.f32 0.5, %v1530_v31  ;;  %v2116_v20 = vmul.f32 0.70710677, %v6770_v3 }
 0x30f   :  { %3375 = vst [vmem:[#allocation2 + $0x1d0] sm:$0xff] %v3703_v8  ;;  %v2674_v57 = vmul.f32 %v2482_v5, %v1906_v46  ;;  %v2488_v14 = vadd.f32 1.0, %v4235_v16  ;;  %4248 = verf.f32 %v2115_v50  ;;  %v1540_v18 = vadd.f32 %v6423_v25, %v5726_v9  ;;  %v7143_v50 = vld [vmem:[#allocation33_spill] sm:$0xff] }
 0x310   :  { %v2679_v37 = vmul.f32 %v2487_v38, %v1911_v44  ;;  %v6778_v2 = vadd.f32 %v6430_v22, %v5731_v6  ;;  %4250 = verf.f32 %v2116_v20  ;;  %v6782_v43 = vadd.f32 %v7141_v1, %v5726_v9 }
 0x311   :  { %v4237_v36 = vpop.eup %4236  ;;  %v3707_v54 = vpack.c.bf16 %v2674_v57, %v2673_v33  ;;  %v2680_v63 = vmul.f32 %v2488_v14, %v1912_v23  ;;  %v1904_v45 = vmul.f32 0.5, %v6746_v59  ;;  %v1909_v7 = vmul.f32 0.5, %v1534_v4 }
 0x312   :  { %v4239_v31 = vpop.eup %4238  ;;  %v2479_v39 = vadd.f32 1.0, %v4237_v36  ;;  %v2107_v15 = vmul.f32 0.70710677, %v1540_v18  ;;  %v1910_v13 = vmul.f32 0.5, %v1536_v0  ;;  %v2108_v22 = vmul.f32 0.70710677, %v6778_v2 }
 0x313   :  { %3379 = vst [vmem:[#allocation2 + $0x1f0] sm:$0xff] %v3707_v54  ;;  %v3710_v25 = vpack.c.bf16 %v2680_v63, %v2679_v37  ;;  %v2480_v60 = vadd.f32 1.0, %v4239_v31  ;;  %v2113_v48 = vmul.f32 0.70710677, %v6782_v43  ;;  %v6789_v26 = vadd.f32 %v6442_v42, %v5731_v6 }
 0x314   :  { %v2671_v49 = vmul.f32 %v2479_v39, %v1903_v32  ;;  %4252 = verf.f32 %v2107_v15  ;;  %v6793_v59 = vadd.f32 %v6445_v62, %v5639_v11  ;;  %v6797_v4 = vadd.f32 %v6448_v53, %v5643_v28 }
 0x315   :  { %v4241_v41 = vpop.eup %4240  ;;  %3382 = vst [vmem:[#allocation2 + $0x208] sm:$0xff] %v3710_v25  ;;  %v2672_v29 = vmul.f32 %v2480_v60, %v1904_v45  ;;  %4254 = verf.f32 %v2108_v22  ;;  %v1917_v46 = vmul.f32 0.5, %v6757_v24  ;;  %v2114_v42 = vmul.f32 0.70710677, %v6789_v26  ;;  %v7145_v22 = vld [vmem:[#allocation19_spill] sm:$0xff] }
 0x316   :  { %v4243_v0 = vpop.eup %4242  ;;  %v2485_v55 = vadd.f32 1.0, %v4241_v41  ;;  %4256 = verf.f32 %v2113_v48  ;;  %v1918_v44 = vmul.f32 0.5, %v6761_v34  ;;  %v2121_v61 = vmul.f32 0.70710677, %v6793_v59  ;;  %v7142_v34 = vld [vmem:[#allocation32_spill] sm:$0xff] }
 0x317   :  { %v4245_v51 = vpop.eup %4244  ;;  %v3706_v12 = vpack.c.bf16 %v2672_v29, %v2671_v49  ;;  %v2486_v17 = vadd.f32 1.0, %v4243_v0  ;;  %v1923_v8 = vmul.f32 0.5, %v1737_v47  ;;  %4258 = verf.f32 %v2114_v42 }
 0x318   :  { %v4247_v62 = vpop.eup %4246  ;;  %v2677_v58 = vmul.f32 %v2485_v55, %v1909_v7  ;;  %v2493_v35 = vadd.f32 1.0, %v4245_v51  ;;  %4260 = verf.f32 %v2121_v61  ;;  %v2122_v24 = vmul.f32 0.70710677, %v6797_v4 }
 0x319   :  { %3378 = vst [vmem:[#allocation2 + $0x1e8] sm:$0xff] %v3706_v12  ;;  %v2678_v53 = vmul.f32 %v2486_v17, %v1910_v13  ;;  %v2494_v33 = vadd.f32 1.0, %v4247_v62  ;;  %v4249_v5 = vpop.eup %4248  ;;  %v1747_v38 = vadd.f32 %v6455_v52, %v5639_v11  ;;  %v6808_v23 = vadd.f32 %v7142_v34, %v5643_v28 }
 0x31a   :  { %v2685_v16 = vmul.f32 %v2493_v35, %v1917_v46  ;;  %v6812_v57 = vadd.f32 %v7143_v50, %v5726_v9  ;;  %v4251_v47 = vpop.eup %4250  ;;  %v2499_v20 = vadd.f32 1.0, %v4249_v5  ;;  %4262 = verf.f32 %v2122_v24 }
 0x31b   :  { %v3709_v14 = vpack.c.bf16 %v2678_v53, %v2677_v58  ;;  %v2686_v32 = vmul.f32 %v2494_v33, %v1918_v44  ;;  %v1924_v37 = vmul.f32 0.5, %v6770_v3  ;;  %v2500_v36 = vadd.f32 1.0, %v4251_v47 }
 0x31c   :  { %v1915_v54 = vmul.f32 0.5, %v1540_v18  ;;  %v2127_v63 = vmul.f32 0.70710677, %v1747_v38  ;;  %v2691_v1 = vmul.f32 %v2499_v20, %v1923_v8  ;;  %v1916_v31 = vmul.f32 0.5, %v6778_v2  ;;  %v7144_v18 = vld [vmem:[#allocation34_spill] sm:$0xff]  ;;  %v7148_v20 = vld [vmem:[#allocation35_spill] sm:$0xff] }
 0x31d   :  { %3381 = vst [vmem:[#allocation2 + $0x200] sm:$0xff] %v3709_v14  ;;  %v3713_v52 = vpack.c.bf16 %v2686_v32, %v2685_v16  ;;  %v2128_v39 = vmul.f32 0.70710677, %v6808_v23  ;;  %v2692_v7 = vmul.f32 %v2500_v36, %v1924_v37  ;;  %v2119_v15 = vmul.f32 0.70710677, %v6812_v57 }
 0x31e   :  { %v4253_v45 = vpop.eup %4252  ;;  %4264 = verf.f32 %v2127_v63  ;;  %v1552_v25 = vadd.f32 %v6473_v56, %v5731_v6  ;;  %v1554_v13 = vadd.f32 %v7144_v18, %v5726_v9  ;;  %v6824_v2 = vadd.f32 %v7145_v22, %v5731_v6 }
 0x31f   :  { %v4255_v60 = vpop.eup %4254  ;;  %3385 = vst [vmem:[#allocation2 + $0x220] sm:$0xff] %v3713_v52  ;;  %v2491_v3 = vadd.f32 1.0, %v4253_v45  ;;  %4266 = verf.f32 %v2128_v39  ;;  %v3716_v48 = vpack.c.bf16 %v2692_v7, %v2691_v1  ;;  %v1921_v29 = vmul.f32 0.5, %v6782_v43 }
 0x320   :  { %v4257_v49 = vpop.eup %4256  ;;  %v2492_v41 = vadd.f32 1.0, %v4255_v60  ;;  %4268 = verf.f32 %v2119_v15  ;;  %v1922_v56 = vmul.f32 0.5, %v6789_v26  ;;  %v2120_v46 = vmul.f32 0.70710677, %v1552_v25  ;;  %v7146_v26 = vld [vmem:[#allocation21_spill] sm:$0xff] }
 0x321   :  { %v2683_v0 = vmul.f32 %v2491_v3, %v1915_v54  ;;  %v2497_v55 = vadd.f32 1.0, %v4257_v49  ;;  %v4259_v42 = vpop.eup %4258  ;;  %3388 = vst [vmem:[#allocation2 + $0x238] sm:$0xff] %v3716_v48  ;;  %v1929_v12 = vmul.f32 0.5, %v6793_v59  ;;  %v2125_v17 = vmul.f32 0.70710677, %v1554_v13 }
 0x322   :  { %v2684_v51 = vmul.f32 %v2492_v41, %v1916_v31  ;;  %v2126_v44 = vmul.f32 0.70710677, %v6824_v2  ;;  %v4261_v61 = vpop.eup %4260  ;;  %v2498_v58 = vadd.f32 1.0, %v4259_v42  ;;  %4270 = verf.f32 %v2120_v46 }
 0x323   :  { %v2689_v62 = vmul.f32 %v2497_v55, %v1921_v29  ;;  %v1753_v43 = vadd.f32 %v6493_v21, %v5639_v11  ;;  %v2505_v8 = vadd.f32 1.0, %v4261_v61  ;;  %4272 = verf.f32 %v2125_v17  ;;  %v7147_v21 = vld [vmem:[#allocation22_spill] sm:$0xff] }
 0x324   :  { %v3712_v35 = vpack.c.bf16 %v2684_v51, %v2683_v0  ;;  %v1755_v53 = vadd.f32 %v7146_v26, %v5643_v28  ;;  %v4263_v33 = vpop.eup %4262  ;;  %v2690_v24 = vmul.f32 %v2498_v58, %v1922_v56  ;;  %v1930_v59 = vmul.f32 0.5, %v6797_v4  ;;  %v7149_v4 = vld [vmem:[#allocation36_spill] sm:$0xff]  ;;  %v7150_v0 = vld [vmem:[#allocation37_spill] sm:$0xff] }
 0x325   :  { %4274 = verf.f32 %v2126_v44  ;;  %v2133_v5 = vmul.f32 0.70710677, %v1753_v43  ;;  %v2697_v16 = vmul.f32 %v2505_v8, %v1929_v12  ;;  %v2506_v34 = vadd.f32 1.0, %v4263_v33  ;;  %v7152_v12 = vld [vmem:[#allocation25_spill] sm:$0xff] }
 0x326   :  { %3384 = vst [vmem:[#allocation2 + $0x218] sm:$0xff] %v3712_v35  ;;  %v1935_v50 = vmul.f32 0.5, %v1747_v38  ;;  %v2134_v47 = vmul.f32 0.70710677, %v1755_v53  ;;  %v3715_v14 = vpack.c.bf16 %v2690_v24, %v2689_v62  ;;  %v1757_v32 = vadd.f32 %v7147_v21, %v5639_v11 }
 0x327   :  { %4276 = verf.f32 %v2133_v5  ;;  %v6839_v37 = vadd.f32 %v7148_v20, %v5643_v28  ;;  %v2698_v54 = vmul.f32 %v2506_v34, %v1930_v59  ;;  %v6843_v63 = vadd.f32 %v7149_v4, %v5726_v9  ;;  %v7154_v4 = vld [vmem:[#allocation39_spill] sm:$0xff] }
 0x328   :  { %v4265_v36 = vpop.eup %4264  ;;  %4278 = verf.f32 %v2134_v47  ;;  %v6847_v38 = vadd.f32 %v6518_v40, %v5731_v6  ;;  %3387 = vst [vmem:[#allocation2 + $0x230] sm:$0xff] %v3715_v14  ;;  %v1936_v31 = vmul.f32 0.5, %v6808_v23  ;;  %v1927_v39 = vmul.f32 0.5, %v6812_v57 }
 0x329   :  { %v4267_v52 = vpop.eup %4266  ;;  %v2511_v1 = vadd.f32 1.0, %v4265_v36  ;;  %v2139_v45 = vmul.f32 0.70710677, %v1757_v32  ;;  %v3719_v15 = vpack.c.bf16 %v2698_v54, %v2697_v16  ;;  %v1928_v3 = vmul.f32 0.5, %v1552_v25  ;;  %v7151_v25 = vld [vmem:[#allocation23_spill] sm:$0xff]  ;;  %v7153_v16 = vld [vmem:[#allocation38_spill] sm:$0xff] }
 0x32a   :  { %v4269_v7 = vpop.eup %4268  ;;  %v2512_v60 = vadd.f32 1.0, %v4267_v52  ;;  %v2140_v18 = vmul.f32 0.70710677, %v6839_v37  ;;  %v2131_v40 = vmul.f32 0.70710677, %v6843_v63  ;;  %v1933_v41 = vmul.f32 0.5, %v1554_v13 }
 0x32b   :  { %v2703_v22 = vmul.f32 %v2511_v1, %v1935_v50  ;;  %v2503_v49 = vadd.f32 1.0, %v4269_v7  ;;  %4280 = verf.f32 %v2139_v45  ;;  %3391 = vst [vmem:[#allocation2 + $0x250] sm:$0xff] %v3719_v15  ;;  %v2132_v23 = vmul.f32 0.70710677, %v6847_v38 }
 0x32c   :  { %v2704_v48 = vmul.f32 %v2512_v60, %v1936_v31  ;;  %4282 = verf.f32 %v2140_v18  ;;  %v4271_v29 = vpop.eup %4270  ;;  %v1564_v55 = vadd.f32 %v7150_v0, %v5726_v9  ;;  %v6858_v56 = vadd.f32 %v7151_v25, %v5731_v6 }
 0x32d   :  { %v2695_v57 = vmul.f32 %v2503_v49, %v1927_v39  ;;  %4284 = verf.f32 %v2131_v40  ;;  %v4273_v46 = vpop.eup %4272  ;;  %v2504_v51 = vadd.f32 1.0, %v4271_v29  ;;  %v6862_v13 = vadd.f32 %v7152_v12, %v5639_v11 }
 0x32e   :  { %v3722_v42 = vpack.c.bf16 %v2704_v48, %v2703_v22  ;;  %4286 = verf.f32 %v2132_v23  ;;  %v2509_v44 = vadd.f32 1.0, %v4273_v46  ;;  %v1934_v61 = vmul.f32 0.5, %v6824_v2 }
 0x32f   :  { %v4275_v17 = vpop.eup %4274  ;;  %v1941_v62 = vmul.f32 0.5, %v1753_v43  ;;  %v2137_v58 = vmul.f32 0.70710677, %v1564_v55  ;;  %v2696_v35 = vmul.f32 %v2504_v51, %v1928_v3  ;;  %v1942_v26 = vmul.f32 0.5, %v1755_v53  ;;  %v7156_v3 = vld [vmem:[#allocation41_spill] sm:$0xff] }
 0x330   :  { %3394 = vst [vmem:[#allocation2 + $0x268] sm:$0xff] %v3722_v42  ;;  %v2510_v8 = vadd.f32 1.0, %v4275_v17  ;;  %v2138_v33 = vmul.f32 0.70710677, %v6858_v56  ;;  %v2701_v59 = vmul.f32 %v2509_v44, %v1933_v41  ;;  %v2145_v5 = vmul.f32 0.70710677, %v6862_v13 }
 0x331   :  { %v4277_v24 = vpop.eup %4276  ;;  %4288 = verf.f32 %v2137_v58  ;;  %v1765_v34 = vadd.f32 %v7153_v16, %v5643_v28  ;;  %v3718_v47 = vpack.c.bf16 %v2696_v35, %v2695_v57  ;;  %v1947_v21 = vmul.f32 0.5, %v1757_v32  ;;  %v7155_v32 = vld [vmem:[#allocation40_spill] sm:$0xff] }
 0x332   :  { %v4279_v50 = vpop.eup %4278  ;;  %v2702_v14 = vmul.f32 %v2510_v8, %v1934_v61  ;;  %v2517_v2 = vadd.f32 1.0, %v4277_v24  ;;  %4290 = verf.f32 %v2138_v33  ;;  %v6871_v54 = vadd.f32 %v6553_v10, %v5639_v11 }
 0x333   :  { %v2518_v43 = vadd.f32 1.0, %v4279_v50  ;;  %4292 = verf.f32 %v2145_v5  ;;  %v2146_v20 = vmul.f32 0.70710677, %v1765_v34  ;;  %3390 = vst [vmem:[#allocation2 + $0x248] sm:$0xff] %v3718_v47  ;;  %v6875_v52 = vadd.f32 %v7154_v4, %v5643_v28  ;;  %v7157_v50 = vld [vmem:[#allocation42_spill] sm:$0xff] }
 0x334   :  { %v3721_v53 = vpack.c.bf16 %v2702_v14, %v2701_v59  ;;  %v2709_v36 = vmul.f32 %v2517_v2, %v1941_v62  ;;  %v1948_v39 = vmul.f32 0.5, %v6839_v37  ;;  %v6880_v45 = vadd.f32 %v7155_v32, %v5726_v9 }
 0x335   :  { %v4281_v1 = vpop.eup %4280  ;;  %v2710_v31 = vmul.f32 %v2518_v43, %v1942_v26  ;;  %4294 = verf.f32 %v2146_v20  ;;  %v1939_v60 = vmul.f32 0.5, %v6843_v63  ;;  %v2151_v10 = vmul.f32 0.70710677, %v6871_v54 }
 0x336   :  { %v4283_v7 = vpop.eup %4282  ;;  %3393 = vst [vmem:[#allocation2 + $0x260] sm:$0xff] %v3721_v53  ;;  %v2523_v15 = vadd.f32 1.0, %v4281_v1  ;;  %v6886_v18 = vadd.f32 %v7156_v3, %v5731_v6  ;;  %v1940_v37 = vmul.f32 0.5, %v6847_v38  ;;  %v2152_v48 = vmul.f32 0.70710677, %v6875_v52 }
 0x337   :  { %v4285_v22 = vpop.eup %4284  ;;  %v3725_v49 = vpack.c.bf16 %v2710_v31, %v2709_v36  ;;  %v2524_v40 = vadd.f32 1.0, %v4283_v7  ;;  %4296 = verf.f32 %v2151_v10  ;;  %v2143_v57 = vmul.f32 0.70710677, %v6880_v45 }
 0x338   :  { %v4287_v41 = vpop.eup %4286  ;;  %v2715_v23 = vmul.f32 %v2523_v15, %v1947_v21  ;;  %v2515_v29 = vadd.f32 1.0, %v4285_v22  ;;  %v1945_v25 = vmul.f32 0.5, %v1564_v55  ;;  %4298 = verf.f32 %v2152_v48  ;;  %v7159_v21 = vld [vmem:[#allocation44_spill] sm:$0xff]  ;;  %v7161_v22 = vld [vmem:[#allocation5_spill] sm:$0xff] }
 0x339   :  { %3397 = vst [vmem:[#allocation2 + $0x280] sm:$0xff] %v3725_v49  ;;  %v2716_v63 = vmul.f32 %v2524_v40, %v1948_v39  ;;  %v2516_v0 = vadd.f32 1.0, %v4287_v41  ;;  %4300 = verf.f32 %v2143_v57  ;;  %v2144_v42 = vmul.f32 0.70710677, %v6886_v18 }
 0x33a   :  { %v2707_v46 = vmul.f32 %v2515_v29, %v1939_v60  ;;  %v6894_v38 = vadd.f32 %v6571_v27, %v5726_v9  ;;  %v6898_v44 = vadd.f32 %v6575_v19, %v5731_v6  ;;  %v6902_v61 = vadd.f32 %v6579_v30, %v5639_v11 }
 0x33b   :  { %v4289_v51 = vpop.eup %4288  ;;  %v3728_v12 = vpack.c.bf16 %v2716_v63, %v2715_v23  ;;  %v2708_v17 = vmul.f32 %v2516_v0, %v1940_v37  ;;  %v1946_v58 = vmul.f32 0.5, %v6858_v56  ;;  %4302 = verf.f32 %v2144_v42  ;;  %v7162_v0 = vld [vmem:[#allocation24_spill] sm:$0xff] }
 0x33c   :  { %v4291_v55 = vpop.eup %4290  ;;  %v2521_v62 = vadd.f32 1.0, %v4289_v51  ;;  %v2149_v35 = vmul.f32 0.70710677, %v6894_v38  ;;  %v1953_v33 = vmul.f32 0.5, %v6862_v13  ;;  %v2150_v19 = vmul.f32 0.70710677, %v6898_v44 }
 0x33d   :  { %v4293_v27 = vpop.eup %4292  ;;  %3400 = vst [vmem:[#allocation2 + $0x298] sm:$0xff] %v3728_v12  ;;  %v3724_v8 = vpack.c.bf16 %v2708_v17, %v2707_v46  ;;  %v2522_v26 = vadd.f32 1.0, %v4291_v55  ;;  %v1954_v5 = vmul.f32 0.5, %v1765_v34  ;;  %v2157_v56 = vmul.f32 0.70710677, %v6902_v61  ;;  %v7158_v13 = vld [vmem:[#allocation43_spill] sm:$0xff] }
 0x33e   :  { %v2713_v24 = vmul.f32 %v2521_v62, %v1945_v25  ;;  %v2529_v59 = vadd.f32 1.0, %v4293_v27  ;;  %4304 = verf.f32 %v2149_v35  ;;  %v6911_v47 = vadd.f32 %v7157_v50, %v5643_v28  ;;  %v7163_v46 = vld [vmem:[#allocation46_spill] sm:$0xff] }
 0x33f   :  { %v4295_v30 = vpop.eup %4294  ;;  %3396 = vst [vmem:[#allocation2 + $0x278] sm:$0xff] %v3724_v8  ;;  %v2714_v16 = vmul.f32 %v2522_v26, %v1946_v58  ;;  %4306 = verf.f32 %v2150_v19  ;;  %v6915_v43 = vadd.f32 %v7158_v13, %v5639_v11  ;;  %v6919_v34 = vadd.f32 %v7159_v21, %v5643_v28  ;;  %v7160_v28 = vld [vmem:[#allocation45_spill] sm:$0xff] }
 0x340   :  { %v2721_v14 = vmul.f32 %v2529_v59, %v1953_v33  ;;  %v2530_v2 = vadd.f32 1.0, %v4295_v30  ;;  %4308 = verf.f32 %v2157_v56  ;;  %v2158_v53 = vmul.f32 0.70710677, %v6911_v47 }
 0x341   :  { %v3727_v20 = vpack.c.bf16 %v2714_v16, %v2713_v24  ;;  %v4297_v36 = vpop.eup %4296  ;;  %v1959_v1 = vmul.f32 0.5, %v6871_v54  ;;  %v1960_v31 = vmul.f32 0.5, %v6875_v52  ;;  %v2163_v39 = vmul.f32 0.70710677, %v6915_v43 }
 0x342   :  { %v2722_v4 = vmul.f32 %v2530_v2, %v1954_v5  ;;  %v4299_v32 = vpop.eup %4298  ;;  %v2535_v11 = vadd.f32 1.0, %v4297_v36  ;;  %4310 = verf.f32 %v2158_v53  ;;  %v2164_v7 = vmul.f32 0.70710677, %v6919_v34 }
 0x343   :  { %3399 = vst [vmem:[#allocation2 + $0x290] sm:$0xff] %v3727_v20  ;;  %v1580_v15 = vadd.f32 %v7160_v28, %v5726_v9  ;;  %v4301_v60 = vpop.eup %4300  ;;  %v2536_v3 = vadd.f32 1.0, %v4299_v32  ;;  %4312 = verf.f32 %v2163_v39  ;;  %v1582_v54 = vadd.f32 %v7161_v22, %v5731_v6 }
 0x344   :  { %v3731_v10 = vpack.c.bf16 %v2722_v4, %v2721_v14  ;;  %v2727_v49 = vmul.f32 %v2535_v11, %v1959_v1  ;;  %v1951_v52 = vmul.f32 0.5, %v6880_v45  ;;  %v2527_v40 = vadd.f32 1.0, %v4301_v60 }
 0x345   :  { %4314 = verf.f32 %v2164_v7  ;;  %v4303_v37 = vpop.eup %4302  ;;  %v2728_v48 = vmul.f32 %v2536_v3, %v1960_v31  ;;  %v1952_v41 = vmul.f32 0.5, %v6886_v18  ;;  %v2155_v23 = vmul.f32 0.70710677, %v1580_v15 }
 0x346   :  { %3403 = vst [vmem:[#allocation2 + $0x2b0] sm:$0xff] %v3731_v10  ;;  %v2156_v29 = vmul.f32 0.70710677, %v1582_v54  ;;  %v2719_v57 = vmul.f32 %v2527_v40, %v1951_v52  ;;  %v2528_v63 = vadd.f32 1.0, %v4303_v37  ;;  %v1584_v25 = vadd.f32 %v7162_v0, %v5726_v9 }
 0x347   :  { %v1586_v42 = vadd.f32 %v7163_v46, %v5731_v6  ;;  %v3734_v12 = vpack.c.bf16 %v2728_v48, %v2727_v49  ;;  %4316 = verf.f32 %v2155_v23  ;;  %v1957_v55 = vmul.f32 0.5, %v6894_v38 }
 0x348   :  { %v4305_v51 = vpop.eup %4304  ;;  %v2720_v17 = vmul.f32 %v2528_v63, %v1952_v41  ;;  %4318 = verf.f32 %v2156_v29  ;;  %v1958_v18 = vmul.f32 0.5, %v6898_v44  ;;  %v2161_v35 = vmul.f32 0.70710677, %v1584_v25 }
 0x349   :  { %v4307_v45 = vpop.eup %4306  ;;  %v2533_v62 = vadd.f32 1.0, %v4305_v51  ;;  %3406 = vst [vmem:[#allocation2 + $0x2c8] sm:$0xff] %v3734_v12  ;;  %v2162_v27 = vmul.f32 0.70710677, %v1586_v42  ;;  %v1965_v6 = vmul.f32 0.5, %v6902_v61  ;;  %v1966_v30 = vmul.f32 0.5, %v6911_v47 }
 0x34a   :  { %v2534_v58 = vadd.f32 1.0, %v4307_v45  ;;  %v4309_v8 = vpop.eup %4308  ;;  %v3730_v9 = vpack.c.bf16 %v2720_v17, %v2719_v57  ;;  %4320 = verf.f32 %v2161_v35  ;;  %v1971_v56 = vmul.f32 0.5, %v6915_v43 }
 0x34b   :  { %v2725_v26 = vmul.f32 %v2533_v62, %v1957_v55  ;;  %v2541_v19 = vadd.f32 1.0, %v4309_v8  ;;  %4322 = verf.f32 %v2162_v27  ;;  %v1972_v2 = vmul.f32 0.5, %v6919_v34 }
 0x34c   :  { %v2726_v33 = vmul.f32 %v2534_v58, %v1958_v18  ;;  %v4311_v24 = vpop.eup %4310  ;;  %3402 = vst [vmem:[#allocation2 + $0x2a8] sm:$0xff] %v3730_v9  ;;  %v1963_v4 = vmul.f32 0.5, %v1580_v15  ;;  %v1964_v47 = vmul.f32 0.5, %v1582_v54  ;;  %v1969_v28 = vmul.f32 0.5, %v1584_v25 }
 0x34d   :  { %v4313_v38 = vpop.eup %4312  ;;  %v2733_v5 = vmul.f32 %v2541_v19, %v1965_v6  ;;  %v2542_v44 = vadd.f32 1.0, %v4311_v24  ;;  %v1970_v10 = vmul.f32 0.5, %v1586_v42 }
 0x34e   :  { %v3733_v59 = vpack.c.bf16 %v2726_v33, %v2725_v26  ;;  %v2547_v50 = vadd.f32 1.0, %v4313_v38 }
 0x34f   :  { %v4315_v16 = vpop.eup %4314  ;;  %v2734_v14 = vmul.f32 %v2542_v44, %v1966_v30 }
 0x350   :  { %3405 = vst [vmem:[#allocation2 + $0x2c0] sm:$0xff] %v3733_v59  ;;  %v2548_v61 = vadd.f32 1.0, %v4315_v16  ;;  %v2739_v13 = vmul.f32 %v2547_v50, %v1971_v56 }
 0x351   :  { %v4317_v21 = vpop.eup %4316  ;;  %v3737_v20 = vpack.c.bf16 %v2734_v14, %v2733_v5 }
 0x352   :  { %v2740_v53 = vmul.f32 %v2548_v61, %v1972_v2  ;;  %v4319_v36 = vpop.eup %4318  ;;  %v2539_v1 = vadd.f32 1.0, %v4317_v21 }
 0x353   :  { %3409 = vst [vmem:[#allocation2 + $0x2e0] sm:$0xff] %v3737_v20  ;;  %v2540_v39 = vadd.f32 1.0, %v4319_v36 }
 0x354   :  { %v3740_v31 = vpack.c.bf16 %v2740_v53, %v2739_v13  ;;  %v2731_v32 = vmul.f32 %v2539_v1, %v1963_v4  ;;  %v4321_v11 = vpop.eup %4320 }
 0x355   :  { %v2732_v43 = vmul.f32 %v2540_v39, %v1964_v47  ;;  %v4323_v7 = vpop.eup %4322  ;;  %v2545_v60 = vadd.f32 1.0, %v4321_v11 }
 0x356   :  { %3412 = vst [vmem:[#allocation2 + $0x2f8] sm:$0xff] %v3740_v31  ;;  %v2546_v3 = vadd.f32 1.0, %v4323_v7 }
 0x357   :  { %v3736_v34 = vpack.c.bf16 %v2732_v43, %v2731_v32  ;;  %v2737_v22 = vmul.f32 %v2545_v60, %v1969_v28 }
 0x358   :  { %v2738_v15 = vmul.f32 %v2546_v3, %v1970_v10 }
 0x359   :  { %3408 = vst [vmem:[#allocation2 + $0x2d8] sm:$0xff] %v3736_v34 }
 0x35a   :  { %v3739_v49 = vpack.c.bf16 %v2738_v15, %v2737_v22 }
 0x35c   :  { %3411 = vst [vmem:[#allocation2 + $0x2f0] sm:$0xff] %v3739_v49 }
 0x35d   :  { %4335 = shalt.err (!%p4332_p4)
}
 0x35e   :  { %s4336_s13 = scalar_lea.hbm %s6957_s3, 12288 }
 0x35f   :  { %p4337_p5 = scmp.ne.s32.totalorder %s6957_s3, %s4336_s13  ;;  %p4340_p6 = scmp.lt.u32.totalorder %s4336_s13, %s6957_s3 }
 0x361   :  { %p4342_p7 = pnand %p4340_p6, %p4337_p5 }
 0x363   :  { %4345 = shalt.err (!%p4342_p7)
}
 0x364   :  { %s4349_s18 = smov 384   ;;  %s4350_s19 = smov 24  }
 0x365   :  { %3424 = dma.vmem_to_hbm [thread:$0]  %s3419_s9, 12288, %s6957_s3, [#allocation3], %s4349_s18, %s4349_s18, %s4350_s19  }
 0x366   :  { %4346 = dma.done.wait [#allocation3], 12288  }
 0x367   :  { %4347 = vsyncadd [#allocation3], 4294955008 }
 0x368   :  { %3428 = vsyncpa [#allocation3], 1 }

</bundles_post_ra>
